<compile_context>
chip_gen: v7x
topology: tpu7x:2x2x1
jax: 0.10.0
libtpu: 0.0.40
codegen_flags: <defaults>
</compile_context>

<pallas_src>
import functools

import jax
import jax.numpy as jnp
import numpy as np
from jax import lax
from jax.experimental import pallas as pl
from jax.experimental.pallas import tpu as pltpu

_EPS = 1e-5                        # nn.BatchNorm2d default eps
_LANES = 128                       # lane-dense MXU columns (in-VMEM only)
_TARGET_ROWS = 1024                # rows (bt*Ho*Wo) per grid step
_VMEM_LIMIT = 48 * 1024 * 1024     # <= v7x physical VMEM, generous on v5e/v6e


# ----------------------------------------------------------------------------
# small helpers
# ----------------------------------------------------------------------------
def _round_up(x, m):
    return ((x + m - 1) // m) * m


def _pad_last(a, c_pad):
    if a.shape[-1] == c_pad:
        return a
    pads = [(0, 0)] * (a.ndim - 1) + [(0, c_pad - a.shape[-1])]
    return jnp.pad(a, pads)


def _pick_bt(n, rows_per_image, target_rows=_TARGET_ROWS):
    """Largest batch-tile that divides N, keeps the row tile <= target, and
    (when possible) leaves a grid of >= 2 so both v7x TensorCores get work."""
    divs = [d for d in range(1, n + 1) if n % d == 0]
    fits = [d for d in divs if d * rows_per_image <= target_rows] or [1]
    multi = [d for d in fits if n // d >= 2]
    return max(multi) if multi else max(fits)


# ----------------------------------------------------------------------------
# the one fused conv kernel (conv1, conv2-stats and conv2-apply all use it)
# ----------------------------------------------------------------------------
def _conv_kernel(*refs, mode, stride, bt, ho, wo, cout, has_extra, has_res):
    """Fused 3x3-conv block kernel; one batch-tile of full images per grid step.

    The conv is 9 shifted accumulating MXU matmuls read straight from the
    spatially pre-padded (or polyphase, for stride 2) activation block: the
    im2col taps matrix never exists in HBM.  Modes:
      "store": write raw conv output (bf16, compact channels) + BN partials.
      "stats": write only the BN partials (main branch + optional 1x1 branch).
      "apply": recompute the matmuls (cheaper than an HBM round trip of the raw
               output), apply folded BN scale/shift per branch, add residual /
               projection branch, ReLU, write the final output block.
    """
    i = 0
    x_ref = refs[i]; i += 1                       # padded input / 4 phase images
    w_ref = refs[i]; i += 1                       # (9, K, c_pad) bf16
    xe_ref = we_ref = None
    if has_extra:
        xe_ref = refs[i]; i += 1                  # (bt, ho, wo, Ke) bf16
        we_ref = refs[i]; i += 1                  # (Ke, c_pad) bf16
    scm_ref = shm_ref = sce_ref = she_ref = res_ref = None
    if mode == "apply":
        scm_ref = refs[i]; i += 1                 # (1, cout) f32
        shm_ref = refs[i]; i += 1
        if has_extra:
            sce_ref = refs[i]; i += 1
            she_ref = refs[i]; i += 1
        if has_res:
            res_ref = refs[i]; i += 1             # (bt, ho, wo, cout) f32
    if mode == "store":
        y_ref = refs[i]; i += 1
        st_ref = refs[i]; i += 1
    elif mode == "stats":
        st_ref = refs[i]; i += 1
        if has_extra:
            ste_ref = refs[i]; i += 1
    else:                                         # "apply"
        out_ref = refs[i]; i += 1
    acc_ref = refs[i]; i += 1                     # (m_t, c_pad) f32 scratch

    m_t = bt * ho * wo
    c_pad = w_ref.shape[2]

    def as_rows(v_f32):
        # (bt, ho, wo, k) f32 -> (bt*ho*wo, k) bf16.  The collapse keeps the
        # minor dim and wo is a multiple of 8, so it is a trivial re-labelling
        # of 8-row tiles; the bf16 cast afterwards feeds the MXU bf16 operands.
        k = v_f32.shape[-1]
        return v_f32.reshape(m_t, k).astype(jnp.bfloat16)

    # ---- main 3x3 conv: 9 shifted accumulating matmuls (fused im2col) -------
    for t in range(9):
        dh, dw = t // 3, t % 3
        if stride == 1:
            # leading-dim (batch/H) ref slice only: minor dims loaded at offset 0
            slab = x_ref[:, dh:dh + ho, :, :]
            b0 = dw
        else:
            # stride 2: un-strided window of the right polyphase image
            p = (dh % 2) * 2 + (dw % 2)
            slab = x_ref[p, :, dh // 2:dh // 2 + ho, :, :]
            b0 = dw // 2
        slab = slab.astype(jnp.float32)           # un-pack before minor-dim slicing
        v = slab[:, :, b0:b0 + wo, :]
        contrib = jnp.dot(as_rows(v), w_ref[t], preferred_element_type=jnp.float32)
        if t == 0:
            acc_ref[...] = contrib
        else:
            acc_ref[...] += contrib
    acc = acc_ref[...]

    # ---- optional fused 1x1 projection shortcut branch ----------------------
    if has_extra:
        acc_e = jnp.dot(as_rows(xe_ref[...].astype(jnp.float32)), we_ref[...],
                        preferred_element_type=jnp.float32)

    def partial_stats(a):                         # (1, 2, c_pad): row0=sum, row1=sumsq
        s = jnp.sum(a, axis=0, keepdims=True)
        ss = jnp.sum(a * a, axis=0, keepdims=True)
        row = lax.broadcasted_iota(jnp.int32, (2, c_pad), 0)
        return jnp.where(row == 0, s, ss)[None]

    if mode == "store":
        st_ref[...] = partial_stats(acc)
        y_ref[...] = acc[:, :cout].reshape(bt, ho, wo, cout).astype(y_ref.dtype)
    elif mode == "stats":
        st_ref[...] = partial_stats(acc)
        if has_extra:
            ste_ref[...] = partial_stats(acc_e)
    else:                                         # "apply"
        y = acc[:, :cout] * scm_ref[...] + shm_ref[...]
        if has_extra:
            y = y + acc_e[:, :cout] * sce_ref[...] + she_ref[...]
        if has_res:
            y = y + res_ref[...].astype(jnp.float32).reshape(m_t, cout)
        y = jnp.maximum(y, 0.0)
        out_ref[...] = y.reshape(bt, ho, wo, cout).astype(out_ref.dtype)


def _fused_conv(x_in, w, *, stride, bt, ho, wo, cout, mode,
                extra=None, bn_main=None, bn_extra=None, residual=None):
    """pallas_call wrapper for the fused conv kernel (batch-tiled grid)."""
    n = x_in.shape[1] if stride == 2 else x_in.shape[0]
    nb = n // bt
    c_pad = w.shape[-1]
    m_t = bt * ho * wo
    has_extra = extra is not None
    has_res = residual is not None

    inputs = [x_in, w]
    if stride == 1:
        x_spec = pl.BlockSpec((bt,) + x_in.shape[1:], lambda i: (i, 0, 0, 0))
    else:  # (4, N, Hph, Wph, Cin) polyphase stack
        x_spec = pl.BlockSpec((4, bt) + x_in.shape[2:], lambda i: (0, i, 0, 0, 0))
    in_specs = [x_spec, pl.BlockSpec(w.shape, lambda i: (0, 0, 0))]
    if has_extra:
        xe, we = extra
        inputs += [xe, we]
        in_specs += [pl.BlockSpec((bt,) + xe.shape[1:], lambda i: (i, 0, 0, 0)),
                     pl.BlockSpec(we.shape, lambda i: (0, 0))]
    if mode == "apply":
        sc_m, sh_m = bn_main
        inputs += [sc_m, sh_m]
        in_specs += [pl.BlockSpec(sc_m.shape, lambda i: (0, 0)),
                     pl.BlockSpec(sh_m.shape, lambda i: (0, 0))]
        if has_extra:
            sc_e, sh_e = bn_extra
            inputs += [sc_e, sh_e]
            in_specs += [pl.BlockSpec(sc_e.shape, lambda i: (0, 0)),
                         pl.BlockSpec(sh_e.shape, lambda i: (0, 0))]
        if has_res:
            inputs.append(residual)
            in_specs.append(pl.BlockSpec((bt, ho, wo, cout), lambda i: (i, 0, 0, 0)))

    stat_sds = jax.ShapeDtypeStruct((nb, 2, c_pad), jnp.float32)
    stat_spec = pl.BlockSpec((1, 2, c_pad), lambda i: (i, 0, 0))
    img_spec = pl.BlockSpec((bt, ho, wo, cout), lambda i: (i, 0, 0, 0))
    if mode == "store":
        out_shape = (jax.ShapeDtypeStruct((n, ho, wo, cout), jnp.bfloat16), stat_sds)
        out_specs = (img_spec, stat_spec)
    elif mode == "stats":
        out_shape = (stat_sds, stat_sds) if has_extra else stat_sds
        out_specs = (stat_spec, stat_spec) if has_extra else stat_spec
    else:
        out_shape = jax.ShapeDtypeStruct((n, ho, wo, cout), jnp.float32)
        out_specs = img_spec

    flops = 2 * n * ho * wo * 9 * w.shape[1] * c_pad
    if has_extra:
        flops += 2 * n * ho * wo * extra[1].shape[0] * c_pad
    bytes_acc = sum(int(np.prod(a.shape)) * jnp.dtype(a.dtype).itemsize for a in inputs)
    bytes_acc += nb * 2 * c_pad * 4
    if mode == "store":
        bytes_acc += n * ho * wo * cout * 2
    elif mode == "apply":
        bytes_acc += n * ho * wo * cout * 4

    kernel = functools.partial(
        _conv_kernel, mode=mode, stride=stride, bt=bt, ho=ho, wo=wo, cout=cout,
        has_extra=has_extra, has_res=has_res)

    return pl.pallas_call(
        kernel,
        out_shape=out_shape,
        grid=(nb,),
        in_specs=in_specs,
        out_specs=out_specs,
        scratch_shapes=[pltpu.VMEM((m_t, c_pad), jnp.float32)],
        compiler_params=pltpu.CompilerParams(
            dimension_semantics=("parallel",), vmem_limit_bytes=_VMEM_LIMIT),
        cost_estimate=pl.CostEstimate(flops=int(flops), transcendentals=0,
                                      bytes_accessed=int(bytes_acc)),
    )(*inputs)


# ----------------------------------------------------------------------------
# plain-JAX glue: fold global batch stats into per-channel scale/shift (tiny)
# ----------------------------------------------------------------------------
def _bn_affine(stats, gamma, beta, m_true):
    cout = gamma.shape[0]
    s = jnp.sum(stats[:, 0, :cout], axis=0)
    ss = jnp.sum(stats[:, 1, :cout], axis=0)
    mean = s / m_true
    # E[x^2] - mean^2 in f32: fine at CIFAR scale / bf16 tolerance (see review).
    var = jnp.maximum(ss / m_true - mean * mean, 0.0)
    inv = lax.rsqrt(var + _EPS)
    scale = gamma.astype(jnp.float32) * inv
    shift = beta.astype(jnp.float32) - mean * scale
    return scale.reshape(1, cout), shift.reshape(1, cout)


# ----------------------------------------------------------------------------
# ResidualBlock forward (training-mode BatchNorm = batch statistics), NHWC
# ----------------------------------------------------------------------------
def residual_block(x_nhwc, params, stride):
    N, H, W, Cin = x_nhwc.shape
    Cout = params["w1"].shape[-1]
    assert stride in (1, 2), "CIFAR ResidualBlock uses stride 1 or 2"
    if stride == 2:
        assert H % 2 == 0 and W % 2 == 0
    Ho, Wo = H // stride, W // stride
    assert Ho % 8 == 0 and Wo % 8 == 0, "output spatial dims must be multiples of 8"
    has_proj = Cin != Cout
    if not has_proj:
        assert stride == 1, "identity shortcut requires stride == 1 (as in PyTorch)"

    c_pad = _round_up(Cout, _LANES)       # lane-dense MXU columns (in-VMEM only)
    M = N * Ho * Wo                       # true per-channel element count for BN
    bt = _pick_bt(N, Ho * Wo)             # batch-tile: m_t = bt*Ho*Wo rows / step

    # ---- conv1 (3x3 / stride, pad 1) + BN1 batch statistics ------------------
    xpad = jnp.pad(x_nhwc, ((0, 0), (1, 1), (1, 1), (0, 0))).astype(jnp.bfloat16)
    if stride == 2:
        # polyphase split so every in-kernel tap window is un-strided
        x1_in = jnp.stack([xpad[:, r::2, c::2, :] for r in (0, 1) for c in (0, 1)],
                          axis=0)          # (4, N, Ho+1, Wo+1, Cin)
    else:
        x1_in = xpad                       # (N, H+2, W+2, Cin)
    w1 = _pad_last(params["w1"].reshape(9, Cin, Cout), c_pad).astype(jnp.bfloat16)
    # conv biases (b1/b2/bs) are intentionally unused: a per-channel constant
    # added before a training-mode BatchNorm cancels exactly.
    y1_raw, st1 = _fused_conv(x1_in, w1, stride=stride, bt=bt, ho=Ho, wo=Wo,
                              cout=Cout, mode="store")
    sc1, sh1 = _bn_affine(st1, params["g1"], params["be1"], M)

    # ---- BN1 apply + ReLU + zero-pad for conv2 (one fused XLA pass over bf16 y1)
    # TODO(synk): fold this apply+pad into conv2's input path with an in-VMEM
    # halo scratch once unaligned sublane stores are verified on all targets.
    y1a = jnp.maximum(y1_raw.astype(jnp.float32) * sc1 + sh1, 0.0)
    x2_in = jnp.pad(y1a, ((0, 0), (1, 1), (1, 1), (0, 0))).astype(jnp.bfloat16)
    w2 = _pad_last(params["w2"].reshape(9, Cout, Cout), c_pad).astype(jnp.bfloat16)

    # ---- conv2 (3x3 / 1, pad 1) [+ fused 1x1 projection shortcut]:
    #      pass 1 -> batch stats, pass 2 -> recompute + apply + residual + ReLU
    if has_proj:
        xs = x_nhwc[:, ::stride, ::stride, :].astype(jnp.bfloat16)   # (N,Ho,Wo,Cin)
        ws = _pad_last(params["ws"].reshape(Cin, Cout), c_pad).astype(jnp.bfloat16)
        st2, sts = _fused_conv(x2_in, w2, stride=1, bt=bt, ho=Ho, wo=Wo, cout=Cout,
                               mode="stats", extra=(xs, ws))
        bn2 = _bn_affine(st2, params["g2"], params["be2"], M)
        bns = _bn_affine(sts, params["gs"], params["bes"], M)
        out = _fused_conv(x2_in, w2, stride=1, bt=bt, ho=Ho, wo=Wo, cout=Cout,
                          mode="apply", extra=(xs, ws), bn_main=bn2, bn_extra=bns)
    else:
        st2 = _fused_conv(x2_in, w2, stride=1, bt=bt, ho=Ho, wo=Wo, cout=Cout,
                          mode="stats")
        bn2 = _bn_affine(st2, params["g2"], params["be2"], M)
        out = _fused_conv(x2_in, w2, stride=1, bt=bt, ho=Ho, wo=Wo, cout=Cout,
                          mode="apply", bn_main=bn2, residual=x_nhwc)
    return out                             # (N, Ho, Wo, Cout) f32


# ----------------------------------------------------------------------------
# pure-JAX reference (f32, includes conv biases - they cancel under BN)
# ----------------------------------------------------------------------------
def _bn_train_ref(y, g, b):
    mean = y.mean(axis=(0, 1, 2), keepdims=True)
    var = jnp.square(y - mean).mean(axis=(0, 1, 2), keepdims=True)
    return (y - mean) * lax.rsqrt(var + _EPS) * g + b


def _conv_ref(x, w, b, stride, pad):
    y = lax.conv_general_dilated(
        x, w, window_strides=(stride, stride), padding=((pad, pad), (pad, pad)),
        dimension_numbers=("NHWC", "HWIO", "NHWC"))
    return y + b.reshape(1, 1, 1, -1)


def residual_block_ref(x, params, stride):
    cin = x.shape[-1]
    cout = params["w1"].shape[-1]
    y = jax.nn.relu(_bn_train_ref(_conv_ref(x, params["w1"], params["b1"], stride, 1),
                                  params["g1"], params["be1"]))
    y = _bn_train_ref(_conv_ref(y, params["w2"], params["b2"], 1, 1),
                      params["g2"], params["be2"])
    if cin != cout:
        sc = _bn_train_ref(_conv_ref(x, params["ws"], params["bs"], stride, 0),
                           params["gs"], params["bes"])
    else:
        sc = x
    return jax.nn.relu(y + sc)


# ----------------------------------------------------------------------------
if __name__ == "__main__":
    def make_params(key, cin, cout, with_proj):
        ks = jax.random.split(key, 12)
        p = {
            "w1": 0.1 * jax.random.normal(ks[0], (3, 3, cin, cout), jnp.float32),
            "b1": 0.1 * jax.random.normal(ks[1], (cout,), jnp.float32),
            "g1": 1.0 + 0.05 * jax.random.normal(ks[2], (cout,), jnp.float32),
            "be1": 0.05 * jax.random.normal(ks[3], (cout,), jnp.float32),
            "w2": 0.1 * jax.random.normal(ks[4], (3, 3, cout, cout), jnp.float32),
            "b2": 0.1 * jax.random.normal(ks[5], (cout,), jnp.float32),
            "g2": 1.0 + 0.05 * jax.random.normal(ks[6], (cout,), jnp.float32),
            "be2": 0.05 * jax.random.normal(ks[7], (cout,), jnp.float32),
        }
        if with_proj:
            p.update({
                "ws": 0.1 * jax.random.normal(ks[8], (1, 1, cin, cout), jnp.float32),
                "bs": 0.1 * jax.random.normal(ks[9], (cout,), jnp.float32),
                "gs": 1.0 + 0.05 * jax.random.normal(ks[10], (cout,), jnp.float32),
                "bes": 0.05 * jax.random.normal(ks[11], (cout,), jnp.float32),
            })
        return p

    key = jax.random.PRNGKey(0)
    k1, k2, k3, k4 = jax.random.split(key, 4)

    # --- downsampling block with 1x1 projection shortcut (stride 2) -----------
    N, H, W, Cin, Cout, stride = 2, 16, 16, 4, 8, 2
    params = make_params(k1, Cin, Cout, True)
    x = jax.random.normal(k2, (N, H, W, Cin), jnp.float32)

    fwd = jax.jit(functools.partial(residual_block, stride=stride))
    out = jax.block_until_ready(fwd(x, params))
    ref = jax.block_until_ready(residual_block_ref(x, params, stride))
    assert out.shape == (N, H // stride, W // stride, Cout), out.shape
    assert np.all(np.isfinite(np.asarray(out)))
    # bf16 MXU operands -> compare against the f32 reference at bf16-level tolerance
    assert np.allclose(np.asarray(out), np.asarray(ref), atol=5e-2, rtol=5e-2)

    # --- identity-shortcut block (stride 1, Cin == Cout) -----------------------
    C = 8
    params_id = make_params(k3, C, C, False)
    x_id = jax.random.normal(k4, (N, H, W, C), jnp.float32)

    fwd_id = jax.jit(functools.partial(residual_block, stride=1))
    out_id = jax.block_until_ready(fwd_id(x_id, params_id))
    ref_id = jax.block_until_ready(residual_block_ref(x_id, params_id, 1))
    assert out_id.shape == (N, H, W, C), out_id.shape
    assert np.all(np.isfinite(np.asarray(out_id)))
    assert np.allclose(np.asarray(out_id), np.asarray(ref_id), atol=5e-2, rtol=5e-2)

    print("KERNEL_OK")
</pallas_src>

<mosaic_0001>
module attributes {stable_mosaic.version = 11 : i64} {
  func.func @_conv_kernel(%arg0: i32, %arg1: memref<4x1x9x9x4xbf16, #tpu.memory_space<vmem>>, %arg2: memref<9x4x128xbf16, #tpu.memory_space<vmem>>, %arg3: memref<1x8x8x8xbf16, #tpu.memory_space<vmem>>, %arg4: memref<1x2x128xf32, #tpu.memory_space<vmem>>, %arg5: memref<64x128xf32, #tpu.memory_space<vmem>>) attributes {dimension_semantics = [#tpu.dimension_semantics<parallel>], iteration_bounds = array<i64: 2>, scalar_prefetch = 0 : i64, scratch_operands = 1 : i64, tpu.core_type = #tpu.core_type<tc>, window_params = [{transform_indices = @transform_0, window_bounds = array<i64: 4, 1, 9, 9, 4>}, {pipeline_mode = #tpu.pipeline_mode<synchronous>, transform_indices = @transform_1, window_bounds = array<i64: 9, 4, 128>}, {transform_indices = @transform_2, window_bounds = array<i64: 1, 8, 8, 8>}, {transform_indices = @transform_3, window_bounds = array<i64: 1, 2, 128>}]} {
    %c0 = arith.constant 0 : index
    %c0_0 = arith.constant 0 : index
    %c0_1 = arith.constant 0 : index
    %c0_2 = arith.constant 0 : index
    %c0_3 = arith.constant 0 : index
    %0 = vector.load %arg1[%c0, %c0_0, %c0_1, %c0_2, %c0_3] : memref<4x1x9x9x4xbf16, #tpu.memory_space<vmem>>, vector<1x1x8x9x4xbf16>
    %1 = vector.shape_cast %0 : vector<1x1x8x9x4xbf16> to vector<1x8x9x4xbf16>
    %2 = arith.extf %1 : vector<1x8x9x4xbf16> to vector<1x8x9x4xf32>
    %3 = vector.extract_strided_slice %2 {offsets = [0, 0, 0, 0], sizes = [1, 8, 8, 4], strides = [1, 1, 1, 1]} : vector<1x8x9x4xf32> to vector<1x8x8x4xf32>
    %4 = vector.shape_cast %3 : vector<1x8x8x4xf32> to vector<64x4xf32>
    %5 = arith.truncf %4 : vector<64x4xf32> to vector<64x4xbf16>
    %c0_4 = arith.constant 0 : index
    %c0_5 = arith.constant 0 : index
    %c0_6 = arith.constant 0 : index
    %6 = vector.load %arg2[%c0_4, %c0_5, %c0_6] : memref<9x4x128xbf16, #tpu.memory_space<vmem>>, vector<1x4x128xbf16>
    %7 = vector.shape_cast %6 : vector<1x4x128xbf16> to vector<4x128xbf16>
    %cst = arith.constant dense<0.000000e+00> : vector<64x128xf32>
    %8 = tpu.matmul %5, %7, %cst {dimension_numbers = #tpu.dot_dimension_numbers<[1], [0], [0], [1], [0, 0, 1, 1], [], []>} : vector<64x4xbf16>, vector<4x128xbf16>, vector<64x128xf32> -> vector<64x128xf32>
    %c0_7 = arith.constant 0 : index
    %c0_8 = arith.constant 0 : index
    %9 = vector.load %arg5[%c0_7, %c0_8] : memref<64x128xf32, #tpu.memory_space<vmem>>, vector<64x128xf32>
    tpu.vector_store %arg5[%c0_7, %c0_8], %8 {strides = array<i32>} : memref<64x128xf32, #tpu.memory_space<vmem>>, vector<64x128xf32>,
    %c1 = arith.constant 1 : index
    %c0_9 = arith.constant 0 : index
    %c0_10 = arith.constant 0 : index
    %c0_11 = arith.constant 0 : index
    %c0_12 = arith.constant 0 : index
    %10 = vector.load %arg1[%c1, %c0_9, %c0_10, %c0_11, %c0_12] : memref<4x1x9x9x4xbf16, #tpu.memory_space<vmem>>, vector<1x1x8x9x4xbf16>
    %11 = vector.shape_cast %10 : vector<1x1x8x9x4xbf16> to vector<1x8x9x4xbf16>
    %12 = arith.extf %11 : vector<1x8x9x4xbf16> to vector<1x8x9x4xf32>
    %13 = vector.extract_strided_slice %12 {offsets = [0, 0, 0, 0], sizes = [1, 8, 8, 4], strides = [1, 1, 1, 1]} : vector<1x8x9x4xf32> to vector<1x8x8x4xf32>
    %14 = vector.shape_cast %13 : vector<1x8x8x4xf32> to vector<64x4xf32>
    %15 = arith.truncf %14 : vector<64x4xf32> to vector<64x4xbf16>
    %c1_13 = arith.constant 1 : index
    %c0_14 = arith.constant 0 : index
    %c0_15 = arith.constant 0 : index
    %16 = vector.load %arg2[%c1_13, %c0_14, %c0_15] : memref<9x4x128xbf16, #tpu.memory_space<vmem>>, vector<1x4x128xbf16>
    %17 = vector.shape_cast %16 : vector<1x4x128xbf16> to vector<4x128xbf16>
    %cst_16 = arith.constant dense<0.000000e+00> : vector<64x128xf32>
    %18 = tpu.matmul %15, %17, %cst_16 {dimension_numbers = #tpu.dot_dimension_numbers<[1], [0], [0], [1], [0, 0, 1, 1], [], []>} : vector<64x4xbf16>, vector<4x128xbf16>, vector<64x128xf32> -> vector<64x128xf32>
    %c0_17 = arith.constant 0 : index
    %c0_18 = arith.constant 0 : index
    %19 = vector.load %arg5[%c0_17, %c0_18] : memref<64x128xf32, #tpu.memory_space<vmem>>, vector<64x128xf32>
    %20 = arith.addf %19, %18 : vector<64x128xf32>
    %c0_19 = arith.constant 0 : index
    %c0_20 = arith.constant 0 : index
    %21 = vector.load %arg5[%c0_19, %c0_20] : memref<64x128xf32, #tpu.memory_space<vmem>>, vector<64x128xf32>
    tpu.vector_store %arg5[%c0_19, %c0_20], %20 {strides = array<i32>} : memref<64x128xf32, #tpu.memory_space<vmem>>, vector<64x128xf32>,
    %c0_21 = arith.constant 0 : index
    %c0_22 = arith.constant 0 : index
    %c0_23 = arith.constant 0 : index
    %c0_24 = arith.constant 0 : index
    %c0_25 = arith.constant 0 : index
    %22 = vector.load %arg1[%c0_21, %c0_22, %c0_23, %c0_24, %c0_25] : memref<4x1x9x9x4xbf16, #tpu.memory_space<vmem>>, vector<1x1x8x9x4xbf16>
    %23 = vector.shape_cast %22 : vector<1x1x8x9x4xbf16> to vector<1x8x9x4xbf16>
    %24 = arith.extf %23 : vector<1x8x9x4xbf16> to vector<1x8x9x4xf32>
    %25 = vector.extract_strided_slice %24 {offsets = [0, 0, 1, 0], sizes = [1, 8, 8, 4], strides = [1, 1, 1, 1]} : vector<1x8x9x4xf32> to vector<1x8x8x4xf32>
    %26 = vector.shape_cast %25 : vector<1x8x8x4xf32> to vector<64x4xf32>
    %27 = arith.truncf %26 : vector<64x4xf32> to vector<64x4xbf16>
    %c2 = arith.constant 2 : index
    %c0_26 = arith.constant 0 : index
    %c0_27 = arith.constant 0 : index
    %28 = vector.load %arg2[%c2, %c0_26, %c0_27] : memref<9x4x128xbf16, #tpu.memory_space<vmem>>, vector<1x4x128xbf16>
    %29 = vector.shape_cast %28 : vector<1x4x128xbf16> to vector<4x128xbf16>
    %cst_28 = arith.constant dense<0.000000e+00> : vector<64x128xf32>
    %30 = tpu.matmul %27, %29, %cst_28 {dimension_numbers = #tpu.dot_dimension_numbers<[1], [0], [0], [1], [0, 0, 1, 1], [], []>} : vector<64x4xbf16>, vector<4x128xbf16>, vector<64x128xf32> -> vector<64x128xf32>
    %c0_29 = arith.constant 0 : index
    %c0_30 = arith.constant 0 : index
    %31 = vector.load %arg5[%c0_29, %c0_30] : memref<64x128xf32, #tpu.memory_space<vmem>>, vector<64x128xf32>
    %32 = arith.addf %31, %30 : vector<64x128xf32>
    %c0_31 = arith.constant 0 : index
    %c0_32 = arith.constant 0 : index
    %33 = vector.load %arg5[%c0_31, %c0_32] : memref<64x128xf32, #tpu.memory_space<vmem>>, vector<64x128xf32>
    tpu.vector_store %arg5[%c0_31, %c0_32], %32 {strides = array<i32>} : memref<64x128xf32, #tpu.memory_space<vmem>>, vector<64x128xf32>,
    %c2_33 = arith.constant 2 : index
    %c0_34 = arith.constant 0 : index
    %c0_35 = arith.constant 0 : index
    %c0_36 = arith.constant 0 : index
    %c0_37 = arith.constant 0 : index
    %34 = vector.load %arg1[%c2_33, %c0_34, %c0_35, %c0_36, %c0_37] : memref<4x1x9x9x4xbf16, #tpu.memory_space<vmem>>, vector<1x1x8x9x4xbf16>
    %35 = vector.shape_cast %34 : vector<1x1x8x9x4xbf16> to vector<1x8x9x4xbf16>
    %36 = arith.extf %35 : vector<1x8x9x4xbf16> to vector<1x8x9x4xf32>
    %37 = vector.extract_strided_slice %36 {offsets = [0, 0, 0, 0], sizes = [1, 8, 8, 4], strides = [1, 1, 1, 1]} : vector<1x8x9x4xf32> to vector<1x8x8x4xf32>
    %38 = vector.shape_cast %37 : vector<1x8x8x4xf32> to vector<64x4xf32>
    %39 = arith.truncf %38 : vector<64x4xf32> to vector<64x4xbf16>
    %c3 = arith.constant 3 : index
    %c0_38 = arith.constant 0 : index
    %c0_39 = arith.constant 0 : index
    %40 = vector.load %arg2[%c3, %c0_38, %c0_39] : memref<9x4x128xbf16, #tpu.memory_space<vmem>>, vector<1x4x128xbf16>
    %41 = vector.shape_cast %40 : vector<1x4x128xbf16> to vector<4x128xbf16>
    %cst_40 = arith.constant dense<0.000000e+00> : vector<64x128xf32>
    %42 = tpu.matmul %39, %41, %cst_40 {dimension_numbers = #tpu.dot_dimension_numbers<[1], [0], [0], [1], [0, 0, 1, 1], [], []>} : vector<64x4xbf16>, vector<4x128xbf16>, vector<64x128xf32> -> vector<64x128xf32>
    %c0_41 = arith.constant 0 : index
    %c0_42 = arith.constant 0 : index
    %43 = vector.load %arg5[%c0_41, %c0_42] : memref<64x128xf32, #tpu.memory_space<vmem>>, vector<64x128xf32>
    %44 = arith.addf %43, %42 : vector<64x128xf32>
    %c0_43 = arith.constant 0 : index
    %c0_44 = arith.constant 0 : index
    %45 = vector.load %arg5[%c0_43, %c0_44] : memref<64x128xf32, #tpu.memory_space<vmem>>, vector<64x128xf32>
    tpu.vector_store %arg5[%c0_43, %c0_44], %44 {strides = array<i32>} : memref<64x128xf32, #tpu.memory_space<vmem>>, vector<64x128xf32>,
    %c3_45 = arith.constant 3 : index
    %c0_46 = arith.constant 0 : index
    %c0_47 = arith.constant 0 : index
    %c0_48 = arith.constant 0 : index
    %c0_49 = arith.constant 0 : index
    %46 = vector.load %arg1[%c3_45, %c0_46, %c0_47, %c0_48, %c0_49] : memref<4x1x9x9x4xbf16, #tpu.memory_space<vmem>>, vector<1x1x8x9x4xbf16>
    %47 = vector.shape_cast %46 : vector<1x1x8x9x4xbf16> to vector<1x8x9x4xbf16>
    %48 = arith.extf %47 : vector<1x8x9x4xbf16> to vector<1x8x9x4xf32>
    %49 = vector.extract_strided_slice %48 {offsets = [0, 0, 0, 0], sizes = [1, 8, 8, 4], strides = [1, 1, 1, 1]} : vector<1x8x9x4xf32> to vector<1x8x8x4xf32>
    %50 = vector.shape_cast %49 : vector<1x8x8x4xf32> to vector<64x4xf32>
    %51 = arith.truncf %50 : vector<64x4xf32> to vector<64x4xbf16>
    %c4 = arith.constant 4 : index
    %c0_50 = arith.constant 0 : index
    %c0_51 = arith.constant 0 : index
    %52 = vector.load %arg2[%c4, %c0_50, %c0_51] : memref<9x4x128xbf16, #tpu.memory_space<vmem>>, vector<1x4x128xbf16>
    %53 = vector.shape_cast %52 : vector<1x4x128xbf16> to vector<4x128xbf16>
    %cst_52 = arith.constant dense<0.000000e+00> : vector<64x128xf32>
    %54 = tpu.matmul %51, %53, %cst_52 {dimension_numbers = #tpu.dot_dimension_numbers<[1], [0], [0], [1], [0, 0, 1, 1], [], []>} : vector<64x4xbf16>, vector<4x128xbf16>, vector<64x128xf32> -> vector<64x128xf32>
    %c0_53 = arith.constant 0 : index
    %c0_54 = arith.constant 0 : index
    %55 = vector.load %arg5[%c0_53, %c0_54] : memref<64x128xf32, #tpu.memory_space<vmem>>, vector<64x128xf32>
    %56 = arith.addf %55, %54 : vector<64x128xf32>
    %c0_55 = arith.constant 0 : index
    %c0_56 = arith.constant 0 : index
    %57 = vector.load %arg5[%c0_55, %c0_56] : memref<64x128xf32, #tpu.memory_space<vmem>>, vector<64x128xf32>
    tpu.vector_store %arg5[%c0_55, %c0_56], %56 {strides = array<i32>} : memref<64x128xf32, #tpu.memory_space<vmem>>, vector<64x128xf32>,
    %c2_57 = arith.constant 2 : index
    %c0_58 = arith.constant 0 : index
    %c0_59 = arith.constant 0 : index
    %c0_60 = arith.constant 0 : index
    %c0_61 = arith.constant 0 : index
    %58 = vector.load %arg1[%c2_57, %c0_58, %c0_59, %c0_60, %c0_61] : memref<4x1x9x9x4xbf16, #tpu.memory_space<vmem>>, vector<1x1x8x9x4xbf16>
    %59 = vector.shape_cast %58 : vector<1x1x8x9x4xbf16> to vector<1x8x9x4xbf16>
    %60 = arith.extf %59 : vector<1x8x9x4xbf16> to vector<1x8x9x4xf32>
    %61 = vector.extract_strided_slice %60 {offsets = [0, 0, 1, 0], sizes = [1, 8, 8, 4], strides = [1, 1, 1, 1]} : vector<1x8x9x4xf32> to vector<1x8x8x4xf32>
    %62 = vector.shape_cast %61 : vector<1x8x8x4xf32> to vector<64x4xf32>
    %63 = arith.truncf %62 : vector<64x4xf32> to vector<64x4xbf16>
    %c5 = arith.constant 5 : index
    %c0_62 = arith.constant 0 : index
    %c0_63 = arith.constant 0 : index
    %64 = vector.load %arg2[%c5, %c0_62, %c0_63] : memref<9x4x128xbf16, #tpu.memory_space<vmem>>, vector<1x4x128xbf16>
    %65 = vector.shape_cast %64 : vector<1x4x128xbf16> to vector<4x128xbf16>
    %cst_64 = arith.constant dense<0.000000e+00> : vector<64x128xf32>
    %66 = tpu.matmul %63, %65, %cst_64 {dimension_numbers = #tpu.dot_dimension_numbers<[1], [0], [0], [1], [0, 0, 1, 1], [], []>} : vector<64x4xbf16>, vector<4x128xbf16>, vector<64x128xf32> -> vector<64x128xf32>
    %c0_65 = arith.constant 0 : index
    %c0_66 = arith.constant 0 : index
    %67 = vector.load %arg5[%c0_65, %c0_66] : memref<64x128xf32, #tpu.memory_space<vmem>>, vector<64x128xf32>
    %68 = arith.addf %67, %66 : vector<64x128xf32>
    %c0_67 = arith.constant 0 : index
    %c0_68 = arith.constant 0 : index
    %69 = vector.load %arg5[%c0_67, %c0_68] : memref<64x128xf32, #tpu.memory_space<vmem>>, vector<64x128xf32>
    tpu.vector_store %arg5[%c0_67, %c0_68], %68 {strides = array<i32>} : memref<64x128xf32, #tpu.memory_space<vmem>>, vector<64x128xf32>,
    %c0_69 = arith.constant 0 : index
    %c0_70 = arith.constant 0 : index
    %c1_71 = arith.constant 1 : index
    %c0_72 = arith.constant 0 : index
    %c0_73 = arith.constant 0 : index
    %70 = vector.load %arg1[%c0_69, %c0_70, %c1_71, %c0_72, %c0_73] : memref<4x1x9x9x4xbf16, #tpu.memory_space<vmem>>, vector<1x1x8x9x4xbf16>
    %71 = vector.shape_cast %70 : vector<1x1x8x9x4xbf16> to vector<1x8x9x4xbf16>
    %72 = arith.extf %71 : vector<1x8x9x4xbf16> to vector<1x8x9x4xf32>
    %73 = vector.extract_strided_slice %72 {offsets = [0, 0, 0, 0], sizes = [1, 8, 8, 4], strides = [1, 1, 1, 1]} : vector<1x8x9x4xf32> to vector<1x8x8x4xf32>
    %74 = vector.shape_cast %73 : vector<1x8x8x4xf32> to vector<64x4xf32>
    %75 = arith.truncf %74 : vector<64x4xf32> to vector<64x4xbf16>
    %c6 = arith.constant 6 : index
    %c0_74 = arith.constant 0 : index
    %c0_75 = arith.constant 0 : index
    %76 = vector.load %arg2[%c6, %c0_74, %c0_75] : memref<9x4x128xbf16, #tpu.memory_space<vmem>>, vector<1x4x128xbf16>
    %77 = vector.shape_cast %76 : vector<1x4x128xbf16> to vector<4x128xbf16>
    %cst_76 = arith.constant dense<0.000000e+00> : vector<64x128xf32>
    %78 = tpu.matmul %75, %77, %cst_76 {dimension_numbers = #tpu.dot_dimension_numbers<[1], [0], [0], [1], [0, 0, 1, 1], [], []>} : vector<64x4xbf16>, vector<4x128xbf16>, vector<64x128xf32> -> vector<64x128xf32>
    %c0_77 = arith.constant 0 : index
    %c0_78 = arith.constant 0 : index
    %79 = vector.load %arg5[%c0_77, %c0_78] : memref<64x128xf32, #tpu.memory_space<vmem>>, vector<64x128xf32>
    %80 = arith.addf %79, %78 : vector<64x128xf32>
    %c0_79 = arith.constant 0 : index
    %c0_80 = arith.constant 0 : index
    %81 = vector.load %arg5[%c0_79, %c0_80] : memref<64x128xf32, #tpu.memory_space<vmem>>, vector<64x128xf32>
    tpu.vector_store %arg5[%c0_79, %c0_80], %80 {strides = array<i32>} : memref<64x128xf32, #tpu.memory_space<vmem>>, vector<64x128xf32>,
    %c1_81 = arith.constant 1 : index
    %c0_82 = arith.constant 0 : index
    %c1_83 = arith.constant 1 : index
    %c0_84 = arith.constant 0 : index
    %c0_85 = arith.constant 0 : index
    %82 = vector.load %arg1[%c1_81, %c0_82, %c1_83, %c0_84, %c0_85] : memref<4x1x9x9x4xbf16, #tpu.memory_space<vmem>>, vector<1x1x8x9x4xbf16>
    %83 = vector.shape_cast %82 : vector<1x1x8x9x4xbf16> to vector<1x8x9x4xbf16>
    %84 = arith.extf %83 : vector<1x8x9x4xbf16> to vector<1x8x9x4xf32>
    %85 = vector.extract_strided_slice %84 {offsets = [0, 0, 0, 0], sizes = [1, 8, 8, 4], strides = [1, 1, 1, 1]} : vector<1x8x9x4xf32> to vector<1x8x8x4xf32>
    %86 = vector.shape_cast %85 : vector<1x8x8x4xf32> to vector<64x4xf32>
    %87 = arith.truncf %86 : vector<64x4xf32> to vector<64x4xbf16>
    %c7 = arith.constant 7 : index
    %c0_86 = arith.constant 0 : index
    %c0_87 = arith.constant 0 : index
    %88 = vector.load %arg2[%c7, %c0_86, %c0_87] : memref<9x4x128xbf16, #tpu.memory_space<vmem>>, vector<1x4x128xbf16>
    %89 = vector.shape_cast %88 : vector<1x4x128xbf16> to vector<4x128xbf16>
    %cst_88 = arith.constant dense<0.000000e+00> : vector<64x128xf32>
    %90 = tpu.matmul %87, %89, %cst_88 {dimension_numbers = #tpu.dot_dimension_numbers<[1], [0], [0], [1], [0, 0, 1, 1], [], []>} : vector<64x4xbf16>, vector<4x128xbf16>, vector<64x128xf32> -> vector<64x128xf32>
    %c0_89 = arith.constant 0 : index
    %c0_90 = arith.constant 0 : index
    %91 = vector.load %arg5[%c0_89, %c0_90] : memref<64x128xf32, #tpu.memory_space<vmem>>, vector<64x128xf32>
    %92 = arith.addf %91, %90 : vector<64x128xf32>
    %c0_91 = arith.constant 0 : index
    %c0_92 = arith.constant 0 : index
    %93 = vector.load %arg5[%c0_91, %c0_92] : memref<64x128xf32, #tpu.memory_space<vmem>>, vector<64x128xf32>
    tpu.vector_store %arg5[%c0_91, %c0_92], %92 {strides = array<i32>} : memref<64x128xf32, #tpu.memory_space<vmem>>, vector<64x128xf32>,
    %c0_93 = arith.constant 0 : index
    %c0_94 = arith.constant 0 : index
    %c1_95 = arith.constant 1 : index
    %c0_96 = arith.constant 0 : index
    %c0_97 = arith.constant 0 : index
    %94 = vector.load %arg1[%c0_93, %c0_94, %c1_95, %c0_96, %c0_97] : memref<4x1x9x9x4xbf16, #tpu.memory_space<vmem>>, vector<1x1x8x9x4xbf16>
    %95 = vector.shape_cast %94 : vector<1x1x8x9x4xbf16> to vector<1x8x9x4xbf16>
    %96 = arith.extf %95 : vector<1x8x9x4xbf16> to vector<1x8x9x4xf32>
    %97 = vector.extract_strided_slice %96 {offsets = [0, 0, 1, 0], sizes = [1, 8, 8, 4], strides = [1, 1, 1, 1]} : vector<1x8x9x4xf32> to vector<1x8x8x4xf32>
    %98 = vector.shape_cast %97 : vector<1x8x8x4xf32> to vector<64x4xf32>
    %99 = arith.truncf %98 : vector<64x4xf32> to vector<64x4xbf16>
    %c8 = arith.constant 8 : index
    %c0_98 = arith.constant 0 : index
    %c0_99 = arith.constant 0 : index
    %100 = vector.load %arg2[%c8, %c0_98, %c0_99] : memref<9x4x128xbf16, #tpu.memory_space<vmem>>, vector<1x4x128xbf16>
    %101 = vector.shape_cast %100 : vector<1x4x128xbf16> to vector<4x128xbf16>
    %cst_100 = arith.constant dense<0.000000e+00> : vector<64x128xf32>
    %102 = tpu.matmul %99, %101, %cst_100 {dimension_numbers = #tpu.dot_dimension_numbers<[1], [0], [0], [1], [0, 0, 1, 1], [], []>} : vector<64x4xbf16>, vector<4x128xbf16>, vector<64x128xf32> -> vector<64x128xf32>
    %c0_101 = arith.constant 0 : index
    %c0_102 = arith.constant 0 : index
    %103 = vector.load %arg5[%c0_101, %c0_102] : memref<64x128xf32, #tpu.memory_space<vmem>>, vector<64x128xf32>
    %104 = arith.addf %103, %102 : vector<64x128xf32>
    %c0_103 = arith.constant 0 : index
    %c0_104 = arith.constant 0 : index
    %105 = vector.load %arg5[%c0_103, %c0_104] : memref<64x128xf32, #tpu.memory_space<vmem>>, vector<64x128xf32>
    tpu.vector_store %arg5[%c0_103, %c0_104], %104 {strides = array<i32>} : memref<64x128xf32, #tpu.memory_space<vmem>>, vector<64x128xf32>,
    %c0_105 = arith.constant 0 : index
    %c0_106 = arith.constant 0 : index
    %106 = vector.load %arg5[%c0_105, %c0_106] : memref<64x128xf32, #tpu.memory_space<vmem>>, vector<64x128xf32>
    %cst_107 = arith.constant dense<0.000000e+00> : vector<128xf32>
    %107 = vector.multi_reduction <add>, %106, %cst_107 [0] : vector<64x128xf32> to vector<128xf32>
    %108 = vector.shape_cast %107 : vector<128xf32> to vector<1x128xf32>
    %109 = arith.mulf %106, %106 : vector<64x128xf32>
    %cst_108 = arith.constant dense<0.000000e+00> : vector<128xf32>
    %110 = vector.multi_reduction <add>, %109, %cst_108 [0] : vector<64x128xf32> to vector<128xf32>
    %111 = vector.shape_cast %110 : vector<128xf32> to vector<1x128xf32>
    %112 = tpu.iota {dimensions = array<i32: 0>} : vector<2x128xi32>
    %c0_i32 = arith.constant 0 : i32
    %113 = vector.broadcast %c0_i32 : i32 to vector<2x128xi32>
    %114 = arith.cmpi eq, %112, %113 : vector<2x128xi32>
    %115 = vector.shape_cast %108 : vector<1x128xf32> to vector<1x128xf32>
    %116 = vector.broadcast %115 : vector<1x128xf32> to vector<2x128xf32>
    %117 = vector.shape_cast %111 : vector<1x128xf32> to vector<1x128xf32>
    %118 = vector.broadcast %117 : vector<1x128xf32> to vector<2x128xf32>
    %119 = arith.select %114, %116, %118 : vector<2x128xi1>, vector<2x128xf32>
    %120 = vector.shape_cast %119 : vector<2x128xf32> to vector<1x2x128xf32>
    %c0_109 = arith.constant 0 : index
    %c0_110 = arith.constant 0 : index
    %c0_111 = arith.constant 0 : index
    %121 = vector.load %arg4[%c0_109, %c0_110, %c0_111] : memref<1x2x128xf32, #tpu.memory_space<vmem>>, vector<1x2x128xf32>
    tpu.vector_store %arg4[%c0_109, %c0_110, %c0_111], %120 {strides = array<i32>} : memref<1x2x128xf32, #tpu.memory_space<vmem>>, vector<1x2x128xf32>,
    %122 = vector.extract_strided_slice %106 {offsets = [0, 0], sizes = [64, 8], strides = [1, 1]} : vector<64x128xf32> to vector<64x8xf32>
    %123 = vector.shape_cast %122 : vector<64x8xf32> to vector<1x8x8x8xf32>
    %124 = arith.truncf %123 : vector<1x8x8x8xf32> to vector<1x8x8x8xbf16>
    %c0_112 = arith.constant 0 : index
    %c0_113 = arith.constant 0 : index
    %c0_114 = arith.constant 0 : index
    %c0_115 = arith.constant 0 : index
    %125 = vector.load %arg3[%c0_112, %c0_113, %c0_114, %c0_115] : memref<1x8x8x8xbf16, #tpu.memory_space<vmem>>, vector<1x8x8x8xbf16>
    tpu.vector_store %arg3[%c0_112, %c0_113, %c0_114, %c0_115], %124 {strides = array<i32>} : memref<1x8x8x8xbf16, #tpu.memory_space<vmem>>, vector<1x8x8x8xbf16>,
    return
  }
  func.func @transform_0(%arg0: i32) -> (i32, i32, i32, i32, i32) {
    %c0_i32 = arith.constant 0 : i32
    %c0_i32_0 = arith.constant 0 : i32
    %c0_i32_1 = arith.constant 0 : i32
    %c0_i32_2 = arith.constant 0 : i32
    %c0_i32_3 = arith.constant 0 : i32
    return %c0_i32, %arg0, %c0_i32_0, %c0_i32_1, %c0_i32_2 : i32, i32, i32, i32, i32
  }
  func.func @transform_1(%arg0: i32) -> (i32, i32, i32) {
    %c0_i32 = arith.constant 0 : i32
    %c0_i32_0 = arith.constant 0 : i32
    %c0_i32_1 = arith.constant 0 : i32
    %c0_i32_2 = arith.constant 0 : i32
    return %c0_i32, %c0_i32_0, %c0_i32_1 : i32, i32, i32
  }
  func.func @transform_2(%arg0: i32) -> (i32, i32, i32, i32) {
    %c0_i32 = arith.constant 0 : i32
    %c0_i32_0 = arith.constant 0 : i32
    %c0_i32_1 = arith.constant 0 : i32
    %c0_i32_2 = arith.constant 0 : i32
    return %arg0, %c0_i32, %c0_i32_0, %c0_i32_1 : i32, i32, i32, i32
  }
  func.func @transform_3(%arg0: i32) -> (i32, i32, i32) {
    %c0_i32 = arith.constant 0 : i32
    %c0_i32_0 = arith.constant 0 : i32
    %c0_i32_1 = arith.constant 0 : i32
    return %arg0, %c0_i32, %c0_i32_0 : i32, i32, i32
  }
}

module attributes {stable_mosaic.version = 11 : i64} {
  func.func @_conv_kernel(%arg0: i32, %arg1: memref<1x10x10x8xbf16, #tpu.memory_space<vmem>>, %arg2: memref<9x8x128xbf16, #tpu.memory_space<vmem>>, %arg3: memref<1x8x8x4xbf16, #tpu.memory_space<vmem>>, %arg4: memref<4x128xbf16, #tpu.memory_space<vmem>>, %arg5: memref<1x2x128xf32, #tpu.memory_space<vmem>>, %arg6: memref<1x2x128xf32, #tpu.memory_space<vmem>>, %arg7: memref<64x128xf32, #tpu.memory_space<vmem>>) attributes {dimension_semantics = [#tpu.dimension_semantics<parallel>], iteration_bounds = array<i64: 2>, scalar_prefetch = 0 : i64, scratch_operands = 1 : i64, tpu.core_type = #tpu.core_type<tc>, window_params = [{transform_indices = @transform_0, window_bounds = array<i64: 1, 10, 10, 8>}, {pipeline_mode = #tpu.pipeline_mode<synchronous>, transform_indices = @transform_1, window_bounds = array<i64: 9, 8, 128>}, {transform_indices = @transform_2, window_bounds = array<i64: 1, 8, 8, 4>}, {pipeline_mode = #tpu.pipeline_mode<synchronous>, transform_indices = @transform_3, window_bounds = array<i64: 4, 128>}, {transform_indices = @transform_4, window_bounds = array<i64: 1, 2, 128>}, {transform_indices = @transform_5, window_bounds = array<i64: 1, 2, 128>}]} {
    %c0 = arith.constant 0 : index
    %c0_0 = arith.constant 0 : index
    %c0_1 = arith.constant 0 : index
    %c0_2 = arith.constant 0 : index
    %0 = vector.load %arg1[%c0, %c0_0, %c0_1, %c0_2] : memref<1x10x10x8xbf16, #tpu.memory_space<vmem>>, vector<1x8x10x8xbf16>
    %1 = arith.extf %0 : vector<1x8x10x8xbf16> to vector<1x8x10x8xf32>
    %2 = vector.extract_strided_slice %1 {offsets = [0, 0, 0, 0], sizes = [1, 8, 8, 8], strides = [1, 1, 1, 1]} : vector<1x8x10x8xf32> to vector<1x8x8x8xf32>
    %3 = vector.shape_cast %2 : vector<1x8x8x8xf32> to vector<64x8xf32>
    %4 = arith.truncf %3 : vector<64x8xf32> to vector<64x8xbf16>
    %c0_3 = arith.constant 0 : index
    %c0_4 = arith.constant 0 : index
    %c0_5 = arith.constant 0 : index
    %5 = vector.load %arg2[%c0_3, %c0_4, %c0_5] : memref<9x8x128xbf16, #tpu.memory_space<vmem>>, vector<1x8x128xbf16>
    %6 = vector.shape_cast %5 : vector<1x8x128xbf16> to vector<8x128xbf16>
    %cst = arith.constant dense<0.000000e+00> : vector<64x128xf32>
    %7 = tpu.matmul %4, %6, %cst {dimension_numbers = #tpu.dot_dimension_numbers<[1], [0], [0], [1], [0, 0, 1, 1], [], []>} : vector<64x8xbf16>, vector<8x128xbf16>, vector<64x128xf32> -> vector<64x128xf32>
    %c0_6 = arith.constant 0 : index
    %c0_7 = arith.constant 0 : index
    %8 = vector.load %arg7[%c0_6, %c0_7] : memref<64x128xf32, #tpu.memory_space<vmem>>, vector<64x128xf32>
    tpu.vector_store %arg7[%c0_6, %c0_7], %7 {strides = array<i32>} : memref<64x128xf32, #tpu.memory_space<vmem>>, vector<64x128xf32>,
    %c0_8 = arith.constant 0 : index
    %c0_9 = arith.constant 0 : index
    %c0_10 = arith.constant 0 : index
    %c0_11 = arith.constant 0 : index
    %9 = vector.load %arg1[%c0_8, %c0_9, %c0_10, %c0_11] : memref<1x10x10x8xbf16, #tpu.memory_space<vmem>>, vector<1x8x10x8xbf16>
    %10 = arith.extf %9 : vector<1x8x10x8xbf16> to vector<1x8x10x8xf32>
    %11 = vector.extract_strided_slice %10 {offsets = [0, 0, 1, 0], sizes = [1, 8, 8, 8], strides = [1, 1, 1, 1]} : vector<1x8x10x8xf32> to vector<1x8x8x8xf32>
    %12 = vector.shape_cast %11 : vector<1x8x8x8xf32> to vector<64x8xf32>
    %13 = arith.truncf %12 : vector<64x8xf32> to vector<64x8xbf16>
    %c1 = arith.constant 1 : index
    %c0_12 = arith.constant 0 : index
    %c0_13 = arith.constant 0 : index
    %14 = vector.load %arg2[%c1, %c0_12, %c0_13] : memref<9x8x128xbf16, #tpu.memory_space<vmem>>, vector<1x8x128xbf16>
    %15 = vector.shape_cast %14 : vector<1x8x128xbf16> to vector<8x128xbf16>
    %cst_14 = arith.constant dense<0.000000e+00> : vector<64x128xf32>
    %16 = tpu.matmul %13, %15, %cst_14 {dimension_numbers = #tpu.dot_dimension_numbers<[1], [0], [0], [1], [0, 0, 1, 1], [], []>} : vector<64x8xbf16>, vector<8x128xbf16>, vector<64x128xf32> -> vector<64x128xf32>
    %c0_15 = arith.constant 0 : index
    %c0_16 = arith.constant 0 : index
    %17 = vector.load %arg7[%c0_15, %c0_16] : memref<64x128xf32, #tpu.memory_space<vmem>>, vector<64x128xf32>
    %18 = arith.addf %17, %16 : vector<64x128xf32>
    %c0_17 = arith.constant 0 : index
    %c0_18 = arith.constant 0 : index
    %19 = vector.load %arg7[%c0_17, %c0_18] : memref<64x128xf32, #tpu.memory_space<vmem>>, vector<64x128xf32>
    tpu.vector_store %arg7[%c0_17, %c0_18], %18 {strides = array<i32>} : memref<64x128xf32, #tpu.memory_space<vmem>>, vector<64x128xf32>,
    %c0_19 = arith.constant 0 : index
    %c0_20 = arith.constant 0 : index
    %c0_21 = arith.constant 0 : index
    %c0_22 = arith.constant 0 : index
    %20 = vector.load %arg1[%c0_19, %c0_20, %c0_21, %c0_22] : memref<1x10x10x8xbf16, #tpu.memory_space<vmem>>, vector<1x8x10x8xbf16>
    %21 = arith.extf %20 : vector<1x8x10x8xbf16> to vector<1x8x10x8xf32>
    %22 = vector.extract_strided_slice %21 {offsets = [0, 0, 2, 0], sizes = [1, 8, 8, 8], strides = [1, 1, 1, 1]} : vector<1x8x10x8xf32> to vector<1x8x8x8xf32>
    %23 = vector.shape_cast %22 : vector<1x8x8x8xf32> to vector<64x8xf32>
    %24 = arith.truncf %23 : vector<64x8xf32> to vector<64x8xbf16>
    %c2 = arith.constant 2 : index
    %c0_23 = arith.constant 0 : index
    %c0_24 = arith.constant 0 : index
    %25 = vector.load %arg2[%c2, %c0_23, %c0_24] : memref<9x8x128xbf16, #tpu.memory_space<vmem>>, vector<1x8x128xbf16>
    %26 = vector.shape_cast %25 : vector<1x8x128xbf16> to vector<8x128xbf16>
    %cst_25 = arith.constant dense<0.000000e+00> : vector<64x128xf32>
    %27 = tpu.matmul %24, %26, %cst_25 {dimension_numbers = #tpu.dot_dimension_numbers<[1], [0], [0], [1], [0, 0, 1, 1], [], []>} : vector<64x8xbf16>, vector<8x128xbf16>, vector<64x128xf32> -> vector<64x128xf32>
    %c0_26 = arith.constant 0 : index
    %c0_27 = arith.constant 0 : index
    %28 = vector.load %arg7[%c0_26, %c0_27] : memref<64x128xf32, #tpu.memory_space<vmem>>, vector<64x128xf32>
    %29 = arith.addf %28, %27 : vector<64x128xf32>
    %c0_28 = arith.constant 0 : index
    %c0_29 = arith.constant 0 : index
    %30 = vector.load %arg7[%c0_28, %c0_29] : memref<64x128xf32, #tpu.memory_space<vmem>>, vector<64x128xf32>
    tpu.vector_store %arg7[%c0_28, %c0_29], %29 {strides = array<i32>} : memref<64x128xf32, #tpu.memory_space<vmem>>, vector<64x128xf32>,
    %c0_30 = arith.constant 0 : index
    %c1_31 = arith.constant 1 : index
    %c0_32 = arith.constant 0 : index
    %c0_33 = arith.constant 0 : index
    %31 = vector.load %arg1[%c0_30, %c1_31, %c0_32, %c0_33] : memref<1x10x10x8xbf16, #tpu.memory_space<vmem>>, vector<1x8x10x8xbf16>
    %32 = arith.extf %31 : vector<1x8x10x8xbf16> to vector<1x8x10x8xf32>
    %33 = vector.extract_strided_slice %32 {offsets = [0, 0, 0, 0], sizes = [1, 8, 8, 8], strides = [1, 1, 1, 1]} : vector<1x8x10x8xf32> to vector<1x8x8x8xf32>
    %34 = vector.shape_cast %33 : vector<1x8x8x8xf32> to vector<64x8xf32>
    %35 = arith.truncf %34 : vector<64x8xf32> to vector<64x8xbf16>
    %c3 = arith.constant 3 : index
    %c0_34 = arith.constant 0 : index
    %c0_35 = arith.constant 0 : index
    %36 = vector.load %arg2[%c3, %c0_34, %c0_35] : memref<9x8x128xbf16, #tpu.memory_space<vmem>>, vector<1x8x128xbf16>
    %37 = vector.shape_cast %36 : vector<1x8x128xbf16> to vector<8x128xbf16>
    %cst_36 = arith.constant dense<0.000000e+00> : vector<64x128xf32>
    %38 = tpu.matmul %35, %37, %cst_36 {dimension_numbers = #tpu.dot_dimension_numbers<[1], [0], [0], [1], [0, 0, 1, 1], [], []>} : vector<64x8xbf16>, vector<8x128xbf16>, vector<64x128xf32> -> vector<64x128xf32>
    %c0_37 = arith.constant 0 : index
    %c0_38 = arith.constant 0 : index
    %39 = vector.load %arg7[%c0_37, %c0_38] : memref<64x128xf32, #tpu.memory_space<vmem>>, vector<64x128xf32>
    %40 = arith.addf %39, %38 : vector<64x128xf32>
    %c0_39 = arith.constant 0 : index
    %c0_40 = arith.constant 0 : index
    %41 = vector.load %arg7[%c0_39, %c0_40] : memref<64x128xf32, #tpu.memory_space<vmem>>, vector<64x128xf32>
    tpu.vector_store %arg7[%c0_39, %c0_40], %40 {strides = array<i32>} : memref<64x128xf32, #tpu.memory_space<vmem>>, vector<64x128xf32>,
    %c0_41 = arith.constant 0 : index
    %c1_42 = arith.constant 1 : index
    %c0_43 = arith.constant 0 : index
    %c0_44 = arith.constant 0 : index
    %42 = vector.load %arg1[%c0_41, %c1_42, %c0_43, %c0_44] : memref<1x10x10x8xbf16, #tpu.memory_space<vmem>>, vector<1x8x10x8xbf16>
    %43 = arith.extf %42 : vector<1x8x10x8xbf16> to vector<1x8x10x8xf32>
    %44 = vector.extract_strided_slice %43 {offsets = [0, 0, 1, 0], sizes = [1, 8, 8, 8], strides = [1, 1, 1, 1]} : vector<1x8x10x8xf32> to vector<1x8x8x8xf32>
    %45 = vector.shape_cast %44 : vector<1x8x8x8xf32> to vector<64x8xf32>
    %46 = arith.truncf %45 : vector<64x8xf32> to vector<64x8xbf16>
    %c4 = arith.constant 4 : index
    %c0_45 = arith.constant 0 : index
    %c0_46 = arith.constant 0 : index
    %47 = vector.load %arg2[%c4, %c0_45, %c0_46] : memref<9x8x128xbf16, #tpu.memory_space<vmem>>, vector<1x8x128xbf16>
    %48 = vector.shape_cast %47 : vector<1x8x128xbf16> to vector<8x128xbf16>
    %cst_47 = arith.constant dense<0.000000e+00> : vector<64x128xf32>
    %49 = tpu.matmul %46, %48, %cst_47 {dimension_numbers = #tpu.dot_dimension_numbers<[1], [0], [0], [1], [0, 0, 1, 1], [], []>} : vector<64x8xbf16>, vector<8x128xbf16>, vector<64x128xf32> -> vector<64x128xf32>
    %c0_48 = arith.constant 0 : index
    %c0_49 = arith.constant 0 : index
    %50 = vector.load %arg7[%c0_48, %c0_49] : memref<64x128xf32, #tpu.memory_space<vmem>>, vector<64x128xf32>
    %51 = arith.addf %50, %49 : vector<64x128xf32>
    %c0_50 = arith.constant 0 : index
    %c0_51 = arith.constant 0 : index
    %52 = vector.load %arg7[%c0_50, %c0_51] : memref<64x128xf32, #tpu.memory_space<vmem>>, vector<64x128xf32>
    tpu.vector_store %arg7[%c0_50, %c0_51], %51 {strides = array<i32>} : memref<64x128xf32, #tpu.memory_space<vmem>>, vector<64x128xf32>,
    %c0_52 = arith.constant 0 : index
    %c1_53 = arith.constant 1 : index
    %c0_54 = arith.constant 0 : index
    %c0_55 = arith.constant 0 : index
    %53 = vector.load %arg1[%c0_52, %c1_53, %c0_54, %c0_55] : memref<1x10x10x8xbf16, #tpu.memory_space<vmem>>, vector<1x8x10x8xbf16>
    %54 = arith.extf %53 : vector<1x8x10x8xbf16> to vector<1x8x10x8xf32>
    %55 = vector.extract_strided_slice %54 {offsets = [0, 0, 2, 0], sizes = [1, 8, 8, 8], strides = [1, 1, 1, 1]} : vector<1x8x10x8xf32> to vector<1x8x8x8xf32>
    %56 = vector.shape_cast %55 : vector<1x8x8x8xf32> to vector<64x8xf32>
    %57 = arith.truncf %56 : vector<64x8xf32> to vector<64x8xbf16>
    %c5 = arith.constant 5 : index
    %c0_56 = arith.constant 0 : index
    %c0_57 = arith.constant 0 : index
    %58 = vector.load %arg2[%c5, %c0_56, %c0_57] : memref<9x8x128xbf16, #tpu.memory_space<vmem>>, vector<1x8x128xbf16>
    %59 = vector.shape_cast %58 : vector<1x8x128xbf16> to vector<8x128xbf16>
    %cst_58 = arith.constant dense<0.000000e+00> : vector<64x128xf32>
    %60 = tpu.matmul %57, %59, %cst_58 {dimension_numbers = #tpu.dot_dimension_numbers<[1], [0], [0], [1], [0, 0, 1, 1], [], []>} : vector<64x8xbf16>, vector<8x128xbf16>, vector<64x128xf32> -> vector<64x128xf32>
    %c0_59 = arith.constant 0 : index
    %c0_60 = arith.constant 0 : index
    %61 = vector.load %arg7[%c0_59, %c0_60] : memref<64x128xf32, #tpu.memory_space<vmem>>, vector<64x128xf32>
    %62 = arith.addf %61, %60 : vector<64x128xf32>
    %c0_61 = arith.constant 0 : index
    %c0_62 = arith.constant 0 : index
    %63 = vector.load %arg7[%c0_61, %c0_62] : memref<64x128xf32, #tpu.memory_space<vmem>>, vector<64x128xf32>
    tpu.vector_store %arg7[%c0_61, %c0_62], %62 {strides = array<i32>} : memref<64x128xf32, #tpu.memory_space<vmem>>, vector<64x128xf32>,
    %c0_63 = arith.constant 0 : index
    %c2_64 = arith.constant 2 : index
    %c0_65 = arith.constant 0 : index
    %c0_66 = arith.constant 0 : index
    %64 = vector.load %arg1[%c0_63, %c2_64, %c0_65, %c0_66] : memref<1x10x10x8xbf16, #tpu.memory_space<vmem>>, vector<1x8x10x8xbf16>
    %65 = arith.extf %64 : vector<1x8x10x8xbf16> to vector<1x8x10x8xf32>
    %66 = vector.extract_strided_slice %65 {offsets = [0, 0, 0, 0], sizes = [1, 8, 8, 8], strides = [1, 1, 1, 1]} : vector<1x8x10x8xf32> to vector<1x8x8x8xf32>
    %67 = vector.shape_cast %66 : vector<1x8x8x8xf32> to vector<64x8xf32>
    %68 = arith.truncf %67 : vector<64x8xf32> to vector<64x8xbf16>
    %c6 = arith.constant 6 : index
    %c0_67 = arith.constant 0 : index
    %c0_68 = arith.constant 0 : index
    %69 = vector.load %arg2[%c6, %c0_67, %c0_68] : memref<9x8x128xbf16, #tpu.memory_space<vmem>>, vector<1x8x128xbf16>
    %70 = vector.shape_cast %69 : vector<1x8x128xbf16> to vector<8x128xbf16>
    %cst_69 = arith.constant dense<0.000000e+00> : vector<64x128xf32>
    %71 = tpu.matmul %68, %70, %cst_69 {dimension_numbers = #tpu.dot_dimension_numbers<[1], [0], [0], [1], [0, 0, 1, 1], [], []>} : vector<64x8xbf16>, vector<8x128xbf16>, vector<64x128xf32> -> vector<64x128xf32>
    %c0_70 = arith.constant 0 : index
    %c0_71 = arith.constant 0 : index
    %72 = vector.load %arg7[%c0_70, %c0_71] : memref<64x128xf32, #tpu.memory_space<vmem>>, vector<64x128xf32>
    %73 = arith.addf %72, %71 : vector<64x128xf32>
    %c0_72 = arith.constant 0 : index
    %c0_73 = arith.constant 0 : index
    %74 = vector.load %arg7[%c0_72, %c0_73] : memref<64x128xf32, #tpu.memory_space<vmem>>, vector<64x128xf32>
    tpu.vector_store %arg7[%c0_72, %c0_73], %73 {strides = array<i32>} : memref<64x128xf32, #tpu.memory_space<vmem>>, vector<64x128xf32>,
    %c0_74 = arith.constant 0 : index
    %c2_75 = arith.constant 2 : index
    %c0_76 = arith.constant 0 : index
    %c0_77 = arith.constant 0 : index
    %75 = vector.load %arg1[%c0_74, %c2_75, %c0_76, %c0_77] : memref<1x10x10x8xbf16, #tpu.memory_space<vmem>>, vector<1x8x10x8xbf16>
    %76 = arith.extf %75 : vector<1x8x10x8xbf16> to vector<1x8x10x8xf32>
    %77 = vector.extract_strided_slice %76 {offsets = [0, 0, 1, 0], sizes = [1, 8, 8, 8], strides = [1, 1, 1, 1]} : vector<1x8x10x8xf32> to vector<1x8x8x8xf32>
    %78 = vector.shape_cast %77 : vector<1x8x8x8xf32> to vector<64x8xf32>
    %79 = arith.truncf %78 : vector<64x8xf32> to vector<64x8xbf16>
    %c7 = arith.constant 7 : index
    %c0_78 = arith.constant 0 : index
    %c0_79 = arith.constant 0 : index
    %80 = vector.load %arg2[%c7, %c0_78, %c0_79] : memref<9x8x128xbf16, #tpu.memory_space<vmem>>, vector<1x8x128xbf16>
    %81 = vector.shape_cast %80 : vector<1x8x128xbf16> to vector<8x128xbf16>
    %cst_80 = arith.constant dense<0.000000e+00> : vector<64x128xf32>
    %82 = tpu.matmul %79, %81, %cst_80 {dimension_numbers = #tpu.dot_dimension_numbers<[1], [0], [0], [1], [0, 0, 1, 1], [], []>} : vector<64x8xbf16>, vector<8x128xbf16>, vector<64x128xf32> -> vector<64x128xf32>
    %c0_81 = arith.constant 0 : index
    %c0_82 = arith.constant 0 : index
    %83 = vector.load %arg7[%c0_81, %c0_82] : memref<64x128xf32, #tpu.memory_space<vmem>>, vector<64x128xf32>
    %84 = arith.addf %83, %82 : vector<64x128xf32>
    %c0_83 = arith.constant 0 : index
    %c0_84 = arith.constant 0 : index
    %85 = vector.load %arg7[%c0_83, %c0_84] : memref<64x128xf32, #tpu.memory_space<vmem>>, vector<64x128xf32>
    tpu.vector_store %arg7[%c0_83, %c0_84], %84 {strides = array<i32>} : memref<64x128xf32, #tpu.memory_space<vmem>>, vector<64x128xf32>,
    %c0_85 = arith.constant 0 : index
    %c2_86 = arith.constant 2 : index
    %c0_87 = arith.constant 0 : index
    %c0_88 = arith.constant 0 : index
    %86 = vector.load %arg1[%c0_85, %c2_86, %c0_87, %c0_88] : memref<1x10x10x8xbf16, #tpu.memory_space<vmem>>, vector<1x8x10x8xbf16>
    %87 = arith.extf %86 : vector<1x8x10x8xbf16> to vector<1x8x10x8xf32>
    %88 = vector.extract_strided_slice %87 {offsets = [0, 0, 2, 0], sizes = [1, 8, 8, 8], strides = [1, 1, 1, 1]} : vector<1x8x10x8xf32> to vector<1x8x8x8xf32>
    %89 = vector.shape_cast %88 : vector<1x8x8x8xf32> to vector<64x8xf32>
    %90 = arith.truncf %89 : vector<64x8xf32> to vector<64x8xbf16>
    %c8 = arith.constant 8 : index
    %c0_89 = arith.constant 0 : index
    %c0_90 = arith.constant 0 : index
    %91 = vector.load %arg2[%c8, %c0_89, %c0_90] : memref<9x8x128xbf16, #tpu.memory_space<vmem>>, vector<1x8x128xbf16>
    %92 = vector.shape_cast %91 : vector<1x8x128xbf16> to vector<8x128xbf16>
    %cst_91 = arith.constant dense<0.000000e+00> : vector<64x128xf32>
    %93 = tpu.matmul %90, %92, %cst_91 {dimension_numbers = #tpu.dot_dimension_numbers<[1], [0], [0], [1], [0, 0, 1, 1], [], []>} : vector<64x8xbf16>, vector<8x128xbf16>, vector<64x128xf32> -> vector<64x128xf32>
    %c0_92 = arith.constant 0 : index
    %c0_93 = arith.constant 0 : index
    %94 = vector.load %arg7[%c0_92, %c0_93] : memref<64x128xf32, #tpu.memory_space<vmem>>, vector<64x128xf32>
    %95 = arith.addf %94, %93 : vector<64x128xf32>
    %c0_94 = arith.constant 0 : index
    %c0_95 = arith.constant 0 : index
    %96 = vector.load %arg7[%c0_94, %c0_95] : memref<64x128xf32, #tpu.memory_space<vmem>>, vector<64x128xf32>
    tpu.vector_store %arg7[%c0_94, %c0_95], %95 {strides = array<i32>} : memref<64x128xf32, #tpu.memory_space<vmem>>, vector<64x128xf32>,
    %c0_96 = arith.constant 0 : index
    %c0_97 = arith.constant 0 : index
    %97 = vector.load %arg7[%c0_96, %c0_97] : memref<64x128xf32, #tpu.memory_space<vmem>>, vector<64x128xf32>
    %c0_98 = arith.constant 0 : index
    %c0_99 = arith.constant 0 : index
    %c0_100 = arith.constant 0 : index
    %c0_101 = arith.constant 0 : index
    %98 = vector.load %arg3[%c0_98, %c0_99, %c0_100, %c0_101] : memref<1x8x8x4xbf16, #tpu.memory_space<vmem>>, vector<1x8x8x4xbf16>
    %99 = arith.extf %98 : vector<1x8x8x4xbf16> to vector<1x8x8x4xf32>
    %100 = vector.shape_cast %99 : vector<1x8x8x4xf32> to vector<64x4xf32>
    %101 = arith.truncf %100 : vector<64x4xf32> to vector<64x4xbf16>
    %c0_102 = arith.constant 0 : index
    %c0_103 = arith.constant 0 : index
    %102 = vector.load %arg4[%c0_102, %c0_103] : memref<4x128xbf16, #tpu.memory_space<vmem>>, vector<4x128xbf16>
    %cst_104 = arith.constant dense<0.000000e+00> : vector<64x128xf32>
    %103 = tpu.matmul %101, %102, %cst_104 {dimension_numbers = #tpu.dot_dimension_numbers<[1], [0], [0], [1], [0, 0, 1, 1], [], []>} : vector<64x4xbf16>, vector<4x128xbf16>, vector<64x128xf32> -> vector<64x128xf32>
    %cst_105 = arith.constant dense<0.000000e+00> : vector<128xf32>
    %104 = vector.multi_reduction <add>, %97, %cst_105 [0] : vector<64x128xf32> to vector<128xf32>
    %105 = vector.shape_cast %104 : vector<128xf32> to vector<1x128xf32>
    %106 = arith.mulf %97, %97 : vector<64x128xf32>
    %cst_106 = arith.constant dense<0.000000e+00> : vector<128xf32>
    %107 = vector.multi_reduction <add>, %106, %cst_106 [0] : vector<64x128xf32> to vector<128xf32>
    %108 = vector.shape_cast %107 : vector<128xf32> to vector<1x128xf32>
    %109 = tpu.iota {dimensions = array<i32: 0>} : vector<2x128xi32>
    %c0_i32 = arith.constant 0 : i32
    %110 = vector.broadcast %c0_i32 : i32 to vector<2x128xi32>
    %111 = arith.cmpi eq, %109, %110 : vector<2x128xi32>
    %112 = vector.shape_cast %105 : vector<1x128xf32> to vector<1x128xf32>
    %113 = vector.broadcast %112 : vector<1x128xf32> to vector<2x128xf32>
    %114 = vector.shape_cast %108 : vector<1x128xf32> to vector<1x128xf32>
    %115 = vector.broadcast %114 : vector<1x128xf32> to vector<2x128xf32>
    %116 = arith.select %111, %113, %115 : vector<2x128xi1>, vector<2x128xf32>
    %117 = vector.shape_cast %116 : vector<2x128xf32> to vector<1x2x128xf32>
    %c0_107 = arith.constant 0 : index
    %c0_108 = arith.constant 0 : index
    %c0_109 = arith.constant 0 : index
    %118 = vector.load %arg5[%c0_107, %c0_108, %c0_109] : memref<1x2x128xf32, #tpu.memory_space<vmem>>, vector<1x2x128xf32>
    tpu.vector_store %arg5[%c0_107, %c0_108, %c0_109], %117 {strides = array<i32>} : memref<1x2x128xf32, #tpu.memory_space<vmem>>, vector<1x2x128xf32>,
    %cst_110 = arith.constant dense<0.000000e+00> : vector<128xf32>
    %119 = vector.multi_reduction <add>, %103, %cst_110 [0] : vector<64x128xf32> to vector<128xf32>
    %120 = vector.shape_cast %119 : vector<128xf32> to vector<1x128xf32>
    %121 = arith.mulf %103, %103 : vector<64x128xf32>
    %cst_111 = arith.constant dense<0.000000e+00> : vector<128xf32>
    %122 = vector.multi_reduction <add>, %121, %cst_111 [0] : vector<64x128xf32> to vector<128xf32>
    %123 = vector.shape_cast %122 : vector<128xf32> to vector<1x128xf32>
    %124 = tpu.iota {dimensions = array<i32: 0>} : vector<2x128xi32>
    %c0_i32_112 = arith.constant 0 : i32
    %125 = vector.broadcast %c0_i32_112 : i32 to vector<2x128xi32>
    %126 = arith.cmpi eq, %124, %125 : vector<2x128xi32>
    %127 = vector.shape_cast %120 : vector<1x128xf32> to vector<1x128xf32>
    %128 = vector.broadcast %127 : vector<1x128xf32> to vector<2x128xf32>
    %129 = vector.shape_cast %123 : vector<1x128xf32> to vector<1x128xf32>
    %130 = vector.broadcast %129 : vector<1x128xf32> to vector<2x128xf32>
    %131 = arith.select %126, %128, %130 : vector<2x128xi1>, vector<2x128xf32>
    %132 = vector.shape_cast %131 : vector<2x128xf32> to vector<1x2x128xf32>
    %c0_113 = arith.constant 0 : index
    %c0_114 = arith.constant 0 : index
    %c0_115 = arith.constant 0 : index
    %133 = vector.load %arg6[%c0_113, %c0_114, %c0_115] : memref<1x2x128xf32, #tpu.memory_space<vmem>>, vector<1x2x128xf32>
    tpu.vector_store %arg6[%c0_113, %c0_114, %c0_115], %132 {strides = array<i32>} : memref<1x2x128xf32, #tpu.memory_space<vmem>>, vector<1x2x128xf32>,
    return
  }
  func.func @transform_0(%arg0: i32) -> (i32, i32, i32, i32) {
    %c0_i32 = arith.constant 0 : i32
    %c0_i32_0 = arith.constant 0 : i32
    %c0_i32_1 = arith.constant 0 : i32
    %c0_i32_2 = arith.constant 0 : i32
    return %arg0, %c0_i32, %c0_i32_0, %c0_i32_1 : i32, i32, i32, i32
  }
  func.func @transform_1(%arg0: i32) -> (i32, i32, i32) {
    %c0_i32 = arith.constant 0 : i32
    %c0_i32_0 = arith.constant 0 : i32
    %c0_i32_1 = arith.constant 0 : i32
    %c0_i32_2 = arith.constant 0 : i32
    return %c0_i32, %c0_i32_0, %c0_i32_1 : i32, i32, i32
  }
  func.func @transform_2(%arg0: i32) -> (i32, i32, i32, i32) {
    %c0_i32 = arith.constant 0 : i32
    %c0_i32_0 = arith.constant 0 : i32
    %c0_i32_1 = arith.constant 0 : i32
    %c0_i32_2 = arith.constant 0 : i32
    return %arg0, %c0_i32, %c0_i32_0, %c0_i32_1 : i32, i32, i32, i32
  }
  func.func @transform_3(%arg0: i32) -> (i32, i32) {
    %c0_i32 = arith.constant 0 : i32
    %c0_i32_0 = arith.constant 0 : i32
    %c0_i32_1 = arith.constant 0 : i32
    return %c0_i32, %c0_i32_0 : i32, i32
  }
  func.func @transform_4(%arg0: i32) -> (i32, i32, i32) {
    %c0_i32 = arith.constant 0 : i32
    %c0_i32_0 = arith.constant 0 : i32
    %c0_i32_1 = arith.constant 0 : i32
    return %arg0, %c0_i32, %c0_i32_0 : i32, i32, i32
  }
  func.func @transform_5(%arg0: i32) -> (i32, i32, i32) {
    %c0_i32 = arith.constant 0 : i32
    %c0_i32_0 = arith.constant 0 : i32
    %c0_i32_1 = arith.constant 0 : i32
    return %arg0, %c0_i32, %c0_i32_0 : i32, i32, i32
  }
}

module attributes {stable_mosaic.version = 11 : i64} {
  func.func @_conv_kernel(%arg0: i32, %arg1: memref<1x10x10x8xbf16, #tpu.memory_space<vmem>>, %arg2: memref<9x8x128xbf16, #tpu.memory_space<vmem>>, %arg3: memref<1x8x8x4xbf16, #tpu.memory_space<vmem>>, %arg4: memref<4x128xbf16, #tpu.memory_space<vmem>>, %arg5: memref<1x8xf32, #tpu.memory_space<vmem>>, %arg6: memref<1x8xf32, #tpu.memory_space<vmem>>, %arg7: memref<1x8xf32, #tpu.memory_space<vmem>>, %arg8: memref<1x8xf32, #tpu.memory_space<vmem>>, %arg9: memref<1x8x8x8xf32, #tpu.memory_space<vmem>>, %arg10: memref<64x128xf32, #tpu.memory_space<vmem>>) attributes {dimension_semantics = [#tpu.dimension_semantics<parallel>], iteration_bounds = array<i64: 2>, scalar_prefetch = 0 : i64, scratch_operands = 1 : i64, tpu.core_type = #tpu.core_type<tc>, window_params = [{transform_indices = @transform_0, window_bounds = array<i64: 1, 10, 10, 8>}, {pipeline_mode = #tpu.pipeline_mode<synchronous>, transform_indices = @transform_1, window_bounds = array<i64: 9, 8, 128>}, {transform_indices = @transform_2, window_bounds = array<i64: 1, 8, 8, 4>}, {pipeline_mode = #tpu.pipeline_mode<synchronous>, transform_indices = @transform_3, window_bounds = array<i64: 4, 128>}, {pipeline_mode = #tpu.pipeline_mode<synchronous>, transform_indices = @transform_4, window_bounds = array<i64: 1, 8>}, {pipeline_mode = #tpu.pipeline_mode<synchronous>, transform_indices = @transform_5, window_bounds = array<i64: 1, 8>}, {pipeline_mode = #tpu.pipeline_mode<synchronous>, transform_indices = @transform_6, window_bounds = array<i64: 1, 8>}, {pipeline_mode = #tpu.pipeline_mode<synchronous>, transform_indices = @transform_7, window_bounds = array<i64: 1, 8>}, {transform_indices = @transform_8, window_bounds = array<i64: 1, 8, 8, 8>}]} {
    %c0 = arith.constant 0 : index
    %c0_0 = arith.constant 0 : index
    %c0_1 = arith.constant 0 : index
    %c0_2 = arith.constant 0 : index
    %0 = vector.load %arg1[%c0, %c0_0, %c0_1, %c0_2] : memref<1x10x10x8xbf16, #tpu.memory_space<vmem>>, vector<1x8x10x8xbf16>
    %1 = arith.extf %0 : vector<1x8x10x8xbf16> to vector<1x8x10x8xf32>
    %2 = vector.extract_strided_slice %1 {offsets = [0, 0, 0, 0], sizes = [1, 8, 8, 8], strides = [1, 1, 1, 1]} : vector<1x8x10x8xf32> to vector<1x8x8x8xf32>
    %3 = vector.shape_cast %2 : vector<1x8x8x8xf32> to vector<64x8xf32>
    %4 = arith.truncf %3 : vector<64x8xf32> to vector<64x8xbf16>
    %c0_3 = arith.constant 0 : index
    %c0_4 = arith.constant 0 : index
    %c0_5 = arith.constant 0 : index
    %5 = vector.load %arg2[%c0_3, %c0_4, %c0_5] : memref<9x8x128xbf16, #tpu.memory_space<vmem>>, vector<1x8x128xbf16>
    %6 = vector.shape_cast %5 : vector<1x8x128xbf16> to vector<8x128xbf16>
    %cst = arith.constant dense<0.000000e+00> : vector<64x128xf32>
    %7 = tpu.matmul %4, %6, %cst {dimension_numbers = #tpu.dot_dimension_numbers<[1], [0], [0], [1], [0, 0, 1, 1], [], []>} : vector<64x8xbf16>, vector<8x128xbf16>, vector<64x128xf32> -> vector<64x128xf32>
    %c0_6 = arith.constant 0 : index
    %c0_7 = arith.constant 0 : index
    %8 = vector.load %arg10[%c0_6, %c0_7] : memref<64x128xf32, #tpu.memory_space<vmem>>, vector<64x128xf32>
    tpu.vector_store %arg10[%c0_6, %c0_7], %7 {strides = array<i32>} : memref<64x128xf32, #tpu.memory_space<vmem>>, vector<64x128xf32>,
    %c0_8 = arith.constant 0 : index
    %c0_9 = arith.constant 0 : index
    %c0_10 = arith.constant 0 : index
    %c0_11 = arith.constant 0 : index
    %9 = vector.load %arg1[%c0_8, %c0_9, %c0_10, %c0_11] : memref<1x10x10x8xbf16, #tpu.memory_space<vmem>>, vector<1x8x10x8xbf16>
    %10 = arith.extf %9 : vector<1x8x10x8xbf16> to vector<1x8x10x8xf32>
    %11 = vector.extract_strided_slice %10 {offsets = [0, 0, 1, 0], sizes = [1, 8, 8, 8], strides = [1, 1, 1, 1]} : vector<1x8x10x8xf32> to vector<1x8x8x8xf32>
    %12 = vector.shape_cast %11 : vector<1x8x8x8xf32> to vector<64x8xf32>
    %13 = arith.truncf %12 : vector<64x8xf32> to vector<64x8xbf16>
    %c1 = arith.constant 1 : index
    %c0_12 = arith.constant 0 : index
    %c0_13 = arith.constant 0 : index
    %14 = vector.load %arg2[%c1, %c0_12, %c0_13] : memref<9x8x128xbf16, #tpu.memory_space<vmem>>, vector<1x8x128xbf16>
    %15 = vector.shape_cast %14 : vector<1x8x128xbf16> to vector<8x128xbf16>
    %cst_14 = arith.constant dense<0.000000e+00> : vector<64x128xf32>
    %16 = tpu.matmul %13, %15, %cst_14 {dimension_numbers = #tpu.dot_dimension_numbers<[1], [0], [0], [1], [0, 0, 1, 1], [], []>} : vector<64x8xbf16>, vector<8x128xbf16>, vector<64x128xf32> -> vector<64x128xf32>
    %c0_15 = arith.constant 0 : index
    %c0_16 = arith.constant 0 : index
    %17 = vector.load %arg10[%c0_15, %c0_16] : memref<64x128xf32, #tpu.memory_space<vmem>>, vector<64x128xf32>
    %18 = arith.addf %17, %16 : vector<64x128xf32>
    %c0_17 = arith.constant 0 : index
    %c0_18 = arith.constant 0 : index
    %19 = vector.load %arg10[%c0_17, %c0_18] : memref<64x128xf32, #tpu.memory_space<vmem>>, vector<64x128xf32>
    tpu.vector_store %arg10[%c0_17, %c0_18], %18 {strides = array<i32>} : memref<64x128xf32, #tpu.memory_space<vmem>>, vector<64x128xf32>,
    %c0_19 = arith.constant 0 : index
    %c0_20 = arith.constant 0 : index
    %c0_21 = arith.constant 0 : index
    %c0_22 = arith.constant 0 : index
    %20 = vector.load %arg1[%c0_19, %c0_20, %c0_21, %c0_22] : memref<1x10x10x8xbf16, #tpu.memory_space<vmem>>, vector<1x8x10x8xbf16>
    %21 = arith.extf %20 : vector<1x8x10x8xbf16> to vector<1x8x10x8xf32>
    %22 = vector.extract_strided_slice %21 {offsets = [0, 0, 2, 0], sizes = [1, 8, 8, 8], strides = [1, 1, 1, 1]} : vector<1x8x10x8xf32> to vector<1x8x8x8xf32>
    %23 = vector.shape_cast %22 : vector<1x8x8x8xf32> to vector<64x8xf32>
    %24 = arith.truncf %23 : vector<64x8xf32> to vector<64x8xbf16>
    %c2 = arith.constant 2 : index
    %c0_23 = arith.constant 0 : index
    %c0_24 = arith.constant 0 : index
    %25 = vector.load %arg2[%c2, %c0_23, %c0_24] : memref<9x8x128xbf16, #tpu.memory_space<vmem>>, vector<1x8x128xbf16>
    %26 = vector.shape_cast %25 : vector<1x8x128xbf16> to vector<8x128xbf16>
    %cst_25 = arith.constant dense<0.000000e+00> : vector<64x128xf32>
    %27 = tpu.matmul %24, %26, %cst_25 {dimension_numbers = #tpu.dot_dimension_numbers<[1], [0], [0], [1], [0, 0, 1, 1], [], []>} : vector<64x8xbf16>, vector<8x128xbf16>, vector<64x128xf32> -> vector<64x128xf32>
    %c0_26 = arith.constant 0 : index
    %c0_27 = arith.constant 0 : index
    %28 = vector.load %arg10[%c0_26, %c0_27] : memref<64x128xf32, #tpu.memory_space<vmem>>, vector<64x128xf32>
    %29 = arith.addf %28, %27 : vector<64x128xf32>
    %c0_28 = arith.constant 0 : index
    %c0_29 = arith.constant 0 : index
    %30 = vector.load %arg10[%c0_28, %c0_29] : memref<64x128xf32, #tpu.memory_space<vmem>>, vector<64x128xf32>
    tpu.vector_store %arg10[%c0_28, %c0_29], %29 {strides = array<i32>} : memref<64x128xf32, #tpu.memory_space<vmem>>, vector<64x128xf32>,
    %c0_30 = arith.constant 0 : index
    %c1_31 = arith.constant 1 : index
    %c0_32 = arith.constant 0 : index
    %c0_33 = arith.constant 0 : index
    %31 = vector.load %arg1[%c0_30, %c1_31, %c0_32, %c0_33] : memref<1x10x10x8xbf16, #tpu.memory_space<vmem>>, vector<1x8x10x8xbf16>
    %32 = arith.extf %31 : vector<1x8x10x8xbf16> to vector<1x8x10x8xf32>
    %33 = vector.extract_strided_slice %32 {offsets = [0, 0, 0, 0], sizes = [1, 8, 8, 8], strides = [1, 1, 1, 1]} : vector<1x8x10x8xf32> to vector<1x8x8x8xf32>
    %34 = vector.shape_cast %33 : vector<1x8x8x8xf32> to vector<64x8xf32>
    %35 = arith.truncf %34 : vector<64x8xf32> to vector<64x8xbf16>
    %c3 = arith.constant 3 : index
    %c0_34 = arith.constant 0 : index
    %c0_35 = arith.constant 0 : index
    %36 = vector.load %arg2[%c3, %c0_34, %c0_35] : memref<9x8x128xbf16, #tpu.memory_space<vmem>>, vector<1x8x128xbf16>
    %37 = vector.shape_cast %36 : vector<1x8x128xbf16> to vector<8x128xbf16>
    %cst_36 = arith.constant dense<0.000000e+00> : vector<64x128xf32>
    %38 = tpu.matmul %35, %37, %cst_36 {dimension_numbers = #tpu.dot_dimension_numbers<[1], [0], [0], [1], [0, 0, 1, 1], [], []>} : vector<64x8xbf16>, vector<8x128xbf16>, vector<64x128xf32> -> vector<64x128xf32>
    %c0_37 = arith.constant 0 : index
    %c0_38 = arith.constant 0 : index
    %39 = vector.load %arg10[%c0_37, %c0_38] : memref<64x128xf32, #tpu.memory_space<vmem>>, vector<64x128xf32>
    %40 = arith.addf %39, %38 : vector<64x128xf32>
    %c0_39 = arith.constant 0 : index
    %c0_40 = arith.constant 0 : index
    %41 = vector.load %arg10[%c0_39, %c0_40] : memref<64x128xf32, #tpu.memory_space<vmem>>, vector<64x128xf32>
    tpu.vector_store %arg10[%c0_39, %c0_40], %40 {strides = array<i32>} : memref<64x128xf32, #tpu.memory_space<vmem>>, vector<64x128xf32>,
    %c0_41 = arith.constant 0 : index
    %c1_42 = arith.constant 1 : index
    %c0_43 = arith.constant 0 : index
    %c0_44 = arith.constant 0 : index
    %42 = vector.load %arg1[%c0_41, %c1_42, %c0_43, %c0_44] : memref<1x10x10x8xbf16, #tpu.memory_space<vmem>>, vector<1x8x10x8xbf16>
    %43 = arith.extf %42 : vector<1x8x10x8xbf16> to vector<1x8x10x8xf32>
    %44 = vector.extract_strided_slice %43 {offsets = [0, 0, 1, 0], sizes = [1, 8, 8, 8], strides = [1, 1, 1, 1]} : vector<1x8x10x8xf32> to vector<1x8x8x8xf32>
    %45 = vector.shape_cast %44 : vector<1x8x8x8xf32> to vector<64x8xf32>
    %46 = arith.truncf %45 : vector<64x8xf32> to vector<64x8xbf16>
    %c4 = arith.constant 4 : index
    %c0_45 = arith.constant 0 : index
    %c0_46 = arith.constant 0 : index
    %47 = vector.load %arg2[%c4, %c0_45, %c0_46] : memref<9x8x128xbf16, #tpu.memory_space<vmem>>, vector<1x8x128xbf16>
    %48 = vector.shape_cast %47 : vector<1x8x128xbf16> to vector<8x128xbf16>
    %cst_47 = arith.constant dense<0.000000e+00> : vector<64x128xf32>
    %49 = tpu.matmul %46, %48, %cst_47 {dimension_numbers = #tpu.dot_dimension_numbers<[1], [0], [0], [1], [0, 0, 1, 1], [], []>} : vector<64x8xbf16>, vector<8x128xbf16>, vector<64x128xf32> -> vector<64x128xf32>
    %c0_48 = arith.constant 0 : index
    %c0_49 = arith.constant 0 : index
    %50 = vector.load %arg10[%c0_48, %c0_49] : memref<64x128xf32, #tpu.memory_space<vmem>>, vector<64x128xf32>
    %51 = arith.addf %50, %49 : vector<64x128xf32>
    %c0_50 = arith.constant 0 : index
    %c0_51 = arith.constant 0 : index
    %52 = vector.load %arg10[%c0_50, %c0_51] : memref<64x128xf32, #tpu.memory_space<vmem>>, vector<64x128xf32>
    tpu.vector_store %arg10[%c0_50, %c0_51], %51 {strides = array<i32>} : memref<64x128xf32, #tpu.memory_space<vmem>>, vector<64x128xf32>,
    %c0_52 = arith.constant 0 : index
    %c1_53 = arith.constant 1 : index
    %c0_54 = arith.constant 0 : index
    %c0_55 = arith.constant 0 : index
    %53 = vector.load %arg1[%c0_52, %c1_53, %c0_54, %c0_55] : memref<1x10x10x8xbf16, #tpu.memory_space<vmem>>, vector<1x8x10x8xbf16>
    %54 = arith.extf %53 : vector<1x8x10x8xbf16> to vector<1x8x10x8xf32>
    %55 = vector.extract_strided_slice %54 {offsets = [0, 0, 2, 0], sizes = [1, 8, 8, 8], strides = [1, 1, 1, 1]} : vector<1x8x10x8xf32> to vector<1x8x8x8xf32>
    %56 = vector.shape_cast %55 : vector<1x8x8x8xf32> to vector<64x8xf32>
    %57 = arith.truncf %56 : vector<64x8xf32> to vector<64x8xbf16>
    %c5 = arith.constant 5 : index
    %c0_56 = arith.constant 0 : index
    %c0_57 = arith.constant 0 : index
    %58 = vector.load %arg2[%c5, %c0_56, %c0_57] : memref<9x8x128xbf16, #tpu.memory_space<vmem>>, vector<1x8x128xbf16>
    %59 = vector.shape_cast %58 : vector<1x8x128xbf16> to vector<8x128xbf16>
    %cst_58 = arith.constant dense<0.000000e+00> : vector<64x128xf32>
    %60 = tpu.matmul %57, %59, %cst_58 {dimension_numbers = #tpu.dot_dimension_numbers<[1], [0], [0], [1], [0, 0, 1, 1], [], []>} : vector<64x8xbf16>, vector<8x128xbf16>, vector<64x128xf32> -> vector<64x128xf32>
    %c0_59 = arith.constant 0 : index
    %c0_60 = arith.constant 0 : index
    %61 = vector.load %arg10[%c0_59, %c0_60] : memref<64x128xf32, #tpu.memory_space<vmem>>, vector<64x128xf32>
    %62 = arith.addf %61, %60 : vector<64x128xf32>
    %c0_61 = arith.constant 0 : index
    %c0_62 = arith.constant 0 : index
    %63 = vector.load %arg10[%c0_61, %c0_62] : memref<64x128xf32, #tpu.memory_space<vmem>>, vector<64x128xf32>
    tpu.vector_store %arg10[%c0_61, %c0_62], %62 {strides = array<i32>} : memref<64x128xf32, #tpu.memory_space<vmem>>, vector<64x128xf32>,
    %c0_63 = arith.constant 0 : index
    %c2_64 = arith.constant 2 : index
    %c0_65 = arith.constant 0 : index
    %c0_66 = arith.constant 0 : index
    %64 = vector.load %arg1[%c0_63, %c2_64, %c0_65, %c0_66] : memref<1x10x10x8xbf16, #tpu.memory_space<vmem>>, vector<1x8x10x8xbf16>
    %65 = arith.extf %64 : vector<1x8x10x8xbf16> to vector<1x8x10x8xf32>
    %66 = vector.extract_strided_slice %65 {offsets = [0, 0, 0, 0], sizes = [1, 8, 8, 8], strides = [1, 1, 1, 1]} : vector<1x8x10x8xf32> to vector<1x8x8x8xf32>
    %67 = vector.shape_cast %66 : vector<1x8x8x8xf32> to vector<64x8xf32>
    %68 = arith.truncf %67 : vector<64x8xf32> to vector<64x8xbf16>
    %c6 = arith.constant 6 : index
    %c0_67 = arith.constant 0 : index
    %c0_68 = arith.constant 0 : index
    %69 = vector.load %arg2[%c6, %c0_67, %c0_68] : memref<9x8x128xbf16, #tpu.memory_space<vmem>>, vector<1x8x128xbf16>
    %70 = vector.shape_cast %69 : vector<1x8x128xbf16> to vector<8x128xbf16>
    %cst_69 = arith.constant dense<0.000000e+00> : vector<64x128xf32>
    %71 = tpu.matmul %68, %70, %cst_69 {dimension_numbers = #tpu.dot_dimension_numbers<[1], [0], [0], [1], [0, 0, 1, 1], [], []>} : vector<64x8xbf16>, vector<8x128xbf16>, vector<64x128xf32> -> vector<64x128xf32>
    %c0_70 = arith.constant 0 : index
    %c0_71 = arith.constant 0 : index
    %72 = vector.load %arg10[%c0_70, %c0_71] : memref<64x128xf32, #tpu.memory_space<vmem>>, vector<64x128xf32>
    %73 = arith.addf %72, %71 : vector<64x128xf32>
    %c0_72 = arith.constant 0 : index
    %c0_73 = arith.constant 0 : index
    %74 = vector.load %arg10[%c0_72, %c0_73] : memref<64x128xf32, #tpu.memory_space<vmem>>, vector<64x128xf32>
    tpu.vector_store %arg10[%c0_72, %c0_73], %73 {strides = array<i32>} : memref<64x128xf32, #tpu.memory_space<vmem>>, vector<64x128xf32>,
    %c0_74 = arith.constant 0 : index
    %c2_75 = arith.constant 2 : index
    %c0_76 = arith.constant 0 : index
    %c0_77 = arith.constant 0 : index
    %75 = vector.load %arg1[%c0_74, %c2_75, %c0_76, %c0_77] : memref<1x10x10x8xbf16, #tpu.memory_space<vmem>>, vector<1x8x10x8xbf16>
    %76 = arith.extf %75 : vector<1x8x10x8xbf16> to vector<1x8x10x8xf32>
    %77 = vector.extract_strided_slice %76 {offsets = [0, 0, 1, 0], sizes = [1, 8, 8, 8], strides = [1, 1, 1, 1]} : vector<1x8x10x8xf32> to vector<1x8x8x8xf32>
    %78 = vector.shape_cast %77 : vector<1x8x8x8xf32> to vector<64x8xf32>
    %79 = arith.truncf %78 : vector<64x8xf32> to vector<64x8xbf16>
    %c7 = arith.constant 7 : index
    %c0_78 = arith.constant 0 : index
    %c0_79 = arith.constant 0 : index
    %80 = vector.load %arg2[%c7, %c0_78, %c0_79] : memref<9x8x128xbf16, #tpu.memory_space<vmem>>, vector<1x8x128xbf16>
    %81 = vector.shape_cast %80 : vector<1x8x128xbf16> to vector<8x128xbf16>
    %cst_80 = arith.constant dense<0.000000e+00> : vector<64x128xf32>
    %82 = tpu.matmul %79, %81, %cst_80 {dimension_numbers = #tpu.dot_dimension_numbers<[1], [0], [0], [1], [0, 0, 1, 1], [], []>} : vector<64x8xbf16>, vector<8x128xbf16>, vector<64x128xf32> -> vector<64x128xf32>
    %c0_81 = arith.constant 0 : index
    %c0_82 = arith.constant 0 : index
    %83 = vector.load %arg10[%c0_81, %c0_82] : memref<64x128xf32, #tpu.memory_space<vmem>>, vector<64x128xf32>
    %84 = arith.addf %83, %82 : vector<64x128xf32>
    %c0_83 = arith.constant 0 : index
    %c0_84 = arith.constant 0 : index
    %85 = vector.load %arg10[%c0_83, %c0_84] : memref<64x128xf32, #tpu.memory_space<vmem>>, vector<64x128xf32>
    tpu.vector_store %arg10[%c0_83, %c0_84], %84 {strides = array<i32>} : memref<64x128xf32, #tpu.memory_space<vmem>>, vector<64x128xf32>,
    %c0_85 = arith.constant 0 : index
    %c2_86 = arith.constant 2 : index
    %c0_87 = arith.constant 0 : index
    %c0_88 = arith.constant 0 : index
    %86 = vector.load %arg1[%c0_85, %c2_86, %c0_87, %c0_88] : memref<1x10x10x8xbf16, #tpu.memory_space<vmem>>, vector<1x8x10x8xbf16>
    %87 = arith.extf %86 : vector<1x8x10x8xbf16> to vector<1x8x10x8xf32>
    %88 = vector.extract_strided_slice %87 {offsets = [0, 0, 2, 0], sizes = [1, 8, 8, 8], strides = [1, 1, 1, 1]} : vector<1x8x10x8xf32> to vector<1x8x8x8xf32>
    %89 = vector.shape_cast %88 : vector<1x8x8x8xf32> to vector<64x8xf32>
    %90 = arith.truncf %89 : vector<64x8xf32> to vector<64x8xbf16>
    %c8 = arith.constant 8 : index
    %c0_89 = arith.constant 0 : index
    %c0_90 = arith.constant 0 : index
    %91 = vector.load %arg2[%c8, %c0_89, %c0_90] : memref<9x8x128xbf16, #tpu.memory_space<vmem>>, vector<1x8x128xbf16>
    %92 = vector.shape_cast %91 : vector<1x8x128xbf16> to vector<8x128xbf16>
    %cst_91 = arith.constant dense<0.000000e+00> : vector<64x128xf32>
    %93 = tpu.matmul %90, %92, %cst_91 {dimension_numbers = #tpu.dot_dimension_numbers<[1], [0], [0], [1], [0, 0, 1, 1], [], []>} : vector<64x8xbf16>, vector<8x128xbf16>, vector<64x128xf32> -> vector<64x128xf32>
    %c0_92 = arith.constant 0 : index
    %c0_93 = arith.constant 0 : index
    %94 = vector.load %arg10[%c0_92, %c0_93] : memref<64x128xf32, #tpu.memory_space<vmem>>, vector<64x128xf32>
    %95 = arith.addf %94, %93 : vector<64x128xf32>
    %c0_94 = arith.constant 0 : index
    %c0_95 = arith.constant 0 : index
    %96 = vector.load %arg10[%c0_94, %c0_95] : memref<64x128xf32, #tpu.memory_space<vmem>>, vector<64x128xf32>
    tpu.vector_store %arg10[%c0_94, %c0_95], %95 {strides = array<i32>} : memref<64x128xf32, #tpu.memory_space<vmem>>, vector<64x128xf32>,
    %c0_96 = arith.constant 0 : index
    %c0_97 = arith.constant 0 : index
    %97 = vector.load %arg10[%c0_96, %c0_97] : memref<64x128xf32, #tpu.memory_space<vmem>>, vector<64x128xf32>
    %c0_98 = arith.constant 0 : index
    %c0_99 = arith.constant 0 : index
    %c0_100 = arith.constant 0 : index
    %c0_101 = arith.constant 0 : index
    %98 = vector.load %arg3[%c0_98, %c0_99, %c0_100, %c0_101] : memref<1x8x8x4xbf16, #tpu.memory_space<vmem>>, vector<1x8x8x4xbf16>
    %99 = arith.extf %98 : vector<1x8x8x4xbf16> to vector<1x8x8x4xf32>
    %100 = vector.shape_cast %99 : vector<1x8x8x4xf32> to vector<64x4xf32>
    %101 = arith.truncf %100 : vector<64x4xf32> to vector<64x4xbf16>
    %c0_102 = arith.constant 0 : index
    %c0_103 = arith.constant 0 : index
    %102 = vector.load %arg4[%c0_102, %c0_103] : memref<4x128xbf16, #tpu.memory_space<vmem>>, vector<4x128xbf16>
    %cst_104 = arith.constant dense<0.000000e+00> : vector<64x128xf32>
    %103 = tpu.matmul %101, %102, %cst_104 {dimension_numbers = #tpu.dot_dimension_numbers<[1], [0], [0], [1], [0, 0, 1, 1], [], []>} : vector<64x4xbf16>, vector<4x128xbf16>, vector<64x128xf32> -> vector<64x128xf32>
    %104 = vector.extract_strided_slice %97 {offsets = [0, 0], sizes = [64, 8], strides = [1, 1]} : vector<64x128xf32> to vector<64x8xf32>
    %c0_105 = arith.constant 0 : index
    %c0_106 = arith.constant 0 : index
    %105 = vector.load %arg5[%c0_105, %c0_106] : memref<1x8xf32, #tpu.memory_space<vmem>>, vector<1x8xf32>
    %106 = vector.broadcast %105 : vector<1x8xf32> to vector<64x8xf32>
    %107 = arith.mulf %104, %106 : vector<64x8xf32>
    %c0_107 = arith.constant 0 : index
    %c0_108 = arith.constant 0 : index
    %108 = vector.load %arg6[%c0_107, %c0_108] : memref<1x8xf32, #tpu.memory_space<vmem>>, vector<1x8xf32>
    %109 = vector.broadcast %108 : vector<1x8xf32> to vector<64x8xf32>
    %110 = arith.addf %107, %109 : vector<64x8xf32>
    %111 = vector.extract_strided_slice %103 {offsets = [0, 0], sizes = [64, 8], strides = [1, 1]} : vector<64x128xf32> to vector<64x8xf32>
    %c0_109 = arith.constant 0 : index
    %c0_110 = arith.constant 0 : index
    %112 = vector.load %arg7[%c0_109, %c0_110] : memref<1x8xf32, #tpu.memory_space<vmem>>, vector<1x8xf32>
    %113 = vector.broadcast %112 : vector<1x8xf32> to vector<64x8xf32>
    %114 = arith.mulf %111, %113 : vector<64x8xf32>
    %115 = arith.addf %110, %114 : vector<64x8xf32>
    %c0_111 = arith.constant 0 : index
    %c0_112 = arith.constant 0 : index
    %116 = vector.load %arg8[%c0_111, %c0_112] : memref<1x8xf32, #tpu.memory_space<vmem>>, vector<1x8xf32>
    %117 = vector.broadcast %116 : vector<1x8xf32> to vector<64x8xf32>
    %118 = arith.addf %115, %117 : vector<64x8xf32>
    %cst_113 = arith.constant 0.000000e+00 : f32
    %119 = vector.broadcast %cst_113 : f32 to vector<64x8xf32>
    %120 = arith.maximumf %118, %119 : vector<64x8xf32>
    %121 = vector.shape_cast %120 : vector<64x8xf32> to vector<1x8x8x8xf32>
    %c0_114 = arith.constant 0 : index
    %c0_115 = arith.constant 0 : index
    %c0_116 = arith.constant 0 : index
    %c0_117 = arith.constant 0 : index
    %122 = vector.load %arg9[%c0_114, %c0_115, %c0_116, %c0_117] : memref<1x8x8x8xf32, #tpu.memory_space<vmem>>, vector<1x8x8x8xf32>
    tpu.vector_store %arg9[%c0_114, %c0_115, %c0_116, %c0_117], %121 {strides = array<i32>} : memref<1x8x8x8xf32, #tpu.memory_space<vmem>>, vector<1x8x8x8xf32>,
    return
  }
  func.func @transform_0(%arg0: i32) -> (i32, i32, i32, i32) {
    %c0_i32 = arith.constant 0 : i32
    %c0_i32_0 = arith.constant 0 : i32
    %c0_i32_1 = arith.constant 0 : i32
    %c0_i32_2 = arith.constant 0 : i32
    return %arg0, %c0_i32, %c0_i32_0, %c0_i32_1 : i32, i32, i32, i32
  }
  func.func @transform_1(%arg0: i32) -> (i32, i32, i32) {
    %c0_i32 = arith.constant 0 : i32
    %c0_i32_0 = arith.constant 0 : i32
    %c0_i32_1 = arith.constant 0 : i32
    %c0_i32_2 = arith.constant 0 : i32
    return %c0_i32, %c0_i32_0, %c0_i32_1 : i32, i32, i32
  }
  func.func @transform_2(%arg0: i32) -> (i32, i32, i32, i32) {
    %c0_i32 = arith.constant 0 : i32
    %c0_i32_0 = arith.constant 0 : i32
    %c0_i32_1 = arith.constant 0 : i32
    %c0_i32_2 = arith.constant 0 : i32
    return %arg0, %c0_i32, %c0_i32_0, %c0_i32_1 : i32, i32, i32, i32
  }
  func.func @transform_3(%arg0: i32) -> (i32, i32) {
    %c0_i32 = arith.constant 0 : i32
    %c0_i32_0 = arith.constant 0 : i32
    %c0_i32_1 = arith.constant 0 : i32
    return %c0_i32, %c0_i32_0 : i32, i32
  }
  func.func @transform_4(%arg0: i32) -> (i32, i32) {
    %c0_i32 = arith.constant 0 : i32
    %c0_i32_0 = arith.constant 0 : i32
    %c0_i32_1 = arith.constant 0 : i32
    return %c0_i32, %c0_i32_0 : i32, i32
  }
  func.func @transform_5(%arg0: i32) -> (i32, i32) {
    %c0_i32 = arith.constant 0 : i32
    %c0_i32_0 = arith.constant 0 : i32
    %c0_i32_1 = arith.constant 0 : i32
    return %c0_i32, %c0_i32_0 : i32, i32
  }
  func.func @transform_6(%arg0: i32) -> (i32, i32) {
    %c0_i32 = arith.constant 0 : i32
    %c0_i32_0 = arith.constant 0 : i32
    %c0_i32_1 = arith.constant 0 : i32
    return %c0_i32, %c0_i32_0 : i32, i32
  }
  func.func @transform_7(%arg0: i32) -> (i32, i32) {
    %c0_i32 = arith.constant 0 : i32
    %c0_i32_0 = arith.constant 0 : i32
    %c0_i32_1 = arith.constant 0 : i32
    return %c0_i32, %c0_i32_0 : i32, i32
  }
  func.func @transform_8(%arg0: i32) -> (i32, i32, i32, i32) {
    %c0_i32 = arith.constant 0 : i32
    %c0_i32_0 = arith.constant 0 : i32
    %c0_i32_1 = arith.constant 0 : i32
    %c0_i32_2 = arith.constant 0 : i32
    return %arg0, %c0_i32, %c0_i32_0, %c0_i32_1 : i32, i32, i32, i32
  }
}

</mosaic_0001>

<bundles_post_ra>
// kernel: residual_block.3
= control target key start
LH: loop header
LB: loop body
LE: loop exit
PB: predicated region body
PF: predicated region fallthrough
CT: control target
= control target key end

     0   :  { %s2440_s12 = smov 0   ;;  %s2442_s13 = smov 0   ;;  %s2776_s0 = inlined_call_operand.vmem [shape: bf16[4,2,9,9,4], index: 0, kind: input, shape index: {}]   ;;  %s2777_s1 = inlined_call_operand.vmem [shape: bf16[9,4,128], index: 1, kind: input, shape index: {}]   ;;  %s2778_s2 = inlined_call_operand.vmem [shape: bf16[2,8,8,8], index: 2, kind: output, shape index: {0}]   ;;  %s2779_s3 = inlined_call_operand.vmem [shape: f32[2,2,128], index: 3, kind: output, shape index: {1}]  }
   0x1   :  { %s2444_s14 = smov 0  }
   0x2 LB: > { %s1982_s15 = sadd.s32 4294967295, %s2418_s14   ;;  %s2457_s16 = sadd.s32 1, %s2418_s14   ;;  %s2418_s14 = sphi %s2444_s14, %s2782_s14   ;;  %s2414_s13 = sphi %s2442_s13, %s2781_s13   ;;  %s2410_s12 = sphi %s2440_s12, %s2780_s12  }
   0x3   : > { %s18_s17 = ssub.s32 %s2418_s14, %s2457_s16  ;;  %s21_s18 = sadd.s32 1, %s2414_s13 }
   0x4   : > { %p19_p0 = scmp.eq.s32.totalorder %s18_s17, 0  ;;  %p28_p1 = scmp.ne.s32.totalorder %s2414_s13, %s2410_s12 }
   0x5   : > { %p29_p2 = scmp.eq.s32.totalorder %s2418_s14, 0  ;;  %p1985_p4 = scmp.ge.s32.totalorder %s2418_s14, 2 }
   0x6   : > { %s2466_s19 = scalar_select %p19_p0, %s2414_s13, %s21_s18  }
   0x7   : > { %p30_p3 = por %p29_p2, %p28_p1  ;;  %130 = sbr.rel (%p1985_p4) target bundleno = 37 (0x25), region = 20 }
   0xe   : > { %133 = sbr.rel (!%p30_p3) target bundleno = 37 (0x25), region = 24  ;;  %s135_s20 = sand.u32 (%p30_p3), 1, %s2414_s13  }
   0xf   : > { %s2346_s21 = smul.u32 (%p30_p3), 72, %s2418_s14 }
  0x10   : > { %s2345_s22 = smul.u32 (%p30_p3), 288, %s135_s20 }
  0x11   : > { %s2474_s25 = scalar_lea.vmem (%p30_p3), %s2776_s0, %s2346_s21 }
  0x12   : > { %v156_v0 = vld [vmem:[%s2474_s25] sm:$0xff] (%p30_p3)   ;;  %v160_v1 = vld [vmem:[%s2474_s25 + $0x8] sm:$0xff] (%p30_p3)   ;;  %v164_v2 = vld [vmem:[%s2474_s25 + $0x10] sm:$0xff] (%p30_p3)   ;;  %s2479_s26 = scalar_lea.vmem (%p30_p3), [#allocation3], %s2345_s22 }
  0x13   : > { %157 = vst [vmem:[%s2479_s26] sm:$0xff] (%p30_p3), %v156_v0   ;;  %161 = vst [vmem:[%s2479_s26 + $0x8] sm:$0xff] (%p30_p3), %v160_v1   ;;  %v168_v3 = vld [vmem:[%s2474_s25 + $0x18] sm:$0xff] (%p30_p3)   ;;  %v172_v4 = vld [vmem:[%s2474_s25 + $0x20] sm:$0xff] (%p30_p3)  }
  0x14   : > { %165 = vst [vmem:[%s2479_s26 + $0x10] sm:$0xff] (%p30_p3), %v164_v2   ;;  %v176_v5 = vld [vmem:[%s2474_s25 + $0x28] sm:$0xff] (%p30_p3)   ;;  %169 = vst [vmem:[%s2479_s26 + $0x18] sm:$0xff] (%p30_p3), %v168_v3   ;;  %v180_v6 = vld [vmem:[%s2474_s25 + $0x30] sm:$0xff] (%p30_p3)  }
  0x15   : > { %173 = vst [vmem:[%s2479_s26 + $0x20] sm:$0xff] %v172_v4   ;;  %177 = vst [vmem:[%s2479_s26 + $0x28] sm:$0xff] %v176_v5   ;;  %v184_v7 = vld [vmem:[%s2474_s25 + $0x38] sm:$0xff]   ;;  %v188_v8 = vld [vmem:[%s2474_s25 + $0x40] sm:$0xff]  }
  0x16   : > { %181 = vst [vmem:[%s2479_s26 + $0x30] sm:$0xff] %v180_v6   ;;  %185 = vst [vmem:[%s2479_s26 + $0x38] sm:$0xff] %v184_v7   ;;  %v192_v9 = vld [vmem:[%s2474_s25 + $0x90] sm:$0xff]   ;;  %v196_v10 = vld [vmem:[%s2474_s25 + $0x98] sm:$0xff]  }
  0x17   : > { %189 = vst [vmem:[%s2479_s26 + $0x40] sm:$0xff] %v188_v8   ;;  %v200_v11 = vld [vmem:[%s2474_s25 + $0xa0] sm:$0xff]   ;;  %193 = vst [vmem:[%s2479_s26 + $0x48] sm:$0xff] %v192_v9   ;;  %v204_v12 = vld [vmem:[%s2474_s25 + $0xa8] sm:$0xff]  }
  0x18   : > { %197 = vst [vmem:[%s2479_s26 + $0x50] sm:$0xff] %v196_v10   ;;  %201 = vst [vmem:[%s2479_s26 + $0x58] sm:$0xff] %v200_v11   ;;  %v208_v13 = vld [vmem:[%s2474_s25 + $0xb0] sm:$0xff]   ;;  %v212_v14 = vld [vmem:[%s2474_s25 + $0xb8] sm:$0xff]  }
  0x19   : > { %205 = vst [vmem:[%s2479_s26 + $0x60] sm:$0xff] %v204_v12   ;;  %209 = vst [vmem:[%s2479_s26 + $0x68] sm:$0xff] %v208_v13   ;;  %v216_v15 = vld [vmem:[%s2474_s25 + $0xc0] sm:$0xff]   ;;  %v220_v16 = vld [vmem:[%s2474_s25 + $0xc8] sm:$0xff]  }
  0x1a   : > { %213 = vst [vmem:[%s2479_s26 + $0x70] sm:$0xff] %v212_v14   ;;  %v224_v17 = vld [vmem:[%s2474_s25 + $0xd0] sm:$0xff]   ;;  %217 = vst [vmem:[%s2479_s26 + $0x78] sm:$0xff] %v216_v15   ;;  %v228_v18 = vld [vmem:[%s2474_s25 + $0x120] sm:$0xff]  }
  0x1b   : > { %221 = vst [vmem:[%s2479_s26 + $0x80] sm:$0xff] %v220_v16   ;;  %225 = vst [vmem:[%s2479_s26 + $0x88] sm:$0xff] %v224_v17   ;;  %v232_v19 = vld [vmem:[%s2474_s25 + $0x128] sm:$0xff]   ;;  %v236_v20 = vld [vmem:[%s2474_s25 + $0x130] sm:$0xff]  }
  0x1c   : > { %229 = vst [vmem:[%s2479_s26 + $0x90] sm:$0xff] %v228_v18   ;;  %233 = vst [vmem:[%s2479_s26 + $0x98] sm:$0xff] %v232_v19   ;;  %v240_v21 = vld [vmem:[%s2474_s25 + $0x138] sm:$0xff]   ;;  %v244_v22 = vld [vmem:[%s2474_s25 + $0x140] sm:$0xff]  }
  0x1d   : > { %237 = vst [vmem:[%s2479_s26 + $0xa0] sm:$0xff] %v236_v20   ;;  %v248_v23 = vld [vmem:[%s2474_s25 + $0x148] sm:$0xff]   ;;  %241 = vst [vmem:[%s2479_s26 + $0xa8] sm:$0xff] %v240_v21   ;;  %v252_v24 = vld [vmem:[%s2474_s25 + $0x150] sm:$0xff]  }
  0x1e   : > { %245 = vst [vmem:[%s2479_s26 + $0xb0] sm:$0xff] %v244_v22   ;;  %249 = vst [vmem:[%s2479_s26 + $0xb8] sm:$0xff] %v248_v23   ;;  %v256_v25 = vld [vmem:[%s2474_s25 + $0x158] sm:$0xff]   ;;  %v260_v26 = vld [vmem:[%s2474_s25 + $0x160] sm:$0xff]  }
  0x1f   : > { %253 = vst [vmem:[%s2479_s26 + $0xc0] sm:$0xff] %v252_v24   ;;  %257 = vst [vmem:[%s2479_s26 + $0xc8] sm:$0xff] %v256_v25   ;;  %v264_v27 = vld [vmem:[%s2474_s25 + $0x1b0] sm:$0xff]   ;;  %v268_v28 = vld [vmem:[%s2474_s25 + $0x1b8] sm:$0xff]  }
  0x20   : > { %261 = vst [vmem:[%s2479_s26 + $0xd0] sm:$0xff] %v260_v26   ;;  %v272_v29 = vld [vmem:[%s2474_s25 + $0x1c0] sm:$0xff]   ;;  %265 = vst [vmem:[%s2479_s26 + $0xd8] sm:$0xff] %v264_v27   ;;  %v276_v30 = vld [vmem:[%s2474_s25 + $0x1c8] sm:$0xff]  }
  0x21   : > { %269 = vst [vmem:[%s2479_s26 + $0xe0] sm:$0xff] %v268_v28   ;;  %273 = vst [vmem:[%s2479_s26 + $0xe8] sm:$0xff] %v272_v29   ;;  %v280_v31 = vld [vmem:[%s2474_s25 + $0x1d0] sm:$0xff]   ;;  %v284_v32 = vld [vmem:[%s2474_s25 + $0x1d8] sm:$0xff]  }
  0x22   : > { %277 = vst [vmem:[%s2479_s26 + $0xf0] sm:$0xff] %v276_v30   ;;  %281 = vst [vmem:[%s2479_s26 + $0xf8] sm:$0xff] %v280_v31   ;;  %v288_v33 = vld [vmem:[%s2474_s25 + $0x1e0] sm:$0xff]   ;;  %v292_v34 = vld [vmem:[%s2474_s25 + $0x1e8] sm:$0xff]  }
  0x23   : > { %285 = vst [vmem:[%s2479_s26 + $0x100] sm:$0xff] %v284_v32   ;;  %v296_v35 = vld [vmem:[%s2474_s25 + $0x1f0] sm:$0xff]   ;;  %289 = vst [vmem:[%s2479_s26 + $0x108] sm:$0xff] %v288_v33  }
  0x24   : > { %293 = vst [vmem:[%s2479_s26 + $0x110] sm:$0xff] %v292_v34   ;;  %297 = vst [vmem:[%s2479_s26 + $0x118] sm:$0xff] %v296_v35  }
  0x25 PF: > { %p1987_p5 = scmp.ge.s32.totalorder %s2418_s14, 1  ;;  %p465_p6 = scmp.lt.s32.totalorder %s2418_s14, 3 }
  0x27   : > { %p466_p7 = pnand %p1987_p5, %p465_p6 }
  0x28   : > { %v529_v36 = vld [vmem:[%s2777_s1] sm:$0x3] (!%p466_p7)  ;;  %vm543_vm0 = vcmask (!%p466_p7), 1041408   ;;  %v2558_v37 = vld [vmem:[%s2777_s1 + $0x8] sm:$0x3] (!%p466_p7)  ;;  %s472_s4 = sand.u32 (!%p466_p7), 1, %s2410_s12  }
  0x29   : > { %469 = sbr.rel (%p466_p7) target bundleno = 356 (0x164), region = 65  ;;  %2335 = vmatprep.subr.msk.bf16.mxu1 (!%p466_p7), %vm543_vm0, %v529_v36  ;;  %2339 = vmatprep.subr.msk.bf16.mxu0 (!%p466_p7), %vm543_vm0, %v2558_v37  ;;  %v545_v38 = vsel (!%p466_p7), %vm543_vm0, %v529_v36, 0  ;;  %v2567_v39 = vsel (!%p466_p7), %vm543_vm0, %v2558_v37, 0  ;;  %v2011_v40 = vld [vmem:[%s2777_s1 + $0x2] sm:$0x3] (!%p466_p7)  ;;  %vm530_vm1 = vcmask (!%p466_p7), 31744  }
  0x2a   : > { %s2347_s5 = smul.u32 (!%p466_p7), 288, %s472_s4  ;;  %2180 = vmatpush3.bf16.msra.mxu1 (!%p466_p7), %v545_v38  ;;  %2220 = vmatpush3.bf16.msra.mxu0 (!%p466_p7), %v2567_v39  ;;  %v2071_v41 = vld [vmem:[%s2777_s1 + $0xa] sm:$0x3] (!%p466_p7)  ;;  %v656_v42 = vsel (!%p466_p7), %vm543_vm0, %v2011_v40, 0  ;;  %v2088_v47 = vld [vmem:[%s2777_s1 + $0xc] sm:$0x3] (!%p466_p7) }
  0x2b   : > { %2336 = vmatprep.subr.msk.bf16.mxu1 (!%p466_p7), %vm543_vm0, %v2011_v40  ;;  %2341 = vmatprep.subr.msk.bf16.mxu0 (!%p466_p7), %vm543_vm0, %v2071_v41  ;;  %v1291_v43 = vsel (!%p466_p7), %vm543_vm0, %v2071_v41, 0  ;;  %v2592_v48 = vld [vmem:[%s2777_s1 + $0x4] sm:$0x3] (!%p466_p7)  ;;  %vm795_vm2 = vcmask (!%p466_p7), 1046528   ;;  %v1418_v13 = vsel (!%p466_p7), %vm543_vm0, %v2088_v47, 0  ;;  %p499_p8 = scmp.lt.s32.totalorder (!%p466_p7), %s1982_s15, 1 }
  0x2c   : > { %s2580_s10 = scalar_lea.vmem (!%p466_p7), [#allocation3], %s2347_s5  ;;  %vm1881_vm3 = vcmask (!%p466_p7), 60416  }
  0x2d   : > { %v2372_v44 = vld [vmem:[%s2580_s10] ss:$8 sps:$4 sm:$0xff] (!%p466_p7)   ;;  %v2374_v46 = vld [vmem:[%s2580_s10 + $0x10] ss:$8 sps:$4 sm:$0xff] (!%p466_p7)   ;;  %v2056_v53 = vld [vmem:[%s2580_s10 + $0x94] sm:$0x1] (!%p466_p7) }
  0x2e   : > { %v2373_v45 = vld [vmem:[%s2580_s10 + $0xd8] ss:$8 sps:$4 sm:$0xff] (!%p466_p7)   ;;  %2181 = vmatprep.mubr.msk.bf16.mxu1 (!%p466_p7), %vm530_vm1, %v2372_v44  ;;  %v2375_v49 = vld [vmem:[%s2580_s10 + $0xe8] ss:$8 sps:$4 sm:$0xff] (!%p466_p7)   ;;  %v2058_v54 = vld [vmem:[%s2580_s10 + $0x9c] sm:$0x1] (!%p466_p7)  ;;  %v1209_v56 = vunpack.c.l.bf16 (!%p466_p7), %v2056_v53 }
  0x2f   : > { %2221 = vmatprep.mubr.msk.bf16.mxu0 (!%p466_p7), %vm530_vm1, %v2373_v45  ;;  %2182 = vmatmul.mubr.msk.bf16.vlgmr.msra.gmra.mrb[0].mxu1 (!%p466_p7), %vm530_vm1, %v2374_v46  ;;  %v2376_v50 = vld [vmem:[%s2580_s10 + $0x20] ss:$8 sps:$4 sm:$0xff] (!%p466_p7)   ;;  %v2377_v51 = vld [vmem:[%s2580_s10 + $0x30] ss:$8 sps:$4 sm:$0xff] (!%p466_p7)   ;;  %v1211_v58 = vunpack.c.l.bf16 (!%p466_p7), %v2058_v54  ;;  %v2060_v60 = vld [vmem:[%s2580_s10 + $0xa4] sm:$0x1] (!%p466_p7) }
  0x30   : > { %2190 = vmatpush3.bf16.msra.mxu1 %v656_v42  ;;  %2222 = vmatmul.mubr.msk.bf16.vlgmr.msra.gmra.mrb[0].mxu0 %vm530_vm1, %v2375_v49  ;;  %v2055_v52 = vld [vmem:[%s2580_s10 + $0x90] ss:$8 sps:$4 sm:$0xff]   ;;  %v2059_v59 = vld [vmem:[%s2580_s10 + $0xa0] ss:$8 sps:$4 sm:$0xff]   ;;  %v2062_v61 = vld [vmem:[%s2580_s10 + $0xac] sm:$0x1]  ;;  %v1213_v63 = vunpack.c.l.bf16 %v2060_v60 }
  0x31   : > { %2230 = vmatpush3.bf16.msra.mxu0 %v1291_v43  ;;  %2185 = vmatprep.mubr.msk.bf16.mxu1 %vm530_vm1, %v2376_v50  ;;  %v1208_v55 = vunpack.c.l.bf16 %v2055_v52  ;;  %v1210_v57 = vunpack.c.h.bf16 %v2055_v52  ;;  %v1212_v62 = vunpack.c.l.bf16 %v2059_v59  ;;  %v1214_v0 = vunpack.c.h.bf16 %v2059_v59  ;;  %v2378_v2 = vld [vmem:[%s2580_s10 + $0x48] ss:$8 sps:$4 sm:$0xff]   ;;  %v2064_v18 = vld [vmem:[%s2580_s10 + $0xb4] sm:$0x1]  ;;  %v2066_v19 = vld [vmem:[%s2580_s10 + $0xbc] sm:$0x1] }
  0x32   : > { %2342 = vmatprep.subr.msk.bf16.mxu0 %vm543_vm0, %v2088_v47  ;;  %2337 = vmatprep.subr.msk.bf16.mxu1 %vm543_vm0, %v2592_v48  ;;  %v1215_v1 = vunpack.c.l.bf16 %v2062_v61  ;;  %v1241_v4 = vrot.slane %v1209_v56, 1  ;;  %v1244_v6 = vrot.slane %v1211_v58, 1  ;;  %v1247_v8 = vrot.slane %v1213_v63, 1  ;;  %v2063_v14 = vld [vmem:[%s2580_s10 + $0xb0] ss:$8 sps:$4 sm:$0xff]   ;;  %s2784_s15 = smov (!%p499_p8, %s1982_s15), 1 }
  0x33   : > { %v1240_v3 = vrot.slane %v1208_v55, 1  ;;  %v1243_v5 = vrot.slane %v1210_v57, 1  ;;  %v1246_v7 = vrot.slane %v1212_v62, 1  ;;  %v1249_v9 = vrot.slane %v1214_v0, 1  ;;  %v2067_v21 = vld [vmem:[%s2580_s10 + $0xc0] ss:$8 sps:$4 sm:$0xff]  }
  0x34   : > { %v1250_v10 = vrot.slane %v1215_v1, 1  ;;  %v1216_v20 = vunpack.c.l.bf16 %v2063_v14  ;;  %v1217_v23 = vunpack.c.l.bf16 %v2064_v18  ;;  %v1218_v24 = vunpack.c.h.bf16 %v2063_v14  ;;  %v2068_v26 = vld [vmem:[%s2580_s10 + $0xc4] sm:$0x1]  ;;  %v2070_v27 = vld [vmem:[%s2580_s10 + $0xcc] sm:$0x1]  ;;  %s2133_s26 = sshll.u32 %s2784_s15, 5 }
  0x35   : > { %v1242_v11 = vsel %vm795_vm2, %v1240_v3, %v1241_v4  ;;  %v1245_v12 = vsel %vm795_vm2, %v1243_v5, %v1244_v6  ;;  %v1248_v16 = vsel %vm795_vm2, %v1246_v7, %v1247_v8  ;;  %v1219_v25 = vunpack.c.l.bf16 %v2066_v19  ;;  %v2379_v28 = vld [vmem:[%s2580_s10 + $0x58] ss:$8 sps:$4 sm:$0xff]   ;;  %v2380_v45 = vld [vmem:[%s2580_s10 + $0x68] ss:$8 sps:$4 sm:$0xff]   ;;  %v2105_v50 = vld [vmem:[%s2777_s1 + $0xe] sm:$0x3]  ;;  %s2744_s29 = scalar_lea.vmem %s2778_s2, %s2133_s26 }
  0x36   : > { %v1272_v15 = vpack.c.bf16 %v1245_v12, %v1242_v11  ;;  %v1251_v17 = vsel %vm795_vm2, %v1249_v9, %v1250_v10  ;;  %v1252_v29 = vrot.slane %v1216_v20, 1  ;;  %v1220_v30 = vunpack.c.l.bf16 %v2067_v21  ;;  %v748_v52 = vld [vmem:[%s2580_s10 + $0x4] sm:$0x1]  ;;  %v750_v54 = vld [vmem:[%s2580_s10 + $0xc] sm:$0x1]  ;;  %s1990_s14 = sshll.u32 %s2784_s15, 1 }
  0x37   : > { %2186 = vmatmul.mubr.msk.bf16.gmra.mrb[4].mxu1 %vm530_vm1, %v2377_v51  ;;  %v1273_v22 = vpack.c.bf16 %v1251_v17, %v1248_v16  ;;  %v1221_v31 = vunpack.c.l.bf16 %v2068_v26  ;;  %v1222_v32 = vunpack.c.h.bf16 %v2067_v21  ;;  %v1253_v33 = vrot.slane %v1217_v23, 1  ;;  %v2033_v58 = vld [vmem:[%s2777_s1 + $0x6] sm:$0x3]  ;;  %v751_v59 = vld [vmem:[%s2580_s10 + $0x10] ss:$8 sps:$4 sm:$0xff]   ;;  %s507_s5 = scalar_lea.vmem %s2779_s3, %s1990_s14 }
  0x38   : > { %2191 = vmatprep.mubr.msk.bf16.mxu1 %vm530_vm1, %v2378_v2  ;;  %2231 = vmatprep.mubr.msk.bf16.mxu0 %vm530_vm1, %v1272_v15  ;;  %v1255_v34 = vrot.slane %v1218_v24, 1  ;;  %v1256_v35 = vrot.slane %v1219_v25, 1  ;;  %v1223_v36 = vunpack.c.l.bf16 %v2070_v27  ;;  %v1258_v38 = vrot.slane %v1220_v30, 1  ;;  %v2382_v60 = vld [vmem:[%s2580_s10 + $0x8] ss:$8 sps:$4 sm:$0xff]  }
  0x39   : > { %v1259_v40 = vrot.slane %v1221_v31, 1  ;;  %v1261_v41 = vrot.slane %v1222_v32, 1  ;;  %v1254_v42 = vsel %vm795_vm2, %v1252_v29, %v1253_v33  ;;  %v847_v46 = vsel %vm543_vm0, %v2592_v48, 0  ;;  %v747_v48 = vld [vmem:[%s2580_s10] ss:$8 sps:$4 sm:$0xff]  }
  0x3a   : > { %v1257_v43 = vsel %vm795_vm2, %v1255_v34, %v1256_v35  ;;  %v1262_v44 = vrot.slane %v1223_v36, 1  ;;  %v763_v55 = vunpack.c.l.bf16 %v747_v48  ;;  %v764_v56 = vunpack.c.l.bf16 %v748_v52  ;;  %v752_v62 = vld [vmem:[%s2580_s10 + $0x14] sm:$0x1]  ;;  %v754_v63 = vld [vmem:[%s2580_s10 + $0x1c] sm:$0x1] }
  0x3b   : > { %v1274_v47 = vpack.c.bf16 %v1257_v43, %v1254_v42  ;;  %v1260_v49 = vsel %vm795_vm2, %v1258_v38, %v1259_v40  ;;  %v765_v57 = vunpack.c.h.bf16 %v747_v48  ;;  %v766_v61 = vunpack.c.l.bf16 %v750_v54  ;;  %v2381_v6 = vld [vmem:[%s2580_s10 + $0x78] ss:$8 sps:$4 sm:$0xff]   ;;  %v756_v17 = vld [vmem:[%s2580_s10 + $0x24] sm:$0x1]  ;;  %v758_v18 = vld [vmem:[%s2580_s10 + $0x2c] sm:$0x1] }
  0x3c   : > { %2232 = vmatmul.mubr.msk.bf16.vlgmr.msra.gmra.mrb[0].mxu0 %vm530_vm1, %v1273_v22  ;;  %v1263_v51 = vsel %vm795_vm2, %v1261_v41, %v1262_v44  ;;  %v767_v0 = vunpack.c.l.bf16 %v751_v59  ;;  %v769_v1 = vunpack.c.h.bf16 %v751_v59  ;;  %v796_v2 = vrot.slane %v763_v55, 1  ;;  %v755_v16 = vld [vmem:[%s2580_s10 + $0x20] ss:$8 sps:$4 sm:$0xff]   ;;  %v759_v23 = vld [vmem:[%s2580_s10 + $0x30] ss:$8 sps:$4 sm:$0xff]  }
  0x3d   : > { %2240 = vmatpush3.bf16.msra.mxu0 %v1418_v13  ;;  %2235 = vmatprep.mubr.msk.bf16.mxu0 %vm530_vm1, %v1274_v47  ;;  %v1275_v53 = vpack.c.bf16 %v1263_v51, %v1260_v49  ;;  %v797_v3 = vrot.slane %v764_v56, 1  ;;  %v799_v4 = vrot.slane %v765_v57, 1  ;;  %v768_v5 = vunpack.c.l.bf16 %v752_v62  ;;  %v760_v24 = vld [vmem:[%s2580_s10 + $0x34] sm:$0x1]  ;;  %v762_v25 = vld [vmem:[%s2580_s10 + $0x3c] sm:$0x1] }
  0x3e   : > { %2343 = vmatprep.subr.msk.bf16.mxu0 %vm543_vm0, %v2105_v50  ;;  %v800_v7 = vrot.slane %v766_v61, 1  ;;  %v770_v8 = vunpack.c.l.bf16 %v754_v63  ;;  %v802_v9 = vrot.slane %v767_v0, 1  ;;  %v805_v12 = vrot.slane %v769_v1, 1  ;;  %v2383_v26 = vld [vmem:[%s2580_s10 + $0x18] ss:$8 sps:$4 sm:$0xff]  }
  0x3f   : > { %2192 = vmatmul.mubr.msk.bf16.vlgmr.msra.gmra.mrb[0].mxu1 %vm530_vm1, %v2379_v28  ;;  %v798_v10 = vsel %vm795_vm2, %v796_v2, %v797_v3  ;;  %v803_v11 = vrot.slane %v768_v5, 1  ;;  %v771_v20 = vunpack.c.l.bf16 %v755_v16  ;;  %v772_v21 = vunpack.c.l.bf16 %v756_v17  ;;  %v2384_v31 = vld [vmem:[%s2580_s10 + $0x28] ss:$8 sps:$4 sm:$0xff]   ;;  %v2385_v48 = vld [vmem:[%s2580_s10 + $0x38] ss:$8 sps:$4 sm:$0xff]  }
  0x40   : > { %2200 = vmatpush3.bf16.msra.mxu1 %v847_v46  ;;  %2195 = vmatprep.mubr.msk.bf16.mxu1 %vm530_vm1, %v2380_v45  ;;  %v801_v13 = vsel %vm795_vm2, %v799_v4, %v800_v7  ;;  %v806_v14 = vrot.slane %v770_v8, 1  ;;  %v773_v22 = vunpack.c.h.bf16 %v755_v16  ;;  %v774_v28 = vunpack.c.l.bf16 %v758_v18  ;;  %v2126_v45 = vld [vmem:[%s2777_s1 + $0x10] sm:$0x3]  ;;  %v2111_v57 = vld [vmem:[%s2580_s10 + $0xc] sm:$0x1] }
  0x41   : > { %2338 = vmatprep.subr.msk.bf16.mxu1 %vm543_vm0, %v2033_v58  ;;  %v828_v15 = vpack.c.bf16 %v801_v13, %v798_v10  ;;  %v804_v19 = vsel %vm795_vm2, %v802_v9, %v803_v11  ;;  %v775_v29 = vunpack.c.l.bf16 %v759_v23  ;;  %v776_v30 = vunpack.c.l.bf16 %v760_v24  ;;  %v2386_v54 = vld [vmem:[%s2580_s10 + $0x50] ss:$8 sps:$4 sm:$0xff]   ;;  %v2387_v63 = vld [vmem:[%s2580_s10 + $0x60] ss:$8 sps:$4 sm:$0xff]   ;;  %v2115_v3 = vld [vmem:[%s2580_s10 + $0x1c] sm:$0x1] }
  0x42   : > { %v807_v27 = vsel %vm795_vm2, %v805_v12, %v806_v14  ;;  %v808_v32 = vrot.slane %v771_v20, 1  ;;  %v809_v33 = vrot.slane %v772_v21, 1  ;;  %v811_v34 = vrot.slane %v773_v22, 1  ;;  %v2110_v56 = vld [vmem:[%s2580_s10 + $0x8] ss:$8 sps:$4 sm:$0xff]  }
  0x43   : > { %v777_v35 = vunpack.c.h.bf16 %v759_v23  ;;  %v1545_v36 = vsel %vm543_vm0, %v2105_v50, 0  ;;  %v812_v38 = vrot.slane %v774_v28, 1  ;;  %v778_v40 = vunpack.c.l.bf16 %v762_v25  ;;  %v2388_v59 = vld [vmem:[%s2580_s10 + $0x90] ss:$8 sps:$4 sm:$0xff]   ;;  %v2117_v4 = vld [vmem:[%s2580_s10 + $0x24] sm:$0x1] }
  0x44   : > { %2236 = vmatmul.mubr.msk.bf16.gmra.mrb[4].mxu0 %vm530_vm1, %v1275_v53  ;;  %v829_v41 = vpack.c.bf16 %v807_v27, %v804_v19  ;;  %v810_v42 = vsel %vm795_vm2, %v808_v32, %v809_v33  ;;  %v814_v43 = vrot.slane %v775_v29, 1  ;;  %v815_v44 = vrot.slane %v776_v30, 1  ;;  %v2390_v1 = vld [vmem:[%s2580_s10 + $0x70] ss:$8 sps:$4 sm:$0xff]   ;;  %v2389_v10 = vld [vmem:[%s2580_s10 + $0xa0] ss:$8 sps:$4 sm:$0xff]  }
  0x45   : > { %2241 = vmatprep.mubr.msk.bf16.mxu0 %vm530_vm1, %v2382_v60  ;;  %v813_v46 = vsel %vm795_vm2, %v811_v34, %v812_v38  ;;  %v817_v47 = vrot.slane %v777_v35, 1  ;;  %v818_v49 = vrot.slane %v778_v40, 1  ;;  %v974_v50 = vsel %vm543_vm0, %v2033_v58, 0  ;;  %v2113_v58 = vld [vmem:[%s2580_s10 + $0x14] sm:$0x1] }
  0x46   : > { %v830_v51 = vpack.c.bf16 %v813_v46, %v810_v42  ;;  %v816_v52 = vsel %vm795_vm2, %v814_v43, %v815_v44  ;;  %v1652_v60 = vunpack.c.l.bf16 %v2110_v56  ;;  %v1653_v61 = vunpack.c.l.bf16 %v2111_v57  ;;  %v2114_v2 = vld [vmem:[%s2580_s10 + $0x18] ss:$8 sps:$4 sm:$0xff]   ;;  %v2118_v9 = vld [vmem:[%s2580_s10 + $0x28] ss:$8 sps:$4 sm:$0xff]   ;;  %v2119_v11 = vld [vmem:[%s2580_s10 + $0x2c] sm:$0x1] }
  0x47   : > { %2196 = vmatmul.mubr.msk.bf16.gmra.mrb[4].mxu1 %vm530_vm1, %v2381_v6  ;;  %v819_v53 = vsel %vm795_vm2, %v817_v47, %v818_v49  ;;  %v1654_v62 = vunpack.c.h.bf16 %v2110_v56  ;;  %v1735_v0 = vsel %vm543_vm0, %v2126_v45, 0  ;;  %v2121_v12 = vld [vmem:[%s2580_s10 + $0x34] sm:$0x1]  ;;  %v2392_v13 = vld [vmem:[%s2580_s10 + $0xb0] ss:$8 sps:$4 sm:$0xff]   ;;  %v1656_v14 = vunpack.c.l.bf16 %v2114_v2 }
  0x48   : > { %2201 = vmatprep.mubr.msk.bf16.mxu1 %vm530_vm1, %v828_v15  ;;  %v831_v55 = vpack.c.bf16 %v819_v53, %v816_v52  ;;  %v1684_v5 = vrot.slane %v1652_v60, 1  ;;  %v1685_v6 = vrot.slane %v1653_v61, 1  ;;  %v1657_v15 = vunpack.c.l.bf16 %v2115_v3  ;;  %v2391_v24 = vld [vmem:[%s2580_s10 + $0x80] ss:$8 sps:$4 sm:$0xff]   ;;  %v2123_v35 = vld [vmem:[%s2580_s10 + $0x3c] sm:$0x1] }
  0x49   : > { %v1687_v7 = vrot.slane %v1654_v62, 1  ;;  %v1658_v16 = vunpack.c.h.bf16 %v2114_v2  ;;  %v1659_v17 = vunpack.c.l.bf16 %v2117_v4  ;;  %v1660_v18 = vunpack.c.l.bf16 %v2118_v9  ;;  %v2122_v32 = vld [vmem:[%s2580_s10 + $0x38] ss:$8 sps:$4 sm:$0xff]   ;;  %v2395_v56 = vld [vmem:[%s2580_s10 + $0x108] ss:$8 sps:$4 sm:$0xff]  }
  0x4a   : > { %v1662_v19 = vunpack.c.h.bf16 %v2118_v9  ;;  %v1686_v20 = vsel %vm795_vm2, %v1684_v5, %v1685_v6  ;;  %v1661_v22 = vunpack.c.l.bf16 %v2119_v11  ;;  %v1663_v23 = vunpack.c.l.bf16 %v2121_v12  ;;  %v2393_v38 = vld [vmem:[%s2580_s10 + $0xc0] ss:$8 sps:$4 sm:$0xff]  }
  0x4b   : > { %v1690_v25 = vrot.slane %v1656_v14, 1  ;;  %v1693_v27 = vrot.slane %v1658_v16, 1  ;;  %v1694_v29 = vrot.slane %v1659_v17, 1  ;;  %v1696_v30 = vrot.slane %v1660_v18, 1  ;;  %v2394_v40 = vld [vmem:[%s2580_s10 + $0xf8] ss:$8 sps:$4 sm:$0xff]  }
  0x4c   : > { %2242 = vmatmul.mubr.msk.bf16.vlgmr.msra.gmra.mrb[0].mxu0 %vm530_vm1, %v2383_v26  ;;  %v1691_v26 = vrot.slane %v1657_v15, 1  ;;  %v1697_v33 = vrot.slane %v1661_v22, 1  ;;  %v1700_v34 = vrot.slane %v1663_v23, 1  ;;  %v1665_v43 = vunpack.c.l.bf16 %v2123_v35 }
  0x4d   : > { %2250 = vmatpush3.bf16.msra.mxu0 %v1545_v36  ;;  %2245 = vmatprep.mubr.msk.bf16.mxu0 %vm530_vm1, %v2384_v31  ;;  %v1699_v31 = vrot.slane %v1662_v19, 1  ;;  %v2125_v36 = vld [vmem:[%s2580_s10 + $0x44] sm:$0x1]  ;;  %v1695_v42 = vsel %vm795_vm2, %v1693_v27, %v1694_v29  ;;  %v1666_v44 = vunpack.c.h.bf16 %v2122_v32 }
  0x4e   : > { %2344 = vmatprep.subr.msk.bf16.mxu0 %vm543_vm0, %v2126_v45  ;;  %v1667_v45 = vunpack.c.l.bf16 %v2125_v36  ;;  %v1698_v46 = vsel %vm795_vm2, %v1696_v30, %v1697_v33 }
  0x4f   : > { %2202 = vmatmul.mubr.msk.bf16.vlgmr.msra.gmra.mrb[0].mxu1 %vm530_vm1, %v829_v41  ;;  %v1664_v41 = vunpack.c.l.bf16 %v2122_v32  ;;  %v1701_v47 = vsel %vm795_vm2, %v1699_v31, %v1700_v34  ;;  %v1705_v52 = vrot.slane %v1666_v44, 1 }
  0x50   : > { %2210 = vmatpush3.bf16.msra.mxu1 %v974_v50  ;;  %2205 = vmatprep.mubr.msk.bf16.mxu1 %vm530_vm1, %v830_v51  ;;  %v1718_v51 = vpack.c.bf16 %v1701_v47, %v1698_v46  ;;  %v1706_v53 = vrot.slane %v1667_v45, 1 }
  0x51   : > { %2340 = vmatprep.subr.msk.bf16.mxu1 %vm543_vm0, %v2558_v37  ;;  %v1655_v37 = vunpack.c.l.bf16 %v2113_v58  ;;  %v1702_v50 = vrot.slane %v1664_v41, 1 }
  0x53   : > { %v1688_v8 = vrot.slane %v1655_v37, 1 }
  0x54   : > { %2246 = vmatmul.mubr.msk.bf16.gmra.mrb[4].mxu0 %vm530_vm1, %v2385_v48  ;;  %v1703_v48 = vrot.slane %v1665_v43, 1 }
  0x55   : > { %2251 = vmatprep.mubr.msk.bf16.mxu0 %vm530_vm1, %v2386_v54  ;;  %v1689_v21 = vsel %vm795_vm2, %v1687_v7, %v1688_v8 }
  0x56   : > { %v1716_v28 = vpack.c.bf16 %v1689_v21, %v1686_v20  ;;  %v1704_v54 = vsel %vm795_vm2, %v1702_v50, %v1703_v48  ;;  %v1868_v48 = vlaneseq }
  0x57   : > { %2206 = vmatmul.mubr.msk.bf16.gmra.mrb[4].mxu1 %vm530_vm1, %v831_v55  ;;  %v1707_v55 = vsel %vm795_vm2, %v1705_v52, %v1706_v53 }
  0x58   : > { %2211 = vmatprep.mubr.msk.bf16.mxu1 %vm530_vm1, %v2388_v59  ;;  %v1719_v57 = vpack.c.bf16 %v1707_v55, %v1704_v54 }
  0x5c   : > { %2252 = vmatmul.mubr.msk.bf16.vlgmr.msra.gmra.mrb[0].mxu0 %vm530_vm1, %v2387_v63 }
  0x5d   : > { %2260 = vmatpush3.bf16.msra.mxu0 %v1735_v0  ;;  %2255 = vmatprep.mubr.msk.bf16.mxu0 %vm530_vm1, %v2390_v1 }
  0x5f   : > { %2212 = vmatmul.mubr.msk.bf16.vlgmr.msra.gmra.mrb[0].mxu1 %vm530_vm1, %v2389_v10 }
  0x60   : > { %2270 = vmatpush3.bf16.msra.mxu1 %v2567_v39  ;;  %2215 = vmatprep.mubr.msk.bf16.mxu1 %vm530_vm1, %v2392_v13  ;;  %v1692_v39 = vsel %vm795_vm2, %v1690_v25, %v1691_v26 }
  0x61   : > { %v1717_v49 = vpack.c.bf16 %v1695_v42, %v1692_v39 }
  0x64   : > { %2256 = vmatmul.mubr.msk.bf16.gmra.mrb[4].mxu0 %vm530_vm1, %v2391_v24 }
  0x65   : > { %2261 = vmatprep.mubr.msk.bf16.mxu0 %vm530_vm1, %v1716_v28 }
  0x67   : > { %2216 = vmatmul.mubr.msk.bf16.gmra.mrb[4].mxu1 %vm530_vm1, %v2393_v38 }
  0x68   : > { %2225 = vmatprep.mubr.msk.bf16.mxu1 %vm530_vm1, %v2394_v40 }
  0x6c   : > { %2262 = vmatmul.mubr.msk.bf16.vlgmr.msra.gmra.mrb[0].mxu0 %vm530_vm1, %v1717_v49 }
  0x6d   : > { %2265 = vmatprep.mubr.msk.bf16.mxu0 %vm530_vm1, %v1718_v51 }
  0x73   : > { %2226 = vmatmul.mubr.msk.bf16.vlgmr.msra.gmra.mrb[4].mxu1 %vm530_vm1, %v2395_v56  ;;  %v1869_v56 = vshrl.u32 %v1868_v48, 7 }
  0x74   : > { %2266 = vmatmul.mubr.msk.bf16.gmra.mrb[4].mxu0 %vm530_vm1, %v1719_v57 }
  0x75   : > { %vm1870_vm4 = vcmp.eq.s32.totalorder %v1869_v56, 0 }
 0x132   : > { %v2213_v58 = vpop.f32.mrb[0].mxu1 }
 0x133   : > { %v1010_v59 = vpop.f32.mrb[1].mxu1 }
 0x134   : > { %v2214_v60 = vpop.f32.mrb[2].mxu1 }
 0x135   : > { %v1013_v61 = vpop.f32.mrb[3].mxu1 }
 0x13f   : > { %v2263_v62 = vpop.f32.mrb[0].mxu0 }
 0x140   : > { %v2271_v37 = vadd.f32 %v2263_v62, %v2213_v58  ;;  %v1771_v63 = vpop.f32.mrb[1].mxu0 }
 0x141   : > { %v2272_v0 = vadd.f32 %v1771_v63, %v1010_v59  ;;  %v2264_v1 = vpop.f32.mrb[2].mxu0 }
 0x142   : > { %v1875_v2 = vpack.c.bf16 %v2271_v37, %v2271_v37  ;;  %v2273_v3 = vadd.f32 %v2264_v1, %v2214_v60  ;;  %v1774_v4 = vpop.f32.mrb[3].mxu0  ;;  %v1849_v13 = vmul.f32 %v2271_v37, %v2271_v37 }
 0x143   : > { %v1873_v5 = vpack.c.bf16 %v2272_v0, %v2272_v0  ;;  %v2274_v6 = vadd.f32 %v1774_v4, %v1013_v61  ;;  %v1847_v8 = vmul.f32 %v2272_v0, %v2272_v0 }
 0x144   : > { %1884 = vst.msk [vmem:[%s2744_s29 + $0x8] sm:$0xf] %vm1881_vm3, %v1875_v2  ;;  %v1876_v7 = vpack.c.bf16 %v2273_v3, %v2273_v3  ;;  %v1850_v21 = vmul.f32 %v2273_v3, %v2273_v3 }
 0x145   : > { %1882 = vst.msk [vmem:[%s2744_s29] sm:$0xf] %vm1881_vm3, %v1873_v5  ;;  %v1834_v9 = vadd.f32 %v2274_v6, %v2272_v0  ;;  %v1848_v10 = vmul.f32 %v2274_v6, %v2274_v6  ;;  %v1874_v11 = vpack.c.bf16 %v2274_v6, %v2274_v6 }
 0x146   : > { %1885 = vst.msk [vmem:[%s2744_s29 + $0xc] sm:$0xf] %vm1881_vm3, %v1876_v7  ;;  %v2227_v12 = vpop.f32.mrb[4].mxu1 }
 0x147   : > { %v1835_v14 = vadd.f32 %v2271_v37, %v1834_v9  ;;  %v1855_v15 = vadd.f32 %v1848_v10, %v1847_v8  ;;  %1883 = vst.msk [vmem:[%s2744_s29 + $0x4] sm:$0xf] %vm1881_vm3, %v1874_v11  ;;  %v2267_v16 = vpop.f32.mrb[4].mxu0  ;;  %v1153_v17 = vpop.f32.mrb[5].mxu1 }
 0x148   : > { %v2275_v18 = vadd.f32 %v2267_v16, %v2227_v12  ;;  %v1787_v19 = vpop.f32.mrb[5].mxu0  ;;  %v2228_v20 = vpop.f32.mrb[6].mxu1 }
 0x149   : > { %v1856_v22 = vadd.f32 %v1855_v15, %v1849_v13  ;;  %v2276_v23 = vadd.f32 %v1787_v19, %v1153_v17  ;;  %v1836_v24 = vadd.f32 %v2273_v3, %v1835_v14  ;;  %v2268_v25 = vpop.f32.mrb[6].mxu0  ;;  %v1156_v26 = vpop.f32.mrb[7].mxu1 }
 0x14a   : > { %v1879_v27 = vpack.c.bf16 %v2275_v18, %v2275_v18  ;;  %v2277_v28 = vadd.f32 %v2268_v25, %v2228_v20  ;;  %v1790_v29 = vpop.f32.mrb[7].mxu0  ;;  %v1853_v41 = vmul.f32 %v2275_v18, %v2275_v18 }
 0x14b   : > { %v1837_v30 = vadd.f32 %v2276_v23, %v1836_v24  ;;  %v1851_v31 = vmul.f32 %v2276_v23, %v2276_v23  ;;  %v1857_v32 = vadd.f32 %v1856_v22, %v1850_v21  ;;  %v1877_v33 = vpack.c.bf16 %v2276_v23, %v2276_v23 }
 0x14c   : > { %1888 = vst.msk [vmem:[%s2744_s29 + $0x18] sm:$0xf] %vm1881_vm3, %v1879_v27  ;;  %v1880_v34 = vpack.c.bf16 %v2277_v28, %v2277_v28  ;;  %v2278_v35 = vadd.f32 %v1790_v29, %v1156_v26  ;;  %v1854_v44 = vmul.f32 %v2277_v28, %v2277_v28 }
 0x14d   : > { %v1858_v36 = vadd.f32 %v1857_v32, %v1851_v31  ;;  %1886 = vst.msk [vmem:[%s2744_s29 + $0x10] sm:$0xf] %vm1881_vm3, %v1877_v33 }
 0x14e   : > { %1889 = vst.msk [vmem:[%s2744_s29 + $0x1c] sm:$0xf] %vm1881_vm3, %v1880_v34  ;;  %v1838_v38 = vadd.f32 %v2278_v35, %v1837_v30  ;;  %v1852_v39 = vmul.f32 %v2278_v35, %v2278_v35  ;;  %v1878_v40 = vpack.c.bf16 %v2278_v35, %v2278_v35 }
 0x150   : > { %v1839_v42 = vadd.f32 %v2275_v18, %v1838_v38  ;;  %v1859_v43 = vadd.f32 %v1858_v36, %v1852_v39  ;;  %1887 = vst.msk [vmem:[%s2744_s29 + $0x14] sm:$0xf] %vm1881_vm3, %v1878_v40 }
 0x152   : > { %v1840_v45 = vadd.f32 %v2277_v28, %v1839_v42  ;;  %v1860_v46 = vadd.f32 %v1859_v43, %v1853_v41 }
 0x154   : > { %v1841_v47 = vrot.slane %v1840_v45, 4  ;;  %v1861_v49 = vadd.f32 %v1860_v46, %v1854_v44 }
 0x156   : > { %v1842_v50 = vadd.f32 %v1841_v47, %v1840_v45  ;;  %v1862_v51 = vrot.slane %v1861_v49, 4 }
 0x158   : > { %v1843_v52 = vrot.slane %v1842_v50, 2  ;;  %v1863_v53 = vadd.f32 %v1862_v51, %v1861_v49 }
 0x15a   : > { %v1844_v54 = vadd.f32 %v1843_v52, %v1842_v50  ;;  %v1864_v55 = vrot.slane %v1863_v53, 2 }
 0x15c   : > { %v1845_v57 = vrot.slane %v1844_v54, 1  ;;  %v1865_v58 = vadd.f32 %v1864_v55, %v1863_v53 }
 0x15e   : > { %v1866_v59 = vrot.slane %v1865_v58, 1  ;;  %v1846_v60 = vadd.f32 %v1845_v57, %v1844_v54 }
 0x160   : > { %v1867_v61 = vadd.f32 %v1866_v59, %v1865_v58 }
 0x162   : > { %v1871_v62 = vsel %vm1870_vm4, %v1846_v60, %v1867_v61 }
 0x163   : > { %1872 = vst [vmem:[%s507_s5] sm:$0x3] %v1871_v62 }
 0x164 PF: > { %p11_p9 = scmp.ge.s32.totalorder %s2457_s16, 4   ;;  %s2780_s12 = smov %s2414_s13 }
 0x165   : > { %s2781_s13 = smov %s2466_s19  ;;  %s2782_s14 = smov %s2457_s16 }
 0x166   :  { %13 = sbr.rel (!%p11_p9) target bundleno = 2 (0x2), region = 129 }

// kernel: residual_block.4
= control target key start
LH: loop header
LB: loop body
LE: loop exit
PB: predicated region body
PF: predicated region fallthrough
CT: control target
= control target key end

     0   :  { %s2488_s18 = smov 0   ;;  %s2777_s0 = inlined_call_operand.vmem [shape: bf16[2,10,10,8], index: 0, kind: input, shape index: {}]   ;;  %s2778_s1 = inlined_call_operand.vmem [shape: bf16[9,8,128], index: 1, kind: input, shape index: {}]   ;;  %s2779_s2 = inlined_call_operand.vmem [shape: bf16[2,8,8,4], index: 2, kind: input, shape index: {}]   ;;  %s2780_s3 = inlined_call_operand.vmem [shape: bf16[4,128], index: 3, kind: input, shape index: {}]   ;;  %s2781_s4 = inlined_call_operand.vmem [shape: f32[2,2,128], index: 4, kind: output, shape index: {0}]   ;;  %s2782_s5 = inlined_call_operand.vmem [shape: f32[2,2,128], index: 5, kind: output, shape index: {1}]  }
   0x1 LB: > { %s2044_s19 = sadd.s32 4294967295, %s2456_s18   ;;  %p2048_p0 = scmp.ge.s32.totalorder %s2456_s18, 1  ;;  %s2456_s18 = sphi %s2488_s18, %s16_s18  }
   0x2   : > { %p200_p1 = scmp.lt.s32.totalorder %s2456_s18, 3 }
   0x4   : > { %p201_p2 = pnand %p2048_p0, %p200_p1 }
   0x5   : > { %v275_v0 = vld [vmem:[%s2778_s1] sm:$0xf] (!%p201_p2)  ;;  %vm289_vm0 = vcmask (!%p201_p2), 1043456   ;;  %p236_p3 = scmp.lt.s32.totalorder (!%p201_p2), %s2044_s19, 1  ;;  %v2105_v2 = vld [vmem:[%s2778_s1 + $0x10] sm:$0xf] (!%p201_p2) }
   0x6   : > { %204 = sbr.rel (%p201_p2) target bundleno = 343 (0x157), region = 36  ;;  %2415 = vmatprep.subr.msk.bf16.mxu1 (!%p201_p2), %vm289_vm0, %v275_v0  ;;  %v291_v1 = vsel (!%p201_p2), %vm289_vm0, %v275_v0, 0  ;;  %v2126_v3 = vld [vmem:[%s2778_s1 + $0x14] sm:$0xf] (!%p201_p2)  ;;  %2419 = vmatprep.subr.msk.bf16.mxu0 (!%p201_p2), %vm289_vm0, %v2105_v2  ;;  %v974_v4 = vsel (!%p201_p2), %vm289_vm0, %v2105_v2, 0  ;;  %vm276_vm1 = vcmask (!%p201_p2), 64512  }
   0x7   : > { %2252 = vmatpush3.bf16.msra.mxu1 (!%p201_p2), %v291_v1  ;;  %v2062_v5 = vld [vmem:[%s2778_s1 + $0x4] sm:$0xf] (!%p201_p2)  ;;  %2292 = vmatpush3.bf16.msra.mxu0 (!%p201_p2), %v974_v4  ;;  %v2518_v6 = vld [vmem:[%s2778_s1 + $0x18] sm:$0xf] (!%p201_p2)  ;;  %v2067_v7 = vld [vmem:[%s2778_s1 + $0x8] sm:$0xf] (!%p201_p2) }
   0x8   : > { %2416 = vmatprep.subr.msk.bf16.mxu1 (!%p201_p2), %vm289_vm0, %v2062_v5  ;;  %2420 = vmatprep.subr.msk.bf16.mxu0 (!%p201_p2), %vm289_vm0, %v2126_v3  ;;  %v2528_v8 = vld [vmem:[%s2778_s1 + $0x1c] sm:$0xf] (!%p201_p2)  ;;  %vm414_vm2 = vcmask (!%p201_p2), 1046528   ;;  %v2532_v9 = vsel (!%p201_p2), %vm289_vm0, %v2126_v3, 0  ;;  %v466_v10 = vsel (!%p201_p2), %vm289_vm0, %v2062_v5, 0  ;;  %v2552_v12 = vsel (!%p201_p2), %vm289_vm0, %v2518_v6, 0 }
   0x9   : > { %v2538_v11 = vld [vmem:[%s2778_s1 + $0xc] sm:$0xf] (!%p201_p2)  ;;  %v2555_v13 = vsel (!%p201_p2), %vm289_vm0, %v2067_v7, 0  ;;  %v2559_v14 = vsel (!%p201_p2), %vm289_vm0, %v2528_v8, 0  ;;  %vm605_vm3 = vcmask (!%p201_p2), 1045504   ;;  %vm1804_vm4 = vcmask (!%p201_p2), 1041408  }
   0xa   : > { %v2563_v15 = vsel (!%p201_p2), %vm289_vm0, %v2538_v11, 0  ;;  %vm1791_vm5 = vcmask (!%p201_p2), 31744  }
   0xd   : > { %s2784_s19 = smov (!%p236_p3, %s2044_s19), 1 }
   0xe   : > { %s2425_s7 = smul.u32 80, %s2784_s19  ;;  %s2200_s10 = sshll.u32 %s2784_s19, 5 }
   0xf   : > { %s2543_s15 = scalar_lea.vmem %s2779_s2, %s2200_s10  ;;  %s2052_s25 = sshll.u32 %s2784_s19, 1 }
  0x10   : > { %s2548_s20 = scalar_lea.vmem %s2777_s0, %s2425_s7  ;;  %s253_s28 = scalar_lea.vmem %s2782_s5, %s2052_s25 }
  0x11   : > { %v2434_v16 = vld [vmem:[%s2548_s20] ss:$8 sps:$4 sm:$0xff]   ;;  %v2435_v17 = vld [vmem:[%s2548_s20 + $0x10] ss:$8 sps:$4 sm:$0xff]   ;;  %v2090_v19 = vld [vmem:[%s2548_s20 + $0xc] sm:$0x1]  ;;  %s249_s6 = scalar_lea.vmem %s2781_s4, %s2052_s25 }
  0x12   : > { %2253 = vmatprep.mubr.msk.bf16.mxu1 %vm276_vm1, %v2434_v16  ;;  %v2089_v18 = vld [vmem:[%s2548_s20 + $0x8] ss:$8 sps:$4 sm:$0xff]   ;;  %v2092_v20 = vld [vmem:[%s2548_s20 + $0x14] sm:$0x1]  ;;  %v892_v22 = vunpack.c.l.bf16 %v2090_v19  ;;  %v2093_v25 = vld [vmem:[%s2548_s20 + $0x18] ss:$8 sps:$4 sm:$0xff]  }
  0x13   : > { %2254 = vmatmul.mubr.msk.bf16.vlgmr.msra.gmra.mrb[0].mxu1 %vm276_vm1, %v2435_v17  ;;  %v891_v21 = vunpack.c.l.bf16 %v2089_v18  ;;  %v893_v23 = vunpack.c.h.bf16 %v2089_v18  ;;  %v894_v24 = vunpack.c.l.bf16 %v2092_v20  ;;  %v2094_v26 = vld [vmem:[%s2548_s20 + $0x1c] sm:$0x1]  ;;  %v2096_v27 = vld [vmem:[%s2548_s20 + $0x24] sm:$0x1]  ;;  %v895_v28 = vunpack.c.l.bf16 %v2093_v25  ;;  %v2436_v32 = vld [vmem:[%s2548_s20 + $0x20] ss:$8 sps:$4 sm:$0xff]  }
  0x14   : > { %v896_v29 = vunpack.c.l.bf16 %v2094_v26  ;;  %v897_v30 = vunpack.c.h.bf16 %v2093_v25  ;;  %v898_v31 = vunpack.c.l.bf16 %v2096_v27  ;;  %2262 = vmatpush3.bf16.msra.mxu1 %v466_v10  ;;  %v924_v34 = vrot.slane %v892_v22, 1  ;;  %2257 = vmatprep.mubr.msk.bf16.mxu1 %vm276_vm1, %v2436_v32  ;;  %v2437_v43 = vld [vmem:[%s2548_s20 + $0x30] ss:$8 sps:$4 sm:$0xff]   ;;  %v2098_v45 = vld [vmem:[%s2548_s20 + $0x2c] sm:$0x1] }
  0x15   : > { %v923_v33 = vrot.slane %v891_v21, 1  ;;  %v926_v35 = vrot.slane %v893_v23, 1  ;;  %v927_v36 = vrot.slane %v894_v24, 1  ;;  %2417 = vmatprep.subr.msk.bf16.mxu1 %vm289_vm0, %v2067_v7  ;;  %v929_v37 = vrot.slane %v895_v28, 1  ;;  %v2097_v44 = vld [vmem:[%s2548_s20 + $0x28] ss:$8 sps:$4 sm:$0xff]  }
  0x16   : > { %v930_v38 = vrot.slane %v896_v29, 1  ;;  %v932_v39 = vrot.slane %v897_v30, 1  ;;  %v933_v40 = vrot.slane %v898_v31, 1  ;;  %v2100_v49 = vld [vmem:[%s2548_s20 + $0x34] sm:$0x1]  ;;  %v899_v50 = vunpack.c.l.bf16 %v2097_v44 }
  0x17   : > { %v925_v41 = vsel %vm414_vm2, %v923_v33, %v924_v34  ;;  %v928_v42 = vsel %vm414_vm2, %v926_v35, %v927_v36  ;;  %v2101_v51 = vld [vmem:[%s2548_s20 + $0x38] ss:$8 sps:$4 sm:$0xff]   ;;  %v2102_v52 = vld [vmem:[%s2548_s20 + $0x3c] sm:$0x1]  ;;  %v900_v54 = vunpack.c.l.bf16 %v2098_v45  ;;  %v901_v55 = vunpack.c.h.bf16 %v2097_v44  ;;  %v2104_v57 = vld [vmem:[%s2548_s20 + $0x44] sm:$0x1] }
  0x18   : > { %v955_v46 = vpack.c.bf16 %v928_v42, %v925_v41  ;;  %v931_v47 = vsel %vm414_vm2, %v929_v37, %v930_v38  ;;  %v934_v48 = vsel %vm414_vm2, %v932_v39, %v933_v40  ;;  %v902_v56 = vunpack.c.l.bf16 %v2100_v49  ;;  %v366_v58 = vld [vmem:[%s2548_s20] ss:$8 sps:$4 sm:$0xff]   ;;  %v367_v63 = vld [vmem:[%s2548_s20 + $0x4] sm:$0x1]  ;;  %v369_v4 = vld [vmem:[%s2548_s20 + $0xc] sm:$0x1] }
  0x19   : > { %v956_v53 = vpack.c.bf16 %v934_v48, %v931_v47  ;;  %v935_v59 = vrot.slane %v899_v50, 1  ;;  %v903_v60 = vunpack.c.l.bf16 %v2101_v51  ;;  %v904_v61 = vunpack.c.l.bf16 %v2102_v52  ;;  %v370_v17 = vld [vmem:[%s2548_s20 + $0x10] ss:$8 sps:$4 sm:$0xff]   ;;  %v371_v22 = vld [vmem:[%s2548_s20 + $0x14] sm:$0x1] }
  0x1a   : > { %2293 = vmatprep.mubr.msk.bf16.mxu0 %vm276_vm1, %v955_v46  ;;  %v905_v62 = vunpack.c.h.bf16 %v2101_v51  ;;  %v936_v0 = vrot.slane %v900_v54, 1  ;;  %v938_v1 = vrot.slane %v901_v55, 1  ;;  %v939_v2 = vrot.slane %v902_v56, 1  ;;  %v373_v26 = vld [vmem:[%s2548_s20 + $0x1c] sm:$0x1] }
  0x1b   : > { %2294 = vmatmul.mubr.msk.bf16.vlgmr.msra.gmra.mrb[0].mxu0 %vm276_vm1, %v956_v53  ;;  %2258 = vmatmul.mubr.msk.bf16.gmra.mrb[4].mxu1 %vm276_vm1, %v2437_v43  ;;  %v906_v3 = vunpack.c.l.bf16 %v2104_v57  ;;  %v941_v5 = vrot.slane %v903_v60, 1  ;;  %v942_v7 = vrot.slane %v904_v61, 1  ;;  %v382_v16 = vunpack.c.l.bf16 %v366_v58  ;;  %v2110_v31 = vld [vmem:[%s2548_s20 + $0x8] ss:$8 sps:$4 sm:$0xff]   ;;  %v2111_v32 = vld [vmem:[%s2548_s20 + $0xc] sm:$0x1] }
  0x1c   : > { %2302 = vmatpush3.bf16.msra.mxu0 %v2532_v9  ;;  %v944_v10 = vrot.slane %v905_v62, 1  ;;  %v937_v18 = vsel %vm414_vm2, %v935_v59, %v936_v0  ;;  %v940_v19 = vsel %vm414_vm2, %v938_v1, %v939_v2  ;;  %v383_v21 = vunpack.c.l.bf16 %v367_v63  ;;  %v2113_v40 = vld [vmem:[%s2548_s20 + $0x14] sm:$0x1]  ;;  %v2114_v45 = vld [vmem:[%s2548_s20 + $0x18] ss:$8 sps:$4 sm:$0xff]  }
  0x1d   : > { %v945_v20 = vrot.slane %v906_v3, 1  ;;  %2421 = vmatprep.subr.msk.bf16.mxu0 %vm289_vm0, %v2518_v6  ;;  %v957_v23 = vpack.c.bf16 %v940_v19, %v937_v18  ;;  %v943_v9 = vsel %vm414_vm2, %v941_v5, %v942_v7  ;;  %v384_v24 = vunpack.c.h.bf16 %v366_v58  ;;  %v2115_v46 = vld [vmem:[%s2548_s20 + $0x1c] sm:$0x1]  ;;  %v2117_v55 = vld [vmem:[%s2548_s20 + $0x24] sm:$0x1] }
  0x1e   : > { %v385_v25 = vunpack.c.l.bf16 %v369_v4  ;;  %v415_v28 = vrot.slane %v382_v16, 1  ;;  %v416_v29 = vrot.slane %v383_v21, 1  ;;  %v386_v30 = vunpack.c.l.bf16 %v370_v17  ;;  %v374_v56 = vld [vmem:[%s2548_s20 + $0x20] ss:$8 sps:$4 sm:$0xff]   ;;  %v375_v61 = vld [vmem:[%s2548_s20 + $0x24] sm:$0x1] }
  0x1f   : > { %v946_v27 = vsel %vm414_vm2, %v944_v10, %v945_v20  ;;  %2297 = vmatprep.mubr.msk.bf16.mxu0 %vm276_vm1, %v957_v23  ;;  %v418_v6 = vrot.slane %v384_v24, 1  ;;  %v387_v35 = vunpack.c.l.bf16 %v371_v22  ;;  %v388_v37 = vunpack.c.h.bf16 %v370_v17  ;;  %v377_v2 = vld [vmem:[%s2548_s20 + $0x2c] sm:$0x1]  ;;  %v378_v10 = vld [vmem:[%s2548_s20 + $0x30] ss:$8 sps:$4 sm:$0xff]  }
  0x20   : > { %v958_v33 = vpack.c.bf16 %v946_v27, %v943_v9  ;;  %v419_v34 = vrot.slane %v385_v25, 1  ;;  %v417_v36 = vsel %vm414_vm2, %v415_v28, %v416_v29  ;;  %v389_v38 = vunpack.c.l.bf16 %v373_v26  ;;  %v379_v16 = vld [vmem:[%s2548_s20 + $0x34] sm:$0x1]  ;;  %v381_v21 = vld [vmem:[%s2548_s20 + $0x3c] sm:$0x1] }
  0x21   : > { %v421_v39 = vrot.slane %v386_v30, 1  ;;  %v422_v42 = vrot.slane %v387_v35, 1  ;;  %v1081_v43 = vunpack.c.l.bf16 %v2110_v31  ;;  %v1082_v44 = vunpack.c.l.bf16 %v2111_v32  ;;  %v2118_v25 = vld [vmem:[%s2548_s20 + $0x28] ss:$8 sps:$4 sm:$0xff]  }
  0x22   : > { %v420_v41 = vsel %vm414_vm2, %v418_v6, %v419_v34  ;;  %v424_v48 = vrot.slane %v388_v37, 1  ;;  %v425_v49 = vrot.slane %v389_v38, 1  ;;  %v1083_v50 = vunpack.c.h.bf16 %v2110_v31  ;;  %v2121_v37 = vld [vmem:[%s2548_s20 + $0x34] sm:$0x1]  ;;  %v2122_v38 = vld [vmem:[%s2548_s20 + $0x38] ss:$8 sps:$4 sm:$0xff]  }
  0x23   : > { %2298 = vmatmul.mubr.msk.bf16.gmra.mrb[4].mxu0 %vm276_vm1, %v958_v33  ;;  %v447_v47 = vpack.c.bf16 %v420_v41, %v417_v36  ;;  %v423_v51 = vsel %vm414_vm2, %v421_v39, %v422_v42  ;;  %v1084_v52 = vunpack.c.l.bf16 %v2113_v40  ;;  %v1113_v53 = vrot.slane %v1081_v43, 2  ;;  %v2123_v42 = vld [vmem:[%s2548_s20 + $0x3c] sm:$0x1]  ;;  %v2125_v43 = vld [vmem:[%s2548_s20 + $0x44] sm:$0x1] }
  0x24   : > { %v1114_v54 = vrot.slane %v1082_v44, 2  ;;  %v426_v57 = vsel %vm414_vm2, %v424_v48, %v425_v49  ;;  %v1116_v58 = vrot.slane %v1083_v50, 2  ;;  %v1085_v59 = vunpack.c.l.bf16 %v2114_v45  ;;  %v557_v48 = vld [vmem:[%s2548_s20] ss:$8 sps:$4 sm:$0xff]   ;;  %v558_v49 = vld [vmem:[%s2548_s20 + $0x4] sm:$0x1] }
  0x25   : > { %2263 = vmatprep.mubr.msk.bf16.mxu1 %vm276_vm1, %v447_v47  ;;  %v1086_v60 = vunpack.c.l.bf16 %v2115_v46  ;;  %v448_v62 = vpack.c.bf16 %v426_v57, %v423_v51  ;;  %v1117_v0 = vrot.slane %v1084_v52, 2  ;;  %v1087_v1 = vunpack.c.h.bf16 %v2114_v45 }
  0x26   : > { %v1115_v63 = vsel %vm605_vm3, %v1113_v53, %v1114_v54  ;;  %v1088_v3 = vunpack.c.l.bf16 %v2117_v55  ;;  %v1119_v4 = vrot.slane %v1085_v59, 2  ;;  %v390_v7 = vunpack.c.l.bf16 %v374_v56 }
  0x27   : > { %v1120_v5 = vrot.slane %v1086_v60, 2  ;;  %2264 = vmatmul.mubr.msk.bf16.vlgmr.msra.gmra.mrb[0].mxu1 %vm276_vm1, %v448_v62  ;;  %v1118_v17 = vsel %vm605_vm3, %v1116_v58, %v1117_v0  ;;  %v1122_v18 = vrot.slane %v1087_v1, 2  ;;  %v391_v19 = vunpack.c.l.bf16 %v375_v61  ;;  %v560_v58 = vld [vmem:[%s2548_s20 + $0xc] sm:$0x1]  ;;  %v561_v62 = vld [vmem:[%s2548_s20 + $0x10] ss:$8 sps:$4 sm:$0xff]  }
  0x28   : > { %v392_v20 = vunpack.c.h.bf16 %v374_v56  ;;  %v1145_v22 = vpack.c.bf16 %v1118_v17, %v1115_v63  ;;  %v1123_v9 = vrot.slane %v1088_v3, 2  ;;  %v393_v24 = vunpack.c.l.bf16 %v377_v2  ;;  %2272 = vmatpush3.bf16.msra.mxu1 %v2555_v13  ;;  %v2119_v13 = vld [vmem:[%s2548_s20 + $0x2c] sm:$0x1] }
  0x29   : > { %v1121_v23 = vsel %vm605_vm3, %v1119_v4, %v1120_v5  ;;  %v427_v26 = vrot.slane %v390_v7, 1  ;;  %v428_v27 = vrot.slane %v391_v19, 1  ;;  %v394_v29 = vunpack.c.l.bf16 %v378_v10  ;;  %2418 = vmatprep.subr.msk.bf16.mxu1 %vm289_vm0, %v2538_v11  ;;  %v562_v7 = vld [vmem:[%s2548_s20 + $0x14] sm:$0x1]  ;;  %v564_v19 = vld [vmem:[%s2548_s20 + $0x1c] sm:$0x1] }
  0x2a   : > { %v430_v28 = vrot.slane %v392_v20, 1  ;;  %2303 = vmatprep.mubr.msk.bf16.mxu0 %vm276_vm1, %v1145_v22  ;;  %v1124_v30 = vsel %vm605_vm3, %v1122_v18, %v1123_v9  ;;  %v431_v31 = vrot.slane %v393_v24, 1  ;;  %v395_v32 = vunpack.c.l.bf16 %v379_v16  ;;  %v2438_v20 = vld [vmem:[%s2548_s20 + $0x10] ss:$8 sps:$4 sm:$0xff]   ;;  %v565_v24 = vld [vmem:[%s2548_s20 + $0x20] ss:$8 sps:$4 sm:$0xff]  }
  0x2b   : > { %v396_v33 = vunpack.c.h.bf16 %v378_v10  ;;  %v1146_v6 = vpack.c.bf16 %v1124_v30, %v1121_v23  ;;  %v429_v34 = vsel %vm414_vm2, %v427_v26, %v428_v27  ;;  %v397_v35 = vunpack.c.l.bf16 %v381_v21  ;;  %v568_v30 = vld [vmem:[%s2548_s20 + $0x2c] sm:$0x1] }
  0x2c   : > { %v433_v36 = vrot.slane %v394_v29, 1  ;;  %v432_v11 = vsel %vm414_vm2, %v430_v28, %v431_v31  ;;  %v434_v39 = vrot.slane %v395_v32, 1  ;;  %v1089_v41 = vunpack.c.l.bf16 %v2118_v25 }
  0x2d   : > { %v436_v40 = vrot.slane %v396_v33, 1  ;;  %2304 = vmatmul.mubr.msk.bf16.vlgmr.msra.gmra.mrb[0].mxu0 %vm276_vm1, %v1146_v6  ;;  %v449_v44 = vpack.c.bf16 %v432_v11, %v429_v34  ;;  %v437_v45 = vrot.slane %v397_v35, 1  ;;  %v1090_v46 = vunpack.c.l.bf16 %v2119_v13  ;;  %v569_v6 = vld [vmem:[%s2548_s20 + $0x30] ss:$8 sps:$4 sm:$0xff]  }
  0x2e   : > { %v1091_v47 = vunpack.c.h.bf16 %v2118_v25  ;;  %2312 = vmatpush3.bf16.msra.mxu0 %v2552_v12  ;;  %v435_v50 = vsel %vm414_vm2, %v433_v36, %v434_v39  ;;  %v1092_v51 = vunpack.c.l.bf16 %v2121_v37  ;;  %v1125_v52 = vrot.slane %v1089_v41, 2  ;;  %v566_v25 = vld [vmem:[%s2548_s20 + $0x24] sm:$0x1] }
  0x2f   : > { %v1093_v53 = vunpack.c.l.bf16 %v2122_v38  ;;  %2267 = vmatprep.mubr.msk.bf16.mxu1 %vm276_vm1, %v449_v44  ;;  %v438_v54 = vsel %vm414_vm2, %v436_v40, %v437_v45  ;;  %v1126_v55 = vrot.slane %v1090_v46, 2  ;;  %v1094_v57 = vunpack.c.l.bf16 %v2123_v42  ;;  %2422 = vmatprep.subr.msk.bf16.mxu0 %vm289_vm0, %v2528_v8  ;;  %v572_v46 = vld [vmem:[%s2548_s20 + $0x3c] sm:$0x1] }
  0x30   : > { %v1128_v56 = vrot.slane %v1091_v47, 2  ;;  %v450_v59 = vpack.c.bf16 %v438_v54, %v435_v50  ;;  %v1129_v12 = vrot.slane %v1092_v51, 2  ;;  %v1095_v60 = vunpack.c.h.bf16 %v2122_v38  ;;  %v570_v38 = vld [vmem:[%s2548_s20 + $0x34] sm:$0x1]  ;;  %v2148_v47 = vld [vmem:[%s2548_s20 + $0x10] ss:$8 sps:$4 sm:$0xff]  }
  0x31   : > { %v1096_v61 = vunpack.c.l.bf16 %v2125_v43  ;;  %v1127_v63 = vsel %vm605_vm3, %v1125_v52, %v1126_v55  ;;  %v1131_v0 = vrot.slane %v1093_v53, 2  ;;  %v1132_v1 = vrot.slane %v1094_v57, 2  ;;  %v2149_v53 = vld [vmem:[%s2548_s20 + $0x14] sm:$0x1]  ;;  %v2680_v54 = vld [vmem:[%s2780_s3] sm:$0x3] }
  0x32   : > { %v573_v2 = vunpack.c.l.bf16 %v557_v48  ;;  %2268 = vmatmul.mubr.msk.bf16.gmra.mrb[4].mxu1 %vm276_vm1, %v450_v59  ;;  %v1130_v3 = vsel %vm605_vm3, %v1128_v56, %v1129_v12  ;;  %v1134_v4 = vrot.slane %v1095_v60, 2  ;;  %v574_v5 = vunpack.c.l.bf16 %v558_v49  ;;  %v2439_v49 = vld [vmem:[%s2548_s20 + $0x20] ss:$8 sps:$4 sm:$0xff]   ;;  %v2440_v59 = vld [vmem:[%s2548_s20 + $0x30] ss:$8 sps:$4 sm:$0xff]  }
  0x33   : > { %v1135_v8 = vrot.slane %v1096_v61, 2  ;;  %v1147_v10 = vpack.c.bf16 %v1130_v3, %v1127_v63  ;;  %v1133_v16 = vsel %vm605_vm3, %v1131_v0, %v1132_v1  ;;  %v575_v17 = vunpack.c.h.bf16 %v557_v48  ;;  %v2151_v12 = vld [vmem:[%s2548_s20 + $0x1c] sm:$0x1]  ;;  %v2152_v60 = vld [vmem:[%s2548_s20 + $0x20] ss:$8 sps:$4 sm:$0xff]  }
  0x34   : > { %v576_v18 = vunpack.c.l.bf16 %v560_v58  ;;  %v606_v22 = vrot.slane %v573_v2, 2  ;;  %v607_v23 = vrot.slane %v574_v5, 2  ;;  %v577_v9 = vunpack.c.l.bf16 %v561_v62  ;;  %v2153_v1 = vld [vmem:[%s2548_s20 + $0x24] sm:$0x1] }
  0x35   : > { %v1136_v21 = vsel %vm605_vm3, %v1134_v4, %v1135_v8  ;;  %2307 = vmatprep.mubr.msk.bf16.mxu0 %vm276_vm1, %v1147_v10  ;;  %v609_v27 = vrot.slane %v575_v17, 2  ;;  %v578_v29 = vunpack.c.l.bf16 %v562_v7  ;;  %v579_v32 = vunpack.c.h.bf16 %v561_v62  ;;  %v2185_v17 = vld [vmem:[%s2778_s1 + $0x20] sm:$0xf] }
  0x36   : > { %v1148_v26 = vpack.c.bf16 %v1136_v21, %v1133_v16  ;;  %v610_v28 = vrot.slane %v576_v18, 2  ;;  %v608_v31 = vsel %vm605_vm3, %v606_v22, %v607_v23  ;;  %v580_v33 = vunpack.c.l.bf16 %v564_v19  ;;  %v2155_v18 = vld [vmem:[%s2548_s20 + $0x2c] sm:$0x1] }
  0x37   : > { %v612_v13 = vrot.slane %v577_v9, 2  ;;  %v613_v35 = vrot.slane %v578_v29, 2  ;;  %v581_v36 = vunpack.c.l.bf16 %v565_v24  ;;  %v582_v37 = vunpack.c.l.bf16 %v566_v25  ;;  %v2156_v25 = vld [vmem:[%s2548_s20 + $0x30] ss:$8 sps:$4 sm:$0xff]  }
  0x38   : > { %2308 = vmatmul.mubr.msk.bf16.gmra.mrb[4].mxu0 %vm276_vm1, %v1148_v26  ;;  %v611_v34 = vsel %vm605_vm3, %v609_v27, %v610_v28  ;;  %v615_v39 = vrot.slane %v579_v32, 2  ;;  %v616_v40 = vrot.slane %v580_v33, 2  ;;  %v583_v41 = vunpack.c.h.bf16 %v565_v24  ;;  %v2157_v26 = vld [vmem:[%s2548_s20 + $0x34] sm:$0x1]  ;;  %v2441_v28 = vld [vmem:[%s2548_s20 + $0x40] ss:$8 sps:$4 sm:$0xff]  }
  0x39   : > { %v638_v11 = vpack.c.bf16 %v611_v34, %v608_v31  ;;  %2313 = vmatprep.mubr.msk.bf16.mxu0 %vm276_vm1, %v2438_v20  ;;  %v614_v42 = vsel %vm605_vm3, %v612_v13, %v613_v35  ;;  %v584_v43 = vunpack.c.l.bf16 %v568_v30  ;;  %v618_v44 = vrot.slane %v581_v36, 2  ;;  %v2442_v29 = vld [vmem:[%s2548_s20 + $0x8] ss:$8 sps:$4 sm:$0xff]   ;;  %v2159_v31 = vld [vmem:[%s2548_s20 + $0x3c] sm:$0x1] }
  0x3a   : > { %v619_v45 = vrot.slane %v582_v37, 2  ;;  %v617_v48 = vsel %vm605_vm3, %v615_v39, %v616_v40  ;;  %v621_v50 = vrot.slane %v583_v41, 2  ;;  %v585_v51 = vunpack.c.l.bf16 %v569_v6  ;;  %v2161_v40 = vld [vmem:[%s2548_s20 + $0x44] sm:$0x1]  ;;  %v2163_v41 = vld [vmem:[%s2548_s20 + $0x4c] sm:$0x1] }
  0x3b   : > { %2273 = vmatprep.mubr.msk.bf16.mxu1 %vm276_vm1, %v638_v11  ;;  %v586_v52 = vunpack.c.l.bf16 %v570_v38  ;;  %v639_v55 = vpack.c.bf16 %v617_v48, %v614_v42  ;;  %v622_v57 = vrot.slane %v584_v43, 2  ;;  %v587_v58 = vunpack.c.h.bf16 %v569_v6  ;;  %v2160_v6 = vld [vmem:[%s2548_s20 + $0x40] ss:$8 sps:$4 sm:$0xff]  }
  0x3c   : > { %v620_v56 = vsel %vm605_vm3, %v618_v44, %v619_v45  ;;  %v588_v61 = vunpack.c.l.bf16 %v572_v46  ;;  %v624_v62 = vrot.slane %v585_v51, 2  ;;  %v1398_v0 = vunpack.c.l.bf16 %v2148_v47  ;;  %v2169_v44 = vld [vmem:[%s2548_s20 + $0x10] ss:$8 sps:$4 sm:$0xff]   ;;  %v2170_v45 = vld [vmem:[%s2548_s20 + $0x14] sm:$0x1] }
  0x3d   : > { %v625_v63 = vrot.slane %v586_v52, 2  ;;  %2274 = vmatmul.mubr.msk.bf16.vlgmr.msra.gmra.mrb[0].mxu1 %vm276_vm1, %v639_v55  ;;  %v623_v2 = vsel %vm605_vm3, %v621_v50, %v622_v57  ;;  %v627_v3 = vrot.slane %v587_v58, 2  ;;  %v1399_v4 = vunpack.c.l.bf16 %v2149_v53  ;;  %v2172_v55 = vld [vmem:[%s2548_s20 + $0x1c] sm:$0x1]  ;;  %v2443_v58 = vld [vmem:[%s2548_s20 + $0x18] ss:$8 sps:$4 sm:$0xff]  }
  0x3e   : > { %v1400_v8 = vunpack.c.h.bf16 %v2148_v47  ;;  %v640_v5 = vpack.c.bf16 %v623_v2, %v620_v56  ;;  %2282 = vmatpush3.bf16.msra.mxu1 %v2563_v15  ;;  %v628_v10 = vrot.slane %v588_v61, 2  ;;  %v1401_v16 = vunpack.c.l.bf16 %v2151_v12 }
  0x3f   : > { %v626_v7 = vsel %vm605_vm3, %v624_v62, %v625_v63  ;;  %v1430_v19 = vrot.slane %v1398_v0, 1  ;;  %v1431_v20 = vrot.slane %v1399_v4, 1  ;;  %v1402_v22 = vunpack.c.l.bf16 %v2152_v60  ;;  %2424 = vmatprep.subr.msk.bf16.mxu1 %vm1804_vm4, %v2680_v54  ;;  %v2444_v63 = vld [vmem:[%s2548_s20 + $0x28] ss:$8 sps:$4 sm:$0xff]  }
  0x40   : > { %2314 = vmatmul.mubr.msk.bf16.vlgmr.msra.gmra.mrb[0].mxu0 %vm276_vm1, %v2439_v49  ;;  %v1433_v21 = vrot.slane %v1400_v8, 1  ;;  %2277 = vmatprep.mubr.msk.bf16.mxu1 %vm276_vm1, %v640_v5  ;;  %v629_v15 = vsel %vm605_vm3, %v627_v3, %v628_v10  ;;  %v1434_v23 = vrot.slane %v1401_v16, 1  ;;  %v1403_v9 = vunpack.c.l.bf16 %v2153_v1  ;;  %v2173_v16 = vld [vmem:[%s2548_s20 + $0x20] ss:$8 sps:$4 sm:$0xff]  }
  0x41   : > { %2322 = vmatpush3.bf16.msra.mxu0 %v2559_v14  ;;  %v1404_v24 = vunpack.c.h.bf16 %v2152_v60  ;;  %v641_v27 = vpack.c.bf16 %v629_v15, %v626_v7  ;;  %2317 = vmatprep.mubr.msk.bf16.mxu0 %vm276_vm1, %v2440_v59  ;;  %v1432_v30 = vsel %vm414_vm2, %v1430_v19, %v1431_v20  ;;  %v1405_v14 = vunpack.c.l.bf16 %v2155_v18  ;;  %v2174_v18 = vld [vmem:[%s2548_s20 + $0x24] sm:$0x1]  ;;  %v2176_v20 = vld [vmem:[%s2548_s20 + $0x2c] sm:$0x1] }
  0x42   : > { %2423 = vmatprep.subr.msk.bf16.mxu0 %vm289_vm0, %v2185_v17  ;;  %v1435_v32 = vsel %vm414_vm2, %v1433_v21, %v1434_v23  ;;  %v1436_v33 = vrot.slane %v1402_v22, 1  ;;  %v1437_v13 = vrot.slane %v1403_v9, 1  ;;  %v1406_v36 = vunpack.c.l.bf16 %v2156_v25  ;;  %v2177_v21 = vld [vmem:[%s2548_s20 + $0x30] ss:$8 sps:$4 sm:$0xff]   ;;  %v2180_v22 = vld [vmem:[%s2548_s20 + $0x3c] sm:$0x1] }
  0x43   : > { %v1439_v34 = vrot.slane %v1404_v24, 1  ;;  %v1440_v35 = vrot.slane %v1405_v14, 1  ;;  %v1407_v37 = vunpack.c.l.bf16 %v2157_v26  ;;  %v1462_v38 = vpack.c.bf16 %v1435_v32, %v1432_v30 }
  0x44   : > { %v1408_v11 = vunpack.c.h.bf16 %v2156_v25  ;;  %v1409_v39 = vunpack.c.l.bf16 %v2159_v31  ;;  %v1442_v42 = vrot.slane %v1406_v36, 1  ;;  %v1438_v46 = vsel %vm414_vm2, %v1436_v33, %v1437_v13  ;;  %v2446_v33 = vld [vmem:[%s2543_s15] sm:$0xff]  }
  0x45   : > { %2278 = vmatmul.mubr.msk.bf16.gmra.mrb[4].mxu1 %vm276_vm1, %v641_v27  ;;  %v1443_v43 = vrot.slane %v1407_v37, 1  ;;  %v1410_v49 = vunpack.c.l.bf16 %v2160_v6  ;;  %v1441_v50 = vsel %vm414_vm2, %v1439_v34, %v1440_v35  ;;  %v1411_v51 = vunpack.c.l.bf16 %v2161_v40 }
  0x46   : > { %2283 = vmatprep.mubr.msk.bf16.mxu1 %vm276_vm1, %v2442_v29  ;;  %v1445_v47 = vrot.slane %v1408_v11, 1  ;;  %v1446_v48 = vrot.slane %v1409_v39, 1  ;;  %v1412_v52 = vunpack.c.h.bf16 %v2160_v6  ;;  %v1413_v53 = vunpack.c.l.bf16 %v2163_v41  ;;  %v2445_v29 = vld [vmem:[%s2548_s20 + $0x38] ss:$8 sps:$4 sm:$0xff]   ;;  %v2182_v11 = vld [vmem:[%s2548_s20 + $0x44] sm:$0x1] }
  0x47   : > { %v1588_v56 = vunpack.c.l.bf16 %v2169_v44  ;;  %v1589_v57 = vunpack.c.l.bf16 %v2170_v45  ;;  %v1444_v59 = vsel %vm414_vm2, %v1442_v42, %v1443_v43  ;;  %v1590_v60 = vunpack.c.h.bf16 %v2169_v44  ;;  %v2184_v43 = vld [vmem:[%s2548_s20 + $0x4c] sm:$0x1] }
  0x48   : > { %2318 = vmatmul.mubr.msk.bf16.gmra.mrb[4].mxu0 %vm276_vm1, %v2441_v28  ;;  %v1447_v12 = vsel %vm414_vm2, %v1445_v47, %v1446_v48  ;;  %v1463_v61 = vpack.c.bf16 %v1441_v50, %v1438_v46  ;;  %v1671_v62 = vsel %vm289_vm0, %v2185_v17, 0  ;;  %v1806_v0 = vsel %vm1804_vm4, %v2680_v54, 0  ;;  %v2178_v54 = vld [vmem:[%s2548_s20 + $0x34] sm:$0x1]  ;;  %v2447_v50 = vld [vmem:[%s2543_s15 + $0x8] sm:$0xff]  }
  0x49   : > { %2323 = vmatprep.mubr.msk.bf16.mxu0 %vm276_vm1, %v1462_v38  ;;  %v1591_v1 = vunpack.c.l.bf16 %v2172_v55  ;;  %v1448_v2 = vrot.slane %v1410_v49, 1  ;;  %v1449_v3 = vrot.slane %v1411_v51, 1  ;;  %v1451_v4 = vrot.slane %v1412_v52, 1  ;;  %v2181_v38 = vld [vmem:[%s2548_s20 + $0x40] ss:$8 sps:$4 sm:$0xff]  }
  0x4a   : > { %v1452_v8 = vrot.slane %v1413_v53, 1  ;;  %v1464_v5 = vpack.c.bf16 %v1447_v12, %v1444_v59  ;;  %v1620_v7 = vrot.slane %v1588_v56, 2  ;;  %v1621_v10 = vrot.slane %v1589_v57, 2  ;;  %v2448_v53 = vld [vmem:[%s2543_s15 + $0x10] sm:$0xff]  }
  0x4b   : > { %v1623_v17 = vrot.slane %v1590_v60, 2  ;;  %v1624_v19 = vrot.slane %v1591_v1, 2  ;;  %v1450_v15 = vsel %vm414_vm2, %v1448_v2, %v1449_v3  ;;  %v1592_v9 = vunpack.c.l.bf16 %v2173_v16 }
  0x4c   : > { %v1453_v23 = vsel %vm414_vm2, %v1451_v4, %v1452_v8  ;;  %v1593_v24 = vunpack.c.l.bf16 %v2174_v18  ;;  %v1622_v25 = vsel %vm605_vm3, %v1620_v7, %v1621_v10  ;;  %v1594_v26 = vunpack.c.h.bf16 %v2173_v16 }
  0x4d   : > { %2284 = vmatmul.mubr.msk.bf16.vlgmr.msra.gmra.mrb[0].mxu1 %vm276_vm1, %v2443_v58  ;;  %v1595_v27 = vunpack.c.l.bf16 %v2176_v20  ;;  %v1596_v28 = vunpack.c.l.bf16 %v2177_v21  ;;  %v1625_v30 = vsel %vm605_vm3, %v1623_v17, %v1624_v19  ;;  %v1597_v14 = vunpack.c.l.bf16 %v2178_v54 }
  0x4e   : > { %2287 = vmatprep.mubr.msk.bf16.mxu1 %vm276_vm1, %v2444_v63  ;;  %2342 = vmatpush3.bf16.msra.mxu1 %v1806_v0  ;;  %v1598_v31 = vunpack.c.h.bf16 %v2177_v21  ;;  %v1599_v32 = vunpack.c.l.bf16 %v2180_v22  ;;  %v1465_v13 = vpack.c.bf16 %v1453_v23, %v1450_v15  ;;  %v1626_v6 = vrot.slane %v1592_v9, 2 }
  0x4f   : > { %v1627_v34 = vrot.slane %v1593_v24, 2  ;;  %v1652_v35 = vpack.c.bf16 %v1625_v30, %v1622_v25  ;;  %v1629_v36 = vrot.slane %v1594_v26, 2  ;;  %v1630_v37 = vrot.slane %v1595_v27, 2 }
  0x50   : > { %2324 = vmatmul.mubr.msk.bf16.vlgmr.msra.gmra.mrb[0].mxu0 %vm276_vm1, %v1463_v61  ;;  %v1632_v39 = vrot.slane %v1596_v28, 2  ;;  %v1633_v40 = vrot.slane %v1597_v14, 2  ;;  %v1635_v41 = vrot.slane %v1598_v31, 2  ;;  %v1636_v42 = vrot.slane %v1599_v32, 2 }
  0x51   : > { %2332 = vmatpush3.bf16.msra.mxu0 %v1671_v62  ;;  %2327 = vmatprep.mubr.msk.bf16.mxu0 %vm276_vm1, %v1464_v5  ;;  %v1628_v44 = vsel %vm605_vm3, %v1626_v6, %v1627_v34  ;;  %v1600_v45 = vunpack.c.l.bf16 %v2181_v38  ;;  %v1631_v46 = vsel %vm605_vm3, %v1629_v36, %v1630_v37  ;;  %v1601_v47 = vunpack.c.l.bf16 %v2182_v11  ;;  %v2449_v62 = vld [vmem:[%s2543_s15 + $0x18] sm:$0xff]  }
  0x52   : > { %v1602_v48 = vunpack.c.h.bf16 %v2181_v38  ;;  %v1603_v49 = vunpack.c.l.bf16 %v2184_v43  ;;  %v1634_v51 = vsel %vm605_vm3, %v1632_v39, %v1633_v40  ;;  %v1637_v52 = vsel %vm605_vm3, %v1635_v41, %v1636_v42 }
  0x53   : > { %v1653_v55 = vpack.c.bf16 %v1631_v46, %v1628_v44  ;;  %v1638_v56 = vrot.slane %v1600_v45, 2  ;;  %v1654_v57 = vpack.c.bf16 %v1637_v52, %v1634_v51  ;;  %v1639_v58 = vrot.slane %v1601_v47, 2 }
  0x54   : > { %v1641_v59 = vrot.slane %v1602_v48, 2  ;;  %v1642_v12 = vrot.slane %v1603_v49, 2 }
  0x55   : > { %2288 = vmatmul.mubr.msk.bf16.gmra.mrb[4].mxu1 %vm276_vm1, %v2445_v29  ;;  %v1640_v60 = vsel %vm605_vm3, %v1638_v56, %v1639_v58 }
  0x56   : > { %2343 = vmatprep.mubr.msk.bf16.mxu1 %vm1791_vm5, %v2446_v33  ;;  %v1643_v61 = vsel %vm605_vm3, %v1641_v59, %v1642_v12 }
  0x57   : > { %v1655_v63 = vpack.c.bf16 %v1643_v61, %v1640_v60 }
  0x58   : > { %2328 = vmatmul.mubr.msk.bf16.gmra.mrb[4].mxu0 %vm276_vm1, %v1465_v13 }
  0x59   : > { %2333 = vmatprep.mubr.msk.bf16.mxu0 %vm276_vm1, %v1652_v35 }
  0x5d   : > { %2344 = vmatmul.mubr.msk.bf16.vlgmr.msra.gmra.mrb[8].mxu1 %vm1791_vm5, %v2447_v50 }
  0x5e   : > { %2347 = vmatprep.mubr.msk.bf16.mxu1 %vm1791_vm5, %v2448_v53 }
  0x60   : > { %2334 = vmatmul.mubr.msk.bf16.vlgmr.msra.gmra.mrb[0].mxu0 %vm276_vm1, %v1653_v55 }
  0x61   : > { %2337 = vmatprep.mubr.msk.bf16.mxu0 %vm276_vm1, %v1654_v57 }
  0x65   : > { %2348 = vmatmul.mubr.msk.bf16.gmra.mrb[12].mxu1 %vm1791_vm5, %v2449_v62 }
  0x68   : > { %2338 = vmatmul.mubr.msk.bf16.gmra.mrb[4].mxu0 %vm276_vm1, %v1655_v63 }
 0x120   : > { %v2285_v0 = vpop.f32.mrb[0].mxu1 }
 0x121   : > { %v820_v1 = vpop.f32.mrb[1].mxu1 }
 0x122   : > { %v2286_v2 = vpop.f32.mrb[2].mxu1 }
 0x123   : > { %v823_v3 = vpop.f32.mrb[3].mxu1 }
 0x128   : > { %v2289_v4 = vpop.f32.mrb[4].mxu1 }
 0x129   : > { %v836_v8 = vpop.f32.mrb[5].mxu1 }
 0x12a   : > { %v2290_v5 = vpop.f32.mrb[6].mxu1 }
 0x12b   : > { %v839_v7 = vpop.f32.mrb[7].mxu1 }
 0x130   : > { %v2345_v10 = vpop.f32.mrb[8].mxu1 }
 0x131   : > { %v1842_v16 = vpop.f32.mrb[9].mxu1  ;;  %v1927_v22 = vmul.f32 %v2345_v10, %v2345_v10 }
 0x132   : > { %v1925_v18 = vmul.f32 %v1842_v16, %v1842_v16  ;;  %v2346_v17 = vpop.f32.mrb[10].mxu1 }
 0x133   : > { %v2335_v19 = vpop.f32.mrb[0].mxu0  ;;  %v1845_v20 = vpop.f32.mrb[11].mxu1  ;;  %v1928_v30 = vmul.f32 %v2346_v17, %v2346_v17 }
 0x134   : > { %v2351_v21 = vadd.f32 %v2335_v19, %v2285_v0  ;;  %v1707_v54 = vpop.f32.mrb[1].mxu0  ;;  %v1912_v15 = vadd.f32 %v1845_v20, %v1842_v16  ;;  %v1926_v23 = vmul.f32 %v1845_v20, %v1845_v20 }
 0x135   : > { %v2352_v9 = vadd.f32 %v1707_v54, %v820_v1  ;;  %v2336_v24 = vpop.f32.mrb[2].mxu0 }
 0x136   : > { %v2353_v25 = vadd.f32 %v2336_v24, %v2286_v2  ;;  %v1710_v26 = vpop.f32.mrb[3].mxu0  ;;  %v1913_v27 = vadd.f32 %v2345_v10, %v1912_v15  ;;  %v1933_v28 = vadd.f32 %v1926_v23, %v1925_v18  ;;  %v1888_v34 = vmul.f32 %v2351_v21, %v2351_v21 }
 0x137   : > { %v2354_v29 = vadd.f32 %v1710_v26, %v823_v3  ;;  %v1886_v14 = vmul.f32 %v2352_v9, %v2352_v9 }
 0x138   : > { %v1934_v31 = vadd.f32 %v1933_v28, %v1927_v22  ;;  %v2349_v13 = vpop.f32.mrb[12].mxu1  ;;  %v1914_v6 = vadd.f32 %v2346_v17, %v1913_v27  ;;  %v1889_v41 = vmul.f32 %v2353_v25, %v2353_v25 }
 0x139   : > { %v1873_v32 = vadd.f32 %v2354_v29, %v2352_v9  ;;  %v1887_v33 = vmul.f32 %v2354_v29, %v2354_v29  ;;  %v1858_v35 = vpop.f32.mrb[13].mxu1  ;;  %v1931_v51 = vmul.f32 %v2349_v13, %v2349_v13 }
 0x13a   : > { %v1915_v38 = vadd.f32 %v1914_v6, %v1858_v35  ;;  %v1929_v11 = vmul.f32 %v1858_v35, %v1858_v35  ;;  %v2350_v39 = vpop.f32.mrb[14].mxu1  ;;  %v1935_v42 = vadd.f32 %v1934_v31, %v1928_v30 }
 0x13b   : > { %v1874_v36 = vadd.f32 %v2351_v21, %v1873_v32  ;;  %v1894_v37 = vadd.f32 %v1887_v33, %v1886_v14  ;;  %v2339_v40 = vpop.f32.mrb[4].mxu0  ;;  %v1861_v43 = vpop.f32.mrb[15].mxu1  ;;  %v1932_v60 = vmul.f32 %v2350_v39, %v2350_v39 }
 0x13c   : > { %v2355_v44 = vadd.f32 %v2339_v40, %v2289_v4  ;;  %v1723_v45 = vpop.f32.mrb[5].mxu0  ;;  %v1916_v47 = vadd.f32 %v1915_v38, %v1861_v43  ;;  %v1930_v48 = vmul.f32 %v1861_v43, %v1861_v43  ;;  %v1936_v52 = vadd.f32 %v1935_v42, %v1929_v11 }
 0x13d   : > { %v1895_v46 = vadd.f32 %v1894_v37, %v1888_v34  ;;  %v2356_v49 = vadd.f32 %v1723_v45, %v836_v8  ;;  %v2340_v50 = vpop.f32.mrb[6].mxu0  ;;  %v1875_v53 = vadd.f32 %v2353_v25, %v1874_v36 }
 0x13e   : > { %v2357_v55 = vadd.f32 %v2340_v50, %v2290_v5  ;;  %v1726_v56 = vpop.f32.mrb[7].mxu0  ;;  %v1917_v57 = vadd.f32 %v2349_v13, %v1916_v47  ;;  %v1937_v61 = vadd.f32 %v1936_v52, %v1930_v48  ;;  %v1892_v8 = vmul.f32 %v2355_v44, %v2355_v44 }
 0x13f   : > { %v1890_v58 = vmul.f32 %v2356_v49, %v2356_v49  ;;  %v1896_v59 = vadd.f32 %v1895_v46, %v1889_v41  ;;  %v2358_v12 = vadd.f32 %v1726_v56, %v839_v7  ;;  %v1876_v62 = vadd.f32 %v2356_v49, %v1875_v53 }
 0x140   : > { %v1918_v63 = vadd.f32 %v2350_v39, %v1917_v57  ;;  %v1938_v2 = vadd.f32 %v1937_v61, %v1931_v51  ;;  %v1893_v5 = vmul.f32 %v2357_v55, %v2357_v55  ;;  %v1907_v7 = vlaneseq }
 0x141   : > { %v1897_v0 = vadd.f32 %v1896_v59, %v1890_v58  ;;  %v1891_v1 = vmul.f32 %v2358_v12, %v2358_v12  ;;  %v1877_v3 = vadd.f32 %v2358_v12, %v1876_v62 }
 0x142   : > { %v1919_v4 = vrot.slane %v1918_v63, 4  ;;  %v1939_v16 = vadd.f32 %v1938_v2, %v1932_v60  ;;  %v1908_v27 = vshrl.u32 %v1907_v7, 7 }
 0x143   : > { %v1898_v10 = vadd.f32 %v1897_v0, %v1891_v1  ;;  %v1878_v18 = vadd.f32 %v2355_v44, %v1877_v3 }
 0x144   : > { %v1920_v17 = vadd.f32 %v1919_v4, %v1918_v63  ;;  %v1940_v20 = vrot.slane %v1939_v16, 4  ;;  %vm1909_vm6 = vcmp.eq.s32.totalorder %v1908_v27, 0 }
 0x145   : > { %v1899_v19 = vadd.f32 %v1898_v10, %v1892_v8  ;;  %v1879_v21 = vadd.f32 %v2357_v55, %v1878_v18 }
 0x146   : > { %v1921_v54 = vrot.slane %v1920_v17, 2  ;;  %v1941_v15 = vadd.f32 %v1940_v20, %v1939_v16 }
 0x147   : > { %v1900_v22 = vadd.f32 %v1899_v19, %v1893_v5  ;;  %v1880_v23 = vrot.slane %v1879_v21, 4 }
 0x148   : > { %v1922_v9 = vadd.f32 %v1921_v54, %v1920_v17  ;;  %v1942_v25 = vrot.slane %v1941_v15, 2 }
 0x149   : > { %v1901_v24 = vrot.slane %v1900_v22, 4  ;;  %v1881_v26 = vadd.f32 %v1880_v23, %v1879_v21 }
 0x14a   : > { %v1923_v29 = vrot.slane %v1922_v9, 1  ;;  %v1943_v30 = vadd.f32 %v1942_v25, %v1941_v15 }
 0x14b   : > { %v1902_v28 = vadd.f32 %v1901_v24, %v1900_v22  ;;  %v1882_v14 = vrot.slane %v1881_v26, 2 }
 0x14c   : > { %v1944_v32 = vrot.slane %v1943_v30, 1  ;;  %v1924_v6 = vadd.f32 %v1923_v29, %v1922_v9 }
 0x14d   : > { %v1903_v31 = vrot.slane %v1902_v28, 2  ;;  %v1883_v33 = vadd.f32 %v1882_v14, %v1881_v26 }
 0x14e   : > { %v1945_v34 = vadd.f32 %v1944_v32, %v1943_v30 }
 0x14f   : > { %v1904_v13 = vadd.f32 %v1903_v31, %v1902_v28  ;;  %v1884_v35 = vrot.slane %v1883_v33, 1 }
 0x150   : > { %v1946_v37 = vsel %vm1909_vm6, %v1924_v6, %v1945_v34 }
 0x151   : > { %v1905_v36 = vrot.slane %v1904_v13, 1  ;;  %1947 = vst [vmem:[%s253_s28] sm:$0x3] %v1946_v37  ;;  %v1885_v38 = vadd.f32 %v1884_v35, %v1883_v33 }
 0x153   : > { %v1906_v11 = vadd.f32 %v1905_v36, %v1904_v13 }
 0x155   : > { %v1910_v39 = vsel %vm1909_vm6, %v1885_v38, %v1906_v11 }
 0x156   : > { %1911 = vst [vmem:[%s249_s6] sm:$0x3] %v1910_v39 }
 0x157 PF: > { %s16_s18 = sadd.s32 1, %s2456_s18  }
 0x158   : > { %p13_p4 = scmp.ge.s32.totalorder %s16_s18, 4  }
 0x15a   :  { %15 = sbr.rel (!%p13_p4) target bundleno = 1 (0x1), region = 91 }

// kernel: residual_block.5
= control target key start
LH: loop header
LB: loop body
LE: loop exit
PB: predicated region body
PF: predicated region fallthrough
CT: control target
= control target key end

     0   :  { %13 = vsyncpa [#allocation4], 0  ;;  %s3088_s0 = inlined_call_operand.vmem [shape: bf16[2,10,10,8], index: 0, kind: input, shape index: {}]   ;;  %s3089_s1 = inlined_call_operand.vmem [shape: bf16[9,8,128], index: 1, kind: input, shape index: {}]   ;;  %s3090_s2 = inlined_call_operand.vmem [shape: bf16[2,8,8,4], index: 2, kind: input, shape index: {}]   ;;  %s3091_s3 = inlined_call_operand.vmem [shape: bf16[4,128], index: 3, kind: input, shape index: {}]   ;;  %s3092_s4 = inlined_call_operand.vmem [shape: f32[1,8], index: 4, kind: input, shape index: {}]   ;;  %s3093_s5 = inlined_call_operand.vmem [shape: f32[1,8], index: 5, kind: input, shape index: {}]   ;;  %s3094_s6 = inlined_call_operand.vmem [shape: f32[1,8], index: 6, kind: input, shape index: {}]   ;;  %s3095_s7 = inlined_call_operand.vmem [shape: f32[1,8], index: 7, kind: input, shape index: {}]   ;;  %s3096_s8 = inlined_call_operand.hbm [shape: f32[2,8,8,8], index: 8, kind: output, shape index: {}]  }
   0x1   :  { %15 = vsyncpa [#allocation4 + $0x1], 0  ;;  %s2672_s27 = smov 0   ;;  %s2674_s28 = smov 0  }
   0x2   :  { %s2676_s29 = smov 0   ;;  %s2678_s30 = smov 0  }
   0x3 LB: > { %s2693_s9 = sadd.s32 4294967295, %s2622_s30   ;;  %s2115_s10 = sadd.s32 4294967294, %s2622_s30   ;;  %s2622_s30 = sphi %s2678_s30, %s3102_s30   ;;  %s2618_s29 = sphi %s2676_s29, %s3101_s29   ;;  %s2614_s28 = sphi %s2674_s28, %s3100_s28   ;;  %s2610_s27 = sphi %s2672_s27, %s3099_s27  }
   0x4   : > { %s2697_s11 = sadd.s32 1, %s2622_s30   ;;  %s206_s12 = sadd.s32 1, %s2618_s29 }
   0x5   : > { %s203_s13 = ssub.s32 %s2622_s30, %s2697_s11  ;;  %p216_p0 = scmp.ne.s32.totalorder %s2618_s29, %s2614_s28 }
   0x6   : > { %p204_p1 = scmp.eq.s32.totalorder %s203_s13, 0  ;;  %p217_p2 = scmp.eq.s32.totalorder %s2693_s9, 1 }
   0x7   : > { %p222_p3 = scmp.ne.s32.totalorder %s2614_s28, %s2610_s27  ;;  %p223_p4 = scmp.eq.s32.totalorder %s2115_s10, 1 }
   0x8   : > { %s2708_s14 = scalar_select %p204_p1, %s2618_s29, %s206_s12  }
   0x9   : > { %p2710_p5 = por %p217_p2, %p216_p0  ;;  %p2714_p6 = por %p223_p4, %p222_p3 }
   0xa   : > { %p2118_p7 = scmp.ge.s32.totalorder %s2622_s30, 1  ;;  %p275_p8 = scmp.lt.s32.totalorder %s2622_s30, 3 }
   0xc   : > { %p276_p9 = pnand %p2118_p7, %p275_p8 }
   0xd   : > { %v345_v0 = vld [vmem:[%s3089_s1] sm:$0xf] (!%p276_p9)  ;;  %vm359_vm0 = vcmask (!%p276_p9), 1043456   ;;  %p314_p10 = scmp.lt.s32.totalorder (!%p276_p9), %s2693_s9, 1  ;;  %v2174_v2 = vld [vmem:[%s3089_s1 + $0x10] sm:$0xf] (!%p276_p9) }
   0xe   : > { %279 = sbr.rel (%p276_p9) target bundleno = 355 (0x163), region = 52  ;;  %2492 = vmatprep.subr.msk.bf16.mxu1 (!%p276_p9), %vm359_vm0, %v345_v0  ;;  %v361_v1 = vsel (!%p276_p9), %vm359_vm0, %v345_v0, 0  ;;  %v2195_v3 = vld [vmem:[%s3089_s1 + $0x14] sm:$0xf] (!%p276_p9)  ;;  %2496 = vmatprep.subr.msk.bf16.mxu0 (!%p276_p9), %vm359_vm0, %v2174_v2  ;;  %v1044_v4 = vsel (!%p276_p9), %vm359_vm0, %v2174_v2, 0  ;;  %vm346_vm1 = vcmask (!%p276_p9), 64512  }
   0xf   : > { %2329 = vmatpush3.bf16.msra.mxu1 (!%p276_p9), %v361_v1  ;;  %v2131_v5 = vld [vmem:[%s3089_s1 + $0x4] sm:$0xf] (!%p276_p9)  ;;  %2369 = vmatpush3.bf16.msra.mxu0 (!%p276_p9), %v1044_v4  ;;  %v2742_v6 = vld [vmem:[%s3089_s1 + $0x18] sm:$0xf] (!%p276_p9)  ;;  %v2136_v7 = vld [vmem:[%s3089_s1 + $0x8] sm:$0xf] (!%p276_p9) }
  0x10   : > { %2493 = vmatprep.subr.msk.bf16.mxu1 (!%p276_p9), %vm359_vm0, %v2131_v5  ;;  %2497 = vmatprep.subr.msk.bf16.mxu0 (!%p276_p9), %vm359_vm0, %v2195_v3  ;;  %v2751_v8 = vld [vmem:[%s3089_s1 + $0x1c] sm:$0xf] (!%p276_p9)  ;;  %vm484_vm2 = vcmask (!%p276_p9), 1046528   ;;  %v2754_v9 = vsel (!%p276_p9), %vm359_vm0, %v2195_v3, 0  ;;  %v536_v10 = vsel (!%p276_p9), %vm359_vm0, %v2131_v5, 0  ;;  %v2774_v12 = vsel (!%p276_p9), %vm359_vm0, %v2742_v6, 0 }
  0x11   : > { %v2760_v11 = vld [vmem:[%s3089_s1 + $0xc] sm:$0xf] (!%p276_p9)  ;;  %v2777_v13 = vsel (!%p276_p9), %vm359_vm0, %v2136_v7, 0  ;;  %v2781_v14 = vsel (!%p276_p9), %vm359_vm0, %v2751_v8, 0  ;;  %vm675_vm3 = vcmask (!%p276_p9), 1045504   ;;  %vm1874_vm4 = vcmask (!%p276_p9), 1041408  }
  0x12   : > { %v2785_v15 = vsel (!%p276_p9), %vm359_vm0, %v2760_v11, 0  ;;  %vm1861_vm5 = vcmask (!%p276_p9), 31744   ;;  %s311_s10 = sand.u32 (!%p276_p9), 1, %s2614_s28   ;;  %s2277_s18 = sshll.u32 (!%p276_p9), %s2693_s9, 10 }
  0x13   : > { %s2119_s13 = sshll.u32 (!%p276_p9), %s311_s10, 6  ;;  %s3035_s22 = scalar_lea.hbm (!%p276_p9), %s3096_s8, %s2277_s18 }
  0x14   : > { %s2624_s25 = smov (!%p276_p9), [#allocation3]  }
  0x15   : > { %s315_s23 = scalar_select %p314_p10, %s2693_s9, 1 }
  0x16   : > { %s3047_s9 = scalar_lea.sflag [#allocation4], %s311_s10 }
  0x17   : > { %s2502_s17 = smul.u32 80, %s315_s23  ;;  %s2276_s20 = sshll.u32 %s315_s23, 5 }
  0x18   : > { %s2765_s26 = scalar_lea.vmem %s3090_s2, %s2276_s20 }
  0x19   : > { %s2770_s23 = scalar_lea.vmem %s3088_s0, %s2502_s17  ;;  %s3016_s17 = scalar_lea.vmem [#allocation3], %s2119_s13 }
  0x1a   : > { %v2544_v16 = vld [vmem:[%s2770_s23] ss:$8 sps:$4 sm:$0xff]   ;;  %v2545_v17 = vld [vmem:[%s2770_s23 + $0x10] ss:$8 sps:$4 sm:$0xff]   ;;  %v2159_v19 = vld [vmem:[%s2770_s23 + $0xc] sm:$0x1] }
  0x1b   : > { %2330 = vmatprep.mubr.msk.bf16.mxu1 %vm346_vm1, %v2544_v16  ;;  %v2158_v18 = vld [vmem:[%s2770_s23 + $0x8] ss:$8 sps:$4 sm:$0xff]   ;;  %v2161_v20 = vld [vmem:[%s2770_s23 + $0x14] sm:$0x1]  ;;  %v962_v22 = vunpack.c.l.bf16 %v2159_v19  ;;  %v2162_v25 = vld [vmem:[%s2770_s23 + $0x18] ss:$8 sps:$4 sm:$0xff]  }
  0x1c   : > { %2331 = vmatmul.mubr.msk.bf16.vlgmr.msra.gmra.mrb[0].mxu1 %vm346_vm1, %v2545_v17  ;;  %v961_v21 = vunpack.c.l.bf16 %v2158_v18  ;;  %v963_v23 = vunpack.c.h.bf16 %v2158_v18  ;;  %v964_v24 = vunpack.c.l.bf16 %v2161_v20  ;;  %v2163_v26 = vld [vmem:[%s2770_s23 + $0x1c] sm:$0x1]  ;;  %v2165_v27 = vld [vmem:[%s2770_s23 + $0x24] sm:$0x1]  ;;  %v965_v28 = vunpack.c.l.bf16 %v2162_v25  ;;  %v2546_v32 = vld [vmem:[%s2770_s23 + $0x20] ss:$8 sps:$4 sm:$0xff]  }
  0x1d   : > { %v966_v29 = vunpack.c.l.bf16 %v2163_v26  ;;  %v967_v30 = vunpack.c.h.bf16 %v2162_v25  ;;  %v968_v31 = vunpack.c.l.bf16 %v2165_v27  ;;  %2339 = vmatpush3.bf16.msra.mxu1 %v536_v10  ;;  %v994_v34 = vrot.slane %v962_v22, 1  ;;  %2334 = vmatprep.mubr.msk.bf16.mxu1 %vm346_vm1, %v2546_v32  ;;  %v2547_v43 = vld [vmem:[%s2770_s23 + $0x30] ss:$8 sps:$4 sm:$0xff]   ;;  %v2167_v45 = vld [vmem:[%s2770_s23 + $0x2c] sm:$0x1]  ;;  %s2041_s19 = sshll.u32 %s3016_s17, 4  ;;  %s3037_s19 = int_to_ptr.vmem [resolvable:$true] %s2041_s19 }
  0x1e   : > { %v993_v33 = vrot.slane %v961_v21, 1  ;;  %v996_v35 = vrot.slane %v963_v23, 1  ;;  %v997_v36 = vrot.slane %v964_v24, 1  ;;  %2494 = vmatprep.subr.msk.bf16.mxu1 %vm359_vm0, %v2136_v7  ;;  %v999_v37 = vrot.slane %v965_v28, 1  ;;  %v2166_v44 = vld [vmem:[%s2770_s23 + $0x28] ss:$8 sps:$4 sm:$0xff]  }
  0x1f   : > { %v1000_v38 = vrot.slane %v966_v29, 1  ;;  %v1002_v39 = vrot.slane %v967_v30, 1  ;;  %v1003_v40 = vrot.slane %v968_v31, 1  ;;  %v2169_v49 = vld [vmem:[%s2770_s23 + $0x34] sm:$0x1]  ;;  %v969_v50 = vunpack.c.l.bf16 %v2166_v44  ;;  %s2560_s24 = scalar_lea.vmem %s3037_s19, 1024 }
  0x20   : > { %v995_v41 = vsel %vm484_vm2, %v993_v33, %v994_v34  ;;  %v998_v42 = vsel %vm484_vm2, %v996_v35, %v997_v36  ;;  %v2170_v51 = vld [vmem:[%s2770_s23 + $0x38] ss:$8 sps:$4 sm:$0xff]   ;;  %v2171_v52 = vld [vmem:[%s2770_s23 + $0x3c] sm:$0x1]  ;;  %v970_v54 = vunpack.c.l.bf16 %v2167_v45  ;;  %v971_v55 = vunpack.c.h.bf16 %v2166_v44  ;;  %v2173_v57 = vld [vmem:[%s2770_s23 + $0x44] sm:$0x1]  ;;  %p2561_p11 = scmp.ne.s32.totalorder %s3037_s19, %s2560_s24 }
  0x21   : > { %v1025_v46 = vpack.c.bf16 %v998_v42, %v995_v41  ;;  %v1001_v47 = vsel %vm484_vm2, %v999_v37, %v1000_v38  ;;  %v1004_v48 = vsel %vm484_vm2, %v1002_v39, %v1003_v40  ;;  %v972_v56 = vunpack.c.l.bf16 %v2169_v49  ;;  %v436_v58 = vld [vmem:[%s2770_s23] ss:$8 sps:$4 sm:$0xff]   ;;  %v437_v63 = vld [vmem:[%s2770_s23 + $0x4] sm:$0x1]  ;;  %v439_v4 = vld [vmem:[%s2770_s23 + $0xc] sm:$0x1] }
  0x22   : > { %v1026_v53 = vpack.c.bf16 %v1004_v48, %v1001_v47  ;;  %v1005_v59 = vrot.slane %v969_v50, 1  ;;  %v973_v60 = vunpack.c.l.bf16 %v2170_v51  ;;  %v974_v61 = vunpack.c.l.bf16 %v2171_v52  ;;  %v440_v17 = vld [vmem:[%s2770_s23 + $0x10] ss:$8 sps:$4 sm:$0xff]   ;;  %v441_v22 = vld [vmem:[%s2770_s23 + $0x14] sm:$0x1]  ;;  %p2562_p12 = pnand %p2561_p11, %p2710_p5 }
  0x23   : > { %2370 = vmatprep.mubr.msk.bf16.mxu0 %vm346_vm1, %v1025_v46  ;;  %v975_v62 = vunpack.c.h.bf16 %v2170_v51  ;;  %v1006_v0 = vrot.slane %v970_v54, 1  ;;  %v1008_v1 = vrot.slane %v971_v55, 1  ;;  %v1009_v2 = vrot.slane %v972_v56, 1  ;;  %v443_v26 = vld [vmem:[%s2770_s23 + $0x1c] sm:$0x1] }
  0x24   : > { %2371 = vmatmul.mubr.msk.bf16.vlgmr.msra.gmra.mrb[0].mxu0 %vm346_vm1, %v1026_v53  ;;  %2335 = vmatmul.mubr.msk.bf16.gmra.mrb[4].mxu1 %vm346_vm1, %v2547_v43  ;;  %v976_v3 = vunpack.c.l.bf16 %v2173_v57  ;;  %v1011_v5 = vrot.slane %v973_v60, 1  ;;  %v1012_v7 = vrot.slane %v974_v61, 1  ;;  %v452_v16 = vunpack.c.l.bf16 %v436_v58  ;;  %v2179_v31 = vld [vmem:[%s2770_s23 + $0x8] ss:$8 sps:$4 sm:$0xff]   ;;  %v2180_v32 = vld [vmem:[%s2770_s23 + $0xc] sm:$0x1]  ;;  %p2563_p13 = pneg %p2562_p12 }
  0x25   : > { %2379 = vmatpush3.bf16.msra.mxu0 %v2754_v9  ;;  %v1014_v10 = vrot.slane %v975_v62, 1  ;;  %v1007_v18 = vsel %vm484_vm2, %v1005_v59, %v1006_v0  ;;  %v1010_v19 = vsel %vm484_vm2, %v1008_v1, %v1009_v2  ;;  %v453_v21 = vunpack.c.l.bf16 %v437_v63  ;;  %v2182_v40 = vld [vmem:[%s2770_s23 + $0x14] sm:$0x1]  ;;  %v2183_v45 = vld [vmem:[%s2770_s23 + $0x18] ss:$8 sps:$4 sm:$0xff]  }
  0x26   : > { %v1015_v20 = vrot.slane %v976_v3, 1  ;;  %2498 = vmatprep.subr.msk.bf16.mxu0 %vm359_vm0, %v2742_v6  ;;  %v1027_v23 = vpack.c.bf16 %v1010_v19, %v1007_v18  ;;  %v1013_v9 = vsel %vm484_vm2, %v1011_v5, %v1012_v7  ;;  %v454_v24 = vunpack.c.h.bf16 %v436_v58  ;;  %v2184_v46 = vld [vmem:[%s2770_s23 + $0x1c] sm:$0x1]  ;;  %v2186_v55 = vld [vmem:[%s2770_s23 + $0x24] sm:$0x1] }
  0x27   : > { %v455_v25 = vunpack.c.l.bf16 %v439_v4  ;;  %v485_v28 = vrot.slane %v452_v16, 1  ;;  %v486_v29 = vrot.slane %v453_v21, 1  ;;  %v456_v30 = vunpack.c.l.bf16 %v440_v17  ;;  %v444_v56 = vld [vmem:[%s2770_s23 + $0x20] ss:$8 sps:$4 sm:$0xff]   ;;  %v445_v61 = vld [vmem:[%s2770_s23 + $0x24] sm:$0x1] }
  0x28   : > { %v1016_v27 = vsel %vm484_vm2, %v1014_v10, %v1015_v20  ;;  %2374 = vmatprep.mubr.msk.bf16.mxu0 %vm346_vm1, %v1027_v23  ;;  %v488_v6 = vrot.slane %v454_v24, 1  ;;  %v457_v35 = vunpack.c.l.bf16 %v441_v22  ;;  %v458_v37 = vunpack.c.h.bf16 %v440_v17  ;;  %v447_v2 = vld [vmem:[%s2770_s23 + $0x2c] sm:$0x1]  ;;  %v448_v10 = vld [vmem:[%s2770_s23 + $0x30] ss:$8 sps:$4 sm:$0xff]  }
  0x29   : > { %v1028_v33 = vpack.c.bf16 %v1016_v27, %v1013_v9  ;;  %v489_v34 = vrot.slane %v455_v25, 1  ;;  %v487_v36 = vsel %vm484_vm2, %v485_v28, %v486_v29  ;;  %v459_v38 = vunpack.c.l.bf16 %v443_v26  ;;  %v449_v16 = vld [vmem:[%s2770_s23 + $0x34] sm:$0x1]  ;;  %v451_v21 = vld [vmem:[%s2770_s23 + $0x3c] sm:$0x1] }
  0x2a   : > { %v491_v39 = vrot.slane %v456_v30, 1  ;;  %v492_v42 = vrot.slane %v457_v35, 1  ;;  %v1151_v43 = vunpack.c.l.bf16 %v2179_v31  ;;  %v1152_v44 = vunpack.c.l.bf16 %v2180_v32  ;;  %v2187_v25 = vld [vmem:[%s2770_s23 + $0x28] ss:$8 sps:$4 sm:$0xff]  }
  0x2b   : > { %v490_v41 = vsel %vm484_vm2, %v488_v6, %v489_v34  ;;  %v494_v48 = vrot.slane %v458_v37, 1  ;;  %v495_v49 = vrot.slane %v459_v38, 1  ;;  %v1153_v50 = vunpack.c.h.bf16 %v2179_v31  ;;  %v2190_v37 = vld [vmem:[%s2770_s23 + $0x34] sm:$0x1]  ;;  %v2191_v38 = vld [vmem:[%s2770_s23 + $0x38] ss:$8 sps:$4 sm:$0xff]  }
  0x2c   : > { %2375 = vmatmul.mubr.msk.bf16.gmra.mrb[4].mxu0 %vm346_vm1, %v1028_v33  ;;  %v517_v47 = vpack.c.bf16 %v490_v41, %v487_v36  ;;  %v493_v51 = vsel %vm484_vm2, %v491_v39, %v492_v42  ;;  %v1154_v52 = vunpack.c.l.bf16 %v2182_v40  ;;  %v1183_v53 = vrot.slane %v1151_v43, 2  ;;  %v2192_v42 = vld [vmem:[%s2770_s23 + $0x3c] sm:$0x1]  ;;  %v2194_v43 = vld [vmem:[%s2770_s23 + $0x44] sm:$0x1] }
  0x2d   : > { %v1184_v54 = vrot.slane %v1152_v44, 2  ;;  %v496_v57 = vsel %vm484_vm2, %v494_v48, %v495_v49  ;;  %v1186_v58 = vrot.slane %v1153_v50, 2  ;;  %v1155_v59 = vunpack.c.l.bf16 %v2183_v45  ;;  %v627_v48 = vld [vmem:[%s2770_s23] ss:$8 sps:$4 sm:$0xff]   ;;  %v628_v49 = vld [vmem:[%s2770_s23 + $0x4] sm:$0x1] }
  0x2e   : > { %2340 = vmatprep.mubr.msk.bf16.mxu1 %vm346_vm1, %v517_v47  ;;  %v1156_v60 = vunpack.c.l.bf16 %v2184_v46  ;;  %v518_v62 = vpack.c.bf16 %v496_v57, %v493_v51  ;;  %v1187_v0 = vrot.slane %v1154_v52, 2  ;;  %v1157_v1 = vunpack.c.h.bf16 %v2183_v45 }
  0x2f   : > { %v1185_v63 = vsel %vm675_vm3, %v1183_v53, %v1184_v54  ;;  %v1158_v3 = vunpack.c.l.bf16 %v2186_v55  ;;  %v1189_v4 = vrot.slane %v1155_v59, 2  ;;  %v460_v7 = vunpack.c.l.bf16 %v444_v56 }
  0x30   : > { %v1190_v5 = vrot.slane %v1156_v60, 2  ;;  %2341 = vmatmul.mubr.msk.bf16.vlgmr.msra.gmra.mrb[0].mxu1 %vm346_vm1, %v518_v62  ;;  %v1188_v17 = vsel %vm675_vm3, %v1186_v58, %v1187_v0  ;;  %v1192_v18 = vrot.slane %v1157_v1, 2  ;;  %v461_v19 = vunpack.c.l.bf16 %v445_v61  ;;  %v630_v58 = vld [vmem:[%s2770_s23 + $0xc] sm:$0x1]  ;;  %v631_v62 = vld [vmem:[%s2770_s23 + $0x10] ss:$8 sps:$4 sm:$0xff]  }
  0x31   : > { %v462_v20 = vunpack.c.h.bf16 %v444_v56  ;;  %v1215_v22 = vpack.c.bf16 %v1188_v17, %v1185_v63  ;;  %v1193_v9 = vrot.slane %v1158_v3, 2  ;;  %v463_v24 = vunpack.c.l.bf16 %v447_v2  ;;  %2349 = vmatpush3.bf16.msra.mxu1 %v2777_v13  ;;  %v2188_v13 = vld [vmem:[%s2770_s23 + $0x2c] sm:$0x1] }
  0x32   : > { %v1191_v23 = vsel %vm675_vm3, %v1189_v4, %v1190_v5  ;;  %v497_v26 = vrot.slane %v460_v7, 1  ;;  %v498_v27 = vrot.slane %v461_v19, 1  ;;  %v464_v29 = vunpack.c.l.bf16 %v448_v10  ;;  %2495 = vmatprep.subr.msk.bf16.mxu1 %vm359_vm0, %v2760_v11  ;;  %v632_v7 = vld [vmem:[%s2770_s23 + $0x14] sm:$0x1]  ;;  %v634_v19 = vld [vmem:[%s2770_s23 + $0x1c] sm:$0x1] }
  0x33   : > { %v500_v28 = vrot.slane %v462_v20, 1  ;;  %2380 = vmatprep.mubr.msk.bf16.mxu0 %vm346_vm1, %v1215_v22  ;;  %v1194_v30 = vsel %vm675_vm3, %v1192_v18, %v1193_v9  ;;  %v501_v31 = vrot.slane %v463_v24, 1  ;;  %v465_v32 = vunpack.c.l.bf16 %v449_v16  ;;  %v2548_v20 = vld [vmem:[%s2770_s23 + $0x10] ss:$8 sps:$4 sm:$0xff]   ;;  %v635_v24 = vld [vmem:[%s2770_s23 + $0x20] ss:$8 sps:$4 sm:$0xff]  }
  0x34   : > { %v466_v33 = vunpack.c.h.bf16 %v448_v10  ;;  %v1216_v6 = vpack.c.bf16 %v1194_v30, %v1191_v23  ;;  %v499_v34 = vsel %vm484_vm2, %v497_v26, %v498_v27  ;;  %v467_v35 = vunpack.c.l.bf16 %v451_v21  ;;  %v638_v30 = vld [vmem:[%s2770_s23 + $0x2c] sm:$0x1] }
  0x35   : > { %v503_v36 = vrot.slane %v464_v29, 1  ;;  %v502_v11 = vsel %vm484_vm2, %v500_v28, %v501_v31  ;;  %v504_v39 = vrot.slane %v465_v32, 1  ;;  %v1159_v41 = vunpack.c.l.bf16 %v2187_v25 }
  0x36   : > { %v506_v40 = vrot.slane %v466_v33, 1  ;;  %2381 = vmatmul.mubr.msk.bf16.vlgmr.msra.gmra.mrb[0].mxu0 %vm346_vm1, %v1216_v6  ;;  %v519_v44 = vpack.c.bf16 %v502_v11, %v499_v34  ;;  %v507_v45 = vrot.slane %v467_v35, 1  ;;  %v1160_v46 = vunpack.c.l.bf16 %v2188_v13  ;;  %v639_v6 = vld [vmem:[%s2770_s23 + $0x30] ss:$8 sps:$4 sm:$0xff]  }
  0x37   : > { %v1161_v47 = vunpack.c.h.bf16 %v2187_v25  ;;  %2389 = vmatpush3.bf16.msra.mxu0 %v2774_v12  ;;  %v505_v50 = vsel %vm484_vm2, %v503_v36, %v504_v39  ;;  %v1162_v51 = vunpack.c.l.bf16 %v2190_v37  ;;  %v1195_v52 = vrot.slane %v1159_v41, 2  ;;  %v636_v25 = vld [vmem:[%s2770_s23 + $0x24] sm:$0x1] }
  0x38   : > { %v1163_v53 = vunpack.c.l.bf16 %v2191_v38  ;;  %2344 = vmatprep.mubr.msk.bf16.mxu1 %vm346_vm1, %v519_v44  ;;  %v508_v54 = vsel %vm484_vm2, %v506_v40, %v507_v45  ;;  %v1196_v55 = vrot.slane %v1160_v46, 2  ;;  %v1164_v57 = vunpack.c.l.bf16 %v2192_v42  ;;  %2499 = vmatprep.subr.msk.bf16.mxu0 %vm359_vm0, %v2751_v8  ;;  %v642_v46 = vld [vmem:[%s2770_s23 + $0x3c] sm:$0x1] }
  0x39   : > { %v1198_v56 = vrot.slane %v1161_v47, 2  ;;  %v520_v59 = vpack.c.bf16 %v508_v54, %v505_v50  ;;  %v1199_v12 = vrot.slane %v1162_v51, 2  ;;  %v1165_v60 = vunpack.c.h.bf16 %v2191_v38  ;;  %v640_v38 = vld [vmem:[%s2770_s23 + $0x34] sm:$0x1]  ;;  %v2217_v47 = vld [vmem:[%s2770_s23 + $0x10] ss:$8 sps:$4 sm:$0xff]  }
  0x3a   : > { %v1166_v61 = vunpack.c.l.bf16 %v2194_v43  ;;  %v1197_v63 = vsel %vm675_vm3, %v1195_v52, %v1196_v55  ;;  %v1201_v0 = vrot.slane %v1163_v53, 2  ;;  %v1202_v1 = vrot.slane %v1164_v57, 2  ;;  %v2218_v52 = vld [vmem:[%s2770_s23 + $0x14] sm:$0x1]  ;;  %v2549_v54 = vld [vmem:[%s2770_s23 + $0x20] ss:$8 sps:$4 sm:$0xff]  }
  0x3b   : > { %v643_v2 = vunpack.c.l.bf16 %v627_v48  ;;  %2345 = vmatmul.mubr.msk.bf16.gmra.mrb[4].mxu1 %vm346_vm1, %v520_v59  ;;  %v1200_v3 = vsel %vm675_vm3, %v1198_v56, %v1199_v12  ;;  %v1204_v4 = vrot.slane %v1165_v60, 2  ;;  %v644_v5 = vunpack.c.l.bf16 %v628_v49 }
  0x3c   : > { %v1205_v8 = vrot.slane %v1166_v61, 2  ;;  %v1217_v10 = vpack.c.bf16 %v1200_v3, %v1197_v63  ;;  %v1203_v16 = vsel %vm675_vm3, %v1201_v0, %v1202_v1  ;;  %v645_v17 = vunpack.c.h.bf16 %v627_v48  ;;  %v2221_v63 = vld [vmem:[%s2770_s23 + $0x20] ss:$8 sps:$4 sm:$0xff]   ;;  %v2550_v3 = vld [vmem:[%s2770_s23 + $0x30] ss:$8 sps:$4 sm:$0xff]  }
  0x3d   : > { %v646_v18 = vunpack.c.l.bf16 %v630_v58  ;;  %v676_v22 = vrot.slane %v643_v2, 2  ;;  %v677_v23 = vrot.slane %v644_v5, 2  ;;  %v647_v9 = vunpack.c.l.bf16 %v631_v62  ;;  %v2220_v58 = vld [vmem:[%s2770_s23 + $0x1c] sm:$0x1]  ;;  %v2910_v0 = vld [vmem:[%s3091_s3] sm:$0x3] }
  0x3e   : > { %v1206_v21 = vsel %vm675_vm3, %v1204_v4, %v1205_v8  ;;  %2384 = vmatprep.mubr.msk.bf16.mxu0 %vm346_vm1, %v1217_v10  ;;  %v679_v27 = vrot.slane %v645_v17, 2  ;;  %v648_v29 = vunpack.c.l.bf16 %v632_v7  ;;  %v649_v32 = vunpack.c.h.bf16 %v631_v62  ;;  %v2904_v62 = vld [vmem:[%s3089_s1 + $0x20] sm:$0xf]  ;;  %v2222_v5 = vld [vmem:[%s2770_s23 + $0x24] sm:$0x1] }
  0x3f   : > { %v1218_v26 = vpack.c.bf16 %v1206_v21, %v1203_v16  ;;  %v680_v28 = vrot.slane %v646_v18, 2  ;;  %v678_v31 = vsel %vm675_vm3, %v676_v22, %v677_v23  ;;  %v650_v33 = vunpack.c.l.bf16 %v634_v19  ;;  %v2224_v18 = vld [vmem:[%s2770_s23 + $0x2c] sm:$0x1]  ;;  %v2225_v19 = vld [vmem:[%s2770_s23 + $0x30] ss:$8 sps:$4 sm:$0xff]  }
  0x40   : > { %v682_v13 = vrot.slane %v647_v9, 2  ;;  %v683_v35 = vrot.slane %v648_v29, 2  ;;  %v651_v36 = vunpack.c.l.bf16 %v635_v24  ;;  %v652_v37 = vunpack.c.l.bf16 %v636_v25  ;;  %v2226_v9 = vld [vmem:[%s2770_s23 + $0x34] sm:$0x1] }
  0x41   : > { %2385 = vmatmul.mubr.msk.bf16.gmra.mrb[4].mxu0 %vm346_vm1, %v1218_v26  ;;  %v681_v34 = vsel %vm675_vm3, %v679_v27, %v680_v28  ;;  %v685_v39 = vrot.slane %v649_v32, 2  ;;  %v686_v40 = vrot.slane %v650_v33, 2  ;;  %v653_v41 = vunpack.c.h.bf16 %v635_v24  ;;  %v2551_v28 = vld [vmem:[%s2770_s23 + $0x40] ss:$8 sps:$4 sm:$0xff]  }
  0x42   : > { %v708_v11 = vpack.c.bf16 %v681_v34, %v678_v31  ;;  %2390 = vmatprep.mubr.msk.bf16.mxu0 %vm346_vm1, %v2548_v20  ;;  %v684_v42 = vsel %vm675_vm3, %v682_v13, %v683_v35  ;;  %v654_v43 = vunpack.c.l.bf16 %v638_v30  ;;  %v688_v44 = vrot.slane %v651_v36, 2  ;;  %v2228_v30 = vld [vmem:[%s2770_s23 + $0x3c] sm:$0x1]  ;;  %v2552_v31 = vld [vmem:[%s2770_s23 + $0x8] ss:$8 sps:$4 sm:$0xff]  }
  0x43   : > { %v689_v45 = vrot.slane %v652_v37, 2  ;;  %v687_v48 = vsel %vm675_vm3, %v685_v39, %v686_v40  ;;  %v691_v49 = vrot.slane %v653_v41, 2  ;;  %v655_v50 = vunpack.c.l.bf16 %v639_v6 }
  0x44   : > { %2350 = vmatprep.mubr.msk.bf16.mxu1 %vm346_vm1, %v708_v11  ;;  %v656_v51 = vunpack.c.l.bf16 %v640_v38  ;;  %v709_v53 = vpack.c.bf16 %v687_v48, %v684_v42  ;;  %v692_v56 = vrot.slane %v654_v43, 2  ;;  %v657_v57 = vunpack.c.h.bf16 %v639_v6  ;;  %v2229_v6 = vld [vmem:[%s2770_s23 + $0x40] ss:$8 sps:$4 sm:$0xff]   ;;  %v2230_v38 = vld [vmem:[%s2770_s23 + $0x44] sm:$0x1] }
  0x45   : > { %v690_v55 = vsel %vm675_vm3, %v688_v44, %v689_v45  ;;  %v658_v59 = vunpack.c.l.bf16 %v642_v46  ;;  %v694_v12 = vrot.slane %v655_v50, 2  ;;  %v1468_v61 = vunpack.c.l.bf16 %v2217_v47  ;;  %v2232_v11 = vld [vmem:[%s2770_s23 + $0x4c] sm:$0x1]  ;;  %v2238_v42 = vld [vmem:[%s2770_s23 + $0x10] ss:$8 sps:$4 sm:$0xff]  }
  0x46   : > { %v695_v60 = vrot.slane %v656_v51, 2  ;;  %2351 = vmatmul.mubr.msk.bf16.vlgmr.msra.gmra.mrb[0].mxu1 %vm346_vm1, %v709_v53  ;;  %v693_v1 = vsel %vm675_vm3, %v691_v49, %v692_v56  ;;  %v697_v2 = vrot.slane %v657_v57, 2  ;;  %v1469_v4 = vunpack.c.l.bf16 %v2218_v52  ;;  %v2239_v43 = vld [vmem:[%s2770_s23 + $0x14] sm:$0x1]  ;;  %v2553_v57 = vld [vmem:[%s2770_s23 + $0x18] ss:$8 sps:$4 sm:$0xff]  }
  0x47   : > { %v1470_v8 = vunpack.c.h.bf16 %v2217_v47  ;;  %v710_v7 = vpack.c.bf16 %v693_v1, %v690_v55  ;;  %v698_v16 = vrot.slane %v658_v59, 2  ;;  %2359 = vmatpush3.bf16.msra.mxu1 %v2785_v15  ;;  %v1471_v17 = vunpack.c.l.bf16 %v2220_v58 }
  0x48   : > { %v696_v10 = vsel %vm675_vm3, %v694_v12, %v695_v60  ;;  %v1500_v20 = vrot.slane %v1468_v61, 1  ;;  %v1501_v21 = vrot.slane %v1469_v4, 1  ;;  %v1472_v23 = vunpack.c.l.bf16 %v2221_v63  ;;  %2501 = vmatprep.subr.msk.bf16.mxu1 %vm1874_vm4, %v2910_v0 }
  0x49   : > { %2391 = vmatmul.mubr.msk.bf16.vlgmr.msra.gmra.mrb[0].mxu0 %vm346_vm1, %v2549_v54  ;;  %v1503_v22 = vrot.slane %v1470_v8, 1  ;;  %2354 = vmatprep.mubr.msk.bf16.mxu1 %vm346_vm1, %v710_v7  ;;  %v699_v15 = vsel %vm675_vm3, %v697_v2, %v698_v16  ;;  %v1504_v24 = vrot.slane %v1471_v17, 1  ;;  %v1473_v25 = vunpack.c.l.bf16 %v2222_v5  ;;  %v2241_v54 = vld [vmem:[%s2770_s23 + $0x1c] sm:$0x1]  ;;  %v2242_v17 = vld [vmem:[%s2770_s23 + $0x20] ss:$8 sps:$4 sm:$0xff]  }
  0x4a   : > { %2399 = vmatpush3.bf16.msra.mxu0 %v2781_v14  ;;  %v1474_v26 = vunpack.c.h.bf16 %v2221_v63  ;;  %v711_v27 = vpack.c.bf16 %v699_v15, %v696_v10  ;;  %2394 = vmatprep.mubr.msk.bf16.mxu0 %vm346_vm1, %v2550_v3  ;;  %v1502_v29 = vsel %vm484_vm2, %v1500_v20, %v1501_v21  ;;  %v1475_v14 = vunpack.c.l.bf16 %v2224_v18  ;;  %v2554_v63 = vld [vmem:[%s2770_s23 + $0x28] ss:$8 sps:$4 sm:$0xff]   ;;  %v2243_v18 = vld [vmem:[%s2770_s23 + $0x24] sm:$0x1]  ;;  %v2245_v20 = vld [vmem:[%s2770_s23 + $0x2c] sm:$0x1] }
  0x4b   : > { %2500 = vmatprep.subr.msk.bf16.mxu0 %vm359_vm0, %v2904_v62  ;;  %v1505_v32 = vsel %vm484_vm2, %v1503_v22, %v1504_v24  ;;  %v1506_v33 = vrot.slane %v1472_v23, 1  ;;  %v1507_v13 = vrot.slane %v1473_v25, 1  ;;  %v1476_v36 = vunpack.c.l.bf16 %v2225_v19  ;;  %v2246_v21 = vld [vmem:[%s2770_s23 + $0x30] ss:$8 sps:$4 sm:$0xff]   ;;  %v2249_v22 = vld [vmem:[%s2770_s23 + $0x3c] sm:$0x1] }
  0x4c   : > { %v1509_v34 = vrot.slane %v1474_v26, 1  ;;  %v1510_v35 = vrot.slane %v1475_v14, 1  ;;  %v1477_v37 = vunpack.c.l.bf16 %v2226_v9  ;;  %v1532_v39 = vpack.c.bf16 %v1505_v32, %v1502_v29  ;;  %v2555_v29 = vld [vmem:[%s2770_s23 + $0x38] ss:$8 sps:$4 sm:$0xff]  }
  0x4d   : > { %v1478_v40 = vunpack.c.h.bf16 %v2225_v19  ;;  %v1479_v41 = vunpack.c.l.bf16 %v2228_v30  ;;  %v1512_v44 = vrot.slane %v1476_v36, 1  ;;  %v1508_v46 = vsel %vm484_vm2, %v1506_v33, %v1507_v13  ;;  %v2556_v33 = vld [vmem:[%s2765_s26] sm:$0xff]  }
  0x4e   : > { %2355 = vmatmul.mubr.msk.bf16.gmra.mrb[4].mxu1 %vm346_vm1, %v711_v27  ;;  %v1513_v45 = vrot.slane %v1477_v37, 1  ;;  %v1480_v49 = vunpack.c.l.bf16 %v2229_v6  ;;  %v1511_v50 = vsel %vm484_vm2, %v1509_v34, %v1510_v35  ;;  %v1481_v51 = vunpack.c.l.bf16 %v2230_v38  ;;  %v2250_v38 = vld [vmem:[%s2770_s23 + $0x40] ss:$8 sps:$4 sm:$0xff]  }
  0x4f   : > { %2360 = vmatprep.mubr.msk.bf16.mxu1 %vm346_vm1, %v2552_v31  ;;  %v1515_v47 = vrot.slane %v1478_v40, 1  ;;  %v1516_v48 = vrot.slane %v1479_v41, 1  ;;  %v1482_v52 = vunpack.c.h.bf16 %v2229_v6  ;;  %v1483_v53 = vunpack.c.l.bf16 %v2232_v11  ;;  %v2251_v11 = vld [vmem:[%s2770_s23 + $0x44] sm:$0x1] }
  0x50   : > { %v1658_v55 = vunpack.c.l.bf16 %v2238_v42  ;;  %v1659_v56 = vunpack.c.l.bf16 %v2239_v43  ;;  %v1514_v58 = vsel %vm484_vm2, %v1512_v44, %v1513_v45  ;;  %v1660_v12 = vunpack.c.h.bf16 %v2238_v42  ;;  %v2253_v43 = vld [vmem:[%s2770_s23 + $0x4c] sm:$0x1] }
  0x51   : > { %2395 = vmatmul.mubr.msk.bf16.gmra.mrb[4].mxu0 %vm346_vm1, %v2551_v28  ;;  %v1517_v59 = vsel %vm484_vm2, %v1515_v47, %v1516_v48  ;;  %v1533_v60 = vpack.c.bf16 %v1511_v50, %v1508_v46  ;;  %v1741_v61 = vsel %vm359_vm0, %v2904_v62, 0  ;;  %v1876_v1 = vsel %vm1874_vm4, %v2910_v0, 0  ;;  %v2247_v0 = vld [vmem:[%s2770_s23 + $0x34] sm:$0x1]  ;;  %v2557_v50 = vld [vmem:[%s2765_s26 + $0x8] sm:$0xff]  }
  0x52   : > { %2400 = vmatprep.mubr.msk.bf16.mxu0 %vm346_vm1, %v1532_v39  ;;  %v1661_v2 = vunpack.c.l.bf16 %v2241_v54  ;;  %v1518_v3 = vrot.slane %v1480_v49, 1  ;;  %v1519_v4 = vrot.slane %v1481_v51, 1  ;;  %v1521_v8 = vrot.slane %v1482_v52, 1 }
  0x53   : > { %v1522_v5 = vrot.slane %v1483_v53, 1  ;;  %v1534_v7 = vpack.c.bf16 %v1517_v59, %v1514_v58  ;;  %v1690_v10 = vrot.slane %v1658_v55, 2  ;;  %v1691_v16 = vrot.slane %v1659_v56, 2  ;;  %v2558_v53 = vld [vmem:[%s2765_s26 + $0x10] sm:$0xff]  }
  0x54   : > { %v1693_v62 = vrot.slane %v1660_v12, 2  ;;  %v1694_v19 = vrot.slane %v1661_v2, 2  ;;  %v1520_v23 = vsel %vm484_vm2, %v1518_v3, %v1519_v4  ;;  %v1662_v15 = vunpack.c.l.bf16 %v2242_v17 }
  0x55   : > { %v1523_v9 = vsel %vm484_vm2, %v1521_v8, %v1522_v5  ;;  %v1663_v24 = vunpack.c.l.bf16 %v2243_v18  ;;  %v1692_v25 = vsel %vm675_vm3, %v1690_v10, %v1691_v16  ;;  %v1664_v26 = vunpack.c.h.bf16 %v2242_v17 }
  0x56   : > { %2361 = vmatmul.mubr.msk.bf16.vlgmr.msra.gmra.mrb[0].mxu1 %vm346_vm1, %v2553_v57  ;;  %v1665_v27 = vunpack.c.l.bf16 %v2245_v20  ;;  %v1666_v28 = vunpack.c.l.bf16 %v2246_v21  ;;  %v1695_v14 = vsel %vm675_vm3, %v1693_v62, %v1694_v19  ;;  %v1667_v30 = vunpack.c.l.bf16 %v2247_v0  ;;  %v2267_v62 = vld [vmem:[%s3092_s4] ss:$0 sm:$0xff] }
  0x57   : > { %2364 = vmatprep.mubr.msk.bf16.mxu1 %vm346_vm1, %v2554_v63  ;;  %2419 = vmatpush3.bf16.msra.mxu1 %v1876_v1  ;;  %v1668_v31 = vunpack.c.h.bf16 %v2246_v21  ;;  %v1669_v32 = vunpack.c.l.bf16 %v2249_v22  ;;  %v1535_v13 = vpack.c.bf16 %v1523_v9, %v1520_v23  ;;  %v1696_v6 = vrot.slane %v1662_v15, 2  ;;  %v2999_v19 = vld [vmem:[%s3094_s6] ss:$0 sm:$0xff] }
  0x58   : > { %v1697_v34 = vrot.slane %v1663_v24, 2  ;;  %v1722_v35 = vpack.c.bf16 %v1695_v14, %v1692_v25  ;;  %v1699_v36 = vrot.slane %v1664_v26, 2  ;;  %v1700_v37 = vrot.slane %v1665_v27, 2  ;;  %v2268_v9 = vld [vmem:[%s3093_s5] ss:$0 sm:$0xff] }
  0x59   : > { %2401 = vmatmul.mubr.msk.bf16.vlgmr.msra.gmra.mrb[0].mxu0 %vm346_vm1, %v1533_v60  ;;  %v1702_v39 = vrot.slane %v1666_v28, 2  ;;  %v1703_v40 = vrot.slane %v1667_v30, 2  ;;  %v1705_v41 = vrot.slane %v1668_v31, 2  ;;  %v1706_v42 = vrot.slane %v1669_v32, 2  ;;  %v2270_v32 = vld [vmem:[%s3095_s7] ss:$0 sm:$0xff] }
  0x5a   : > { %2409 = vmatpush3.bf16.msra.mxu0 %v1741_v61  ;;  %2404 = vmatprep.mubr.msk.bf16.mxu0 %vm346_vm1, %v1534_v7  ;;  %v1698_v44 = vsel %vm675_vm3, %v1696_v6, %v1697_v34  ;;  %v1670_v45 = vunpack.c.l.bf16 %v2250_v38  ;;  %v1701_v46 = vsel %vm675_vm3, %v1699_v36, %v1700_v37  ;;  %v1671_v47 = vunpack.c.l.bf16 %v2251_v11  ;;  %v2559_v61 = vld [vmem:[%s2765_s26 + $0x18] sm:$0xff]   ;;  %s2564_s26 = sshll.u32 %s2624_s25, 4  ;;  %s2565_s26 = int_to_ptr.vmem [resolvable:$false] %s2564_s26 }
  0x5b   : > { %v1672_v48 = vunpack.c.h.bf16 %v2250_v38  ;;  %v1673_v49 = vunpack.c.l.bf16 %v2253_v43  ;;  %v1704_v51 = vsel %vm675_vm3, %v1702_v39, %v1703_v40  ;;  %v1707_v52 = vsel %vm675_vm3, %v1705_v41, %v1706_v42  ;;  %s2566_s12 = scalar_lea.vmem %s2565_s26, 2048  ;;  %p2567_p0 = scmp.lt.s32.totalorder %s3037_s19, %s2565_s26 }
  0x5c   : > { %v1723_v54 = vpack.c.bf16 %v1701_v46, %v1698_v44  ;;  %v1708_v55 = vrot.slane %v1670_v45, 2  ;;  %v1724_v56 = vpack.c.bf16 %v1707_v52, %v1704_v51  ;;  %v1709_v57 = vrot.slane %v1671_v47, 2  ;;  %p2568_p1 = scmp.lt.s32.totalorder %s2566_s12, %s2560_s24 }
  0x5d   : > { %v1711_v58 = vrot.slane %v1672_v48, 2  ;;  %v1712_v59 = vrot.slane %v1673_v49, 2 }
  0x5e   : > { %2365 = vmatmul.mubr.msk.bf16.gmra.mrb[4].mxu1 %vm346_vm1, %v2555_v29  ;;  %v1710_v12 = vsel %vm675_vm3, %v1708_v55, %v1709_v57  ;;  %p2569_p2 = por %p2568_p1, %p2567_p0 }
  0x5f   : > { %2420 = vmatprep.mubr.msk.bf16.mxu1 %vm1861_vm5, %v2556_v33  ;;  %v1713_v60 = vsel %vm675_vm3, %v1711_v58, %v1712_v59 }
  0x60   : > { %v1725_v63 = vpack.c.bf16 %v1713_v60, %v1710_v12  ;;  %p2570_p3 = pnand %p2569_p2, %p2563_p13 }
  0x61   : > { %2405 = vmatmul.mubr.msk.bf16.gmra.mrb[4].mxu0 %vm346_vm1, %v1535_v13 }
  0x62   : > { %2410 = vmatprep.mubr.msk.bf16.mxu0 %vm346_vm1, %v1722_v35 }
  0x66   : > { %2421 = vmatmul.mubr.msk.bf16.vlgmr.msra.gmra.mrb[8].mxu1 %vm1861_vm5, %v2557_v50 }
  0x67   : > { %2424 = vmatprep.mubr.msk.bf16.mxu1 %vm1861_vm5, %v2558_v53 }
  0x69   : > { %2411 = vmatmul.mubr.msk.bf16.vlgmr.msra.gmra.mrb[0].mxu0 %vm346_vm1, %v1723_v54 }
  0x6a   : > { %2414 = vmatprep.mubr.msk.bf16.mxu0 %vm346_vm1, %v1724_v56 }
  0x6e   : > { %2425 = vmatmul.mubr.msk.bf16.gmra.mrb[12].mxu1 %vm1861_vm5, %v2559_v61 }
  0x71   : > { %2415 = vmatmul.mubr.msk.bf16.gmra.mrb[4].mxu0 %vm346_vm1, %v1725_v63 }
 0x129   : > { %v2362_v1 = vpop.f32.mrb[0].mxu1 }
 0x12a   : > { %v890_v2 = vpop.f32.mrb[1].mxu1 }
 0x12b   : > { %v2363_v3 = vpop.f32.mrb[2].mxu1 }
 0x12c   : > { %v893_v4 = vpop.f32.mrb[3].mxu1 }
 0x131   : > { %v2366_v8 = vpop.f32.mrb[4].mxu1 }
 0x132   : > { %v906_v5 = vpop.f32.mrb[5].mxu1 }
 0x133   : > { %v2367_v7 = vpop.f32.mrb[6].mxu1 }
 0x134   : > { %v909_v10 = vpop.f32.mrb[7].mxu1 }
 0x139   : > { %v2422_v16 = vpop.f32.mrb[8].mxu1 }
 0x13a   : > { %v1912_v17 = vpop.f32.mrb[9].mxu1  ;;  %v1982_v25 = vmul.f32 %v2422_v16, %v2999_v19 }
 0x13b   : > { %v2423_v20 = vpop.f32.mrb[10].mxu1  ;;  %v1980_v29 = vmul.f32 %v2999_v19, %v1912_v17 }
 0x13c   : > { %v2412_v18 = vpop.f32.mrb[0].mxu0  ;;  %v1915_v22 = vpop.f32.mrb[11].mxu1  ;;  %v1983_v36 = vmul.f32 %v2423_v20, %v2999_v19 }
 0x13d   : > { %v2428_v21 = vadd.f32 %v2412_v18, %v2362_v1  ;;  %v1777_v0 = vpop.f32.mrb[1].mxu0  ;;  %v1981_v39 = vmul.f32 %v2999_v19, %v1915_v22 }
 0x13e   : > { %v2429_v23 = vadd.f32 %v1777_v0, %v890_v2  ;;  %v2413_v15 = vpop.f32.mrb[2].mxu0 }
 0x13f   : > { %v1952_v24 = vmul.f32 %v2428_v21, %v2267_v62  ;;  %v2430_v26 = vadd.f32 %v2413_v15, %v2363_v3  ;;  %v1780_v27 = vpop.f32.mrb[3].mxu0 }
 0x140   : > { %v1950_v28 = vmul.f32 %v2429_v23, %v2267_v62  ;;  %v2431_v14 = vadd.f32 %v1780_v27, %v893_v4 }
 0x141   : > { %v1967_v30 = vadd.f32 %v2268_v9, %v1952_v24  ;;  %v1953_v31 = vmul.f32 %v2430_v26, %v2267_v62  ;;  %v2426_v6 = vpop.f32.mrb[12].mxu1 }
 0x142   : > { %v1965_v33 = vadd.f32 %v2268_v9, %v1950_v28  ;;  %v1951_v13 = vmul.f32 %v2431_v14, %v2267_v62  ;;  %v1928_v37 = vpop.f32.mrb[13].mxu1  ;;  %v1986_v46 = vmul.f32 %v2426_v6, %v2999_v19 }
 0x143   : > { %v1990_v34 = vadd.f32 %v1982_v25, %v1967_v30  ;;  %v1968_v35 = vadd.f32 %v2268_v9, %v1953_v31  ;;  %v2427_v41 = vpop.f32.mrb[14].mxu1  ;;  %v1984_v52 = vmul.f32 %v2999_v19, %v1928_v37 }
 0x144   : > { %v1988_v38 = vadd.f32 %v1980_v29, %v1965_v33  ;;  %v1966_v11 = vadd.f32 %v2268_v9, %v1951_v13  ;;  %v2416_v40 = vpop.f32.mrb[4].mxu0  ;;  %v1931_v47 = vpop.f32.mrb[15].mxu1 }
 0x145   : > { %v2005_v42 = vadd.f32 %v2270_v32, %v1990_v34  ;;  %v1991_v43 = vadd.f32 %v1983_v36, %v1968_v35  ;;  %v2432_v44 = vadd.f32 %v2416_v40, %v2366_v8  ;;  %v1793_v45 = vpop.f32.mrb[5].mxu0  ;;  %v1985_v17 = vmul.f32 %v2999_v19, %v1931_v47 }
 0x146   : > { %v2003_v48 = vadd.f32 %v2270_v32, %v1988_v38  ;;  %v1989_v49 = vadd.f32 %v1981_v39, %v1966_v11  ;;  %v2433_v50 = vadd.f32 %v1793_v45, %v906_v5  ;;  %v2417_v51 = vpop.f32.mrb[6].mxu0 }
 0x147   : > { %v2013_v53 = vmax.f32 %v2005_v42, 0.0  ;;  %v2006_v54 = vadd.f32 %v2270_v32, %v1991_v43  ;;  %v1956_v55 = vmul.f32 %v2432_v44, %v2267_v62  ;;  %v2434_v56 = vadd.f32 %v2417_v51, %v2367_v7  ;;  %v1796_v57 = vpop.f32.mrb[7].mxu0 }
 0x148   : > { %v2011_v58 = vmax.f32 %v2003_v48, 0.0  ;;  %v2004_v59 = vadd.f32 %v2270_v32, %v1989_v49  ;;  %v1954_v12 = vmul.f32 %v2433_v50, %v2267_v62  ;;  %v2435_v60 = vadd.f32 %v1796_v57, %v909_v10 }
 0x149   : > { %2021 = vst.msk [vmem:[%s3016_s17 + $0x10] sm:$0xff] %vm346_vm1, %v2013_v53  ;;  %v2014_v61 = vmax.f32 %v2006_v54, 0.0  ;;  %v1971_v63 = vadd.f32 %v2268_v9, %v1956_v55  ;;  %v1957_v1 = vmul.f32 %v2434_v56, %v2267_v62  ;;  %v1987_v7 = vmul.f32 %v2427_v41, %v2999_v19 }
 0x14a   : > { %2019 = vst.msk [vmem:[%s3016_s17] sm:$0xff] %vm346_vm1, %v2011_v58  ;;  %v2012_v2 = vmax.f32 %v2004_v59, 0.0  ;;  %v1969_v3 = vadd.f32 %v2268_v9, %v1954_v12  ;;  %v1955_v4 = vmul.f32 %v2435_v60, %v2267_v62 }
 0x14b   : > { %2022 = vst.msk [vmem:[%s3016_s17 + $0x18] sm:$0xff] %vm346_vm1, %v2014_v61  ;;  %v1994_v8 = vadd.f32 %v1986_v46, %v1971_v63  ;;  %v1972_v5 = vadd.f32 %v2268_v9, %v1957_v1 }
 0x14c   : > { %2020 = vst.msk [vmem:[%s3016_s17 + $0x8] sm:$0xff] %vm346_vm1, %v2012_v2  ;;  %v1992_v10 = vadd.f32 %v1984_v52, %v1969_v3  ;;  %v1970_v16 = vadd.f32 %v2268_v9, %v1955_v4 }
 0x14d   : > { %v2009_v18 = vadd.f32 %v2270_v32, %v1994_v8  ;;  %v1995_v20 = vadd.f32 %v1987_v7, %v1972_v5 }
 0x14e   : > { %v2007_v21 = vadd.f32 %v2270_v32, %v1992_v10  ;;  %v1993_v62 = vadd.f32 %v1985_v17, %v1970_v16 }
 0x14f   : > { %v2017_v0 = vmax.f32 %v2009_v18, 0.0  ;;  %v2010_v22 = vadd.f32 %v2270_v32, %v1995_v20 }
 0x150   : > { %v2015_v23 = vmax.f32 %v2007_v21, 0.0  ;;  %v2008_v15 = vadd.f32 %v2270_v32, %v1993_v62 }
 0x151   : > { %2025 = vst.msk [vmem:[%s3016_s17 + $0x30] sm:$0xff] %vm346_vm1, %v2017_v0  ;;  %v2018_v9 = vmax.f32 %v2010_v22, 0.0 }
 0x152   : > { %2023 = vst.msk [vmem:[%s3016_s17 + $0x20] sm:$0xff] %vm346_vm1, %v2015_v23  ;;  %v2016_v19 = vmax.f32 %v2008_v15, 0.0 }
 0x153   : > { %2026 = vst.msk [vmem:[%s3016_s17 + $0x38] sm:$0xff] %vm346_vm1, %v2018_v9 }
 0x154   : > { %2024 = vst.msk [vmem:[%s3016_s17 + $0x28] sm:$0xff] %vm346_vm1, %v2016_v19 }
 0x155   : > { %2573 = shalt.err (!%p2570_p3)
}
 0x156   : > { %s2574_s10 = scalar_lea.hbm %s3035_s22, 1024  ;;  %s2578_s17 = scalar_lea.hbm %s3096_s8, 2048 }
 0x157   : > { %p2575_p4 = scmp.ne.s32.totalorder %s3035_s22, %s2574_s10  ;;  %p2579_p9 = scmp.lt.u32.totalorder %s3035_s22, %s3096_s8 }
 0x158   : > { %p2580_p10 = scmp.lt.u32.totalorder %s2578_s17, %s2574_s10  ;;  %p2582_p12 = scmp.lt.u32.totalorder %s2574_s10, %s3035_s22 }
 0x159   : > { %p2576_p7 = pnand %p2575_p4, %p2710_p5 }
 0x15a   : > { %p2581_p11 = por %p2580_p10, %p2579_p9 }
 0x15b   : > { %p2577_p8 = pneg %p2576_p7 }
 0x15c   : > { %p2583_p13 = por %p2582_p12, %p2581_p11 }
 0x15e   : > { %p2584_p0 = pnand %p2583_p13, %p2577_p8 }
 0x160   : > { %2587 = shalt.err (!%p2584_p0)
}
 0x161   : > { %s2625_s21 = smov 128   ;;  %s2626_s24 = smov 8  }
 0x162   : > { %2503 = dma.vmem_to_hbm [thread:$0]  (%p2710_p5), %s3037_s19, 1024, %s3035_s22, %s3047_s9, %s2625_s21, %s2625_s21, %s2626_s24  }
 0x163 PF: > { %p2509_p1 = scmp.ge.s32.totalorder %s2622_s30, 2  ;;  %s2056_s25 = sand.u32 1, %s2610_s27  }
 0x164   : > { %s2057_s26 = scalar_lea.sflag [#allocation4], %s2056_s25 }
 0x165   : > { %p2506_p2 = pnand %p2509_p1, %p2714_p6 }
 0x167   : > { %2605 = dma.done.wait (!%p2506_p2), %s2057_s26, 1024  }
 0x168   : > { %2607 = vsyncadd (!%p2506_p2), %s2057_s26, 4294966272  ;;  %p18_p3 = scmp.ge.s32.totalorder %s2697_s11, 4   ;;  %s3099_s27 = smov %s2614_s28 }
 0x169   : > { %s3100_s28 = smov %s2618_s29  ;;  %s3101_s29 = smov %s2708_s14 }
 0x16a   : > { %s3102_s30 = smov %s2697_s11  ;;  %20 = sbr.rel (!%p18_p3) target bundleno = 3 (0x3), region = 100 }
 0x171   :  { %2062 = vsyncpa [#allocation4], 1 }
 0x172   :  { %2064 = vsyncpa [#allocation4 + $0x1], 1 }

</bundles_post_ra>
